<compile_context>
chip_gen: v7x
topology: tpu7x:2x2x1
jax: 0.10.0
libtpu: 0.0.40
codegen_flags: <defaults>
</compile_context>

<pallas_src>
import jax
import jax.numpy as jnp
import numpy as np
from jax.experimental import pallas as pl
from jax.experimental.pallas import tpu as pltpu

D_MIX = 10  # "d" hidden size of DynaMixerOperation (module default)


# ----------------------------- kernel ---------------------------------------
def _mix(xf, wf_ref, bf_ref, gg_ref, r_ref, t_ref, g_ref):
    """One DynaMixerOperation over a flat (M, N*C) frame.

    xf[m, n*C + c] = sequence element n, channel c of sequence m.
    Returns Y[m, j*C + c] = sum_s softmax_s(logits[m, j, s]) * xf[m, s*C + c].
    Logit lane order is q = j*N + s (softmax groups are contiguous N-lane runs).
    """
    # folded fc_ND @ fc_Nd: one lane-dense matmul for all sequences in the block
    logits = jnp.dot(xf, wf_ref[...],
                     preferred_element_type=jnp.float32) + bf_ref[...]      # (M, N*N)
    # grouped softmax over s: a per-row max shift is shared by every group, so
    # each group's softmax is unchanged (exact invariance).
    logits = logits - jnp.max(logits, axis=-1, keepdims=True)
    e = jnp.exp(logits)
    # per-group sums broadcast back to every lane of the group: one matmul with
    # the constant block matrix GG = kron(I_N, ones(N, N)).
    denom = jnp.dot(e, gg_ref[...], preferred_element_type=jnp.float32)
    p = e * pl.reciprocal(denom, approx=True)                               # (M, N*N)
    # value mixing via constant expansion matrices (pure MXU, bf16 operands):
    #   p_exp[m, (jN+s)*C + c] = p[m, jN+s]          (R = kron(I_{N*N}, 1_{1xC}))
    #   x_exp[m, (jN+s)*C + c] = xf[m, sC+c]         (T = kron(1_{1xN}, I_{NC}))
    #   Y = (p_exp * x_exp) @ G  (G sums over s)     (G = kron(I_N, kron(1_{Nx1}, I_C)))
    p_exp = jnp.dot(p.astype(jnp.bfloat16), r_ref[...],
                    preferred_element_type=jnp.float32)                     # (M, N*N*C)
    x_exp = jnp.dot(xf.astype(jnp.bfloat16), t_ref[...],
                    preferred_element_type=jnp.float32)                     # (M, N*N*C)
    return jnp.dot(p_exp * x_exp, g_ref[...],
                   preferred_element_type=jnp.float32)                      # (M, N*C)


def dynamixer_block_kernel(xr_ref, xc_ref,
                           wfh_ref, bfh_ref, ggw_ref, rw_ref, tw_ref, gw_ref,
                           wfw_ref, bfw_ref, ggh_ref, rh_ref, th_ref, gh_ref,
                           wokw_ref, wcokw_ref, ball_ref, wokh_ref,
                           orow_ref, ocol_ref):
    # xr_ref : (BB*H, W*C)  row frame, lane order j*C + c
    # xc_ref : (BB*W, H*C)  column frame, lane order r*C + c
    xr = xr_ref[...]
    xc = xc_ref[...]

    # row mixer (op_h): out_row = Yh @ Wo + X @ (Wc @ Wo) + (bc @ Wo + bo)
    yh = _mix(xr, wfh_ref, bfh_ref, ggw_ref, rw_ref, tw_ref, gw_ref)        # (BB*H, W*C)
    orow_ref[...] = (
        jnp.dot(yh, wokw_ref[...], preferred_element_type=jnp.float32)
        + jnp.dot(xr, wcokw_ref[...], preferred_element_type=jnp.float32)
        + ball_ref[...])

    # column mixer (op_w): out_col = Yw @ Wo, emitted in the column frame
    yw = _mix(xc, wfw_ref, bfw_ref, ggh_ref, rh_ref, th_ref, gh_ref)        # (BB*W, H*C)
    ocol_ref[...] = jnp.dot(yw, wokh_ref[...], preferred_element_type=jnp.float32)


# --------------------------- constant preparation ---------------------------
def _fold_mixer(w_nd, b_nd, w_ndd, b_ndd, N, C):
    """Fold fc_ND into fc_Nd (in f32): logits = Xflat @ wfold + bfold."""
    d = w_nd.shape[0]
    w2 = w_ndd.reshape(N * N, N, d)                                         # [q, n, k]
    wfold = jnp.einsum('qnk,kc->ncq', w2, w_nd).reshape(N * C, N * N)
    bfold = (jnp.einsum('qnk,k->q', w2, b_nd) + b_ndd).reshape(1, N * N)
    return wfold.astype(jnp.float32), bfold.astype(jnp.float32)


def _structural(N, C):
    """Constant 0/1 matrices for the grouped softmax and value mixing."""
    gg = np.kron(np.eye(N, dtype=np.float32), np.ones((N, N), np.float32))        # (N^2, N^2)
    r = np.kron(np.eye(N * N, dtype=np.float32), np.ones((1, C), np.float32))     # (N^2, N^2*C)
    t = np.kron(np.ones((1, N), np.float32), np.eye(N * C, dtype=np.float32))     # (N*C, N^2*C)
    g = np.kron(np.eye(N, dtype=np.float32),
                np.kron(np.ones((N, 1), np.float32), np.eye(C, dtype=np.float32)))  # (N^2*C, N*C)
    return (jnp.asarray(gg, jnp.float32), jnp.asarray(r, jnp.bfloat16),
            jnp.asarray(t, jnp.bfloat16), jnp.asarray(g, jnp.float32))


def prepare_dynamixer_constants(params, C, H, W):
    """Fold weights + build structural matrices ONCE (cache across forwards)."""
    wfh, bfh = _fold_mixer(params['w_nd_h'], params['b_nd_h'],
                           params['w_ndd_h'], params['b_ndd_h'], W, C)
    wfw, bfw = _fold_mixer(params['w_nd_w'], params['b_nd_w'],
                           params['w_ndd_w'], params['b_ndd_w'], H, C)
    ggw, rw, tw, gw = _structural(W, C)
    ggh, rh, th, gh = _structural(H, C)

    # 1x1 convs in "y = x @ W" orientation; proj_c folded into proj_o (f32).
    wo = params['w_o'].reshape(C, C).T.astype(jnp.float32)
    wc = params['w_c'].reshape(C, C).T.astype(jnp.float32)
    eye_w = jnp.eye(W, dtype=jnp.float32)
    eye_h = jnp.eye(H, dtype=jnp.float32)
    wokw = jnp.kron(eye_w, wo)                                              # (W*C, W*C)
    wcokw = jnp.kron(eye_w, wc @ wo)                                        # (W*C, W*C)
    wokh = jnp.kron(eye_h, wo)                                              # (H*C, H*C)
    ball = (params['b_c'].reshape(1, C) @ wo
            + params['b_o'].reshape(1, C)).astype(jnp.float32)
    ball_row = jnp.tile(ball, (1, W))                                       # (1, W*C)

    return (wfh, bfh, ggw, rw, tw, gw,
            wfw, bfw, ggh, rh, th, gh,
            wokw, wcokw, ball_row, wokh)


# ------------------------------- wrapper -------------------------------------
def _pick_bb(B, max_bb=8):
    for bb in range(min(B, max_bb), 0, -1):
        if B % bb == 0:
            return bb
    return 1


def dynamixer_block(x_nchw, consts, max_bb=8):
    """Forward pass of DynaMixerBlock. Input/output are NCHW like PyTorch."""
    B, C, H, W = x_nchw.shape
    BB = _pick_bb(B, max_bb)
    grid = (B // BB,)

    # Flat lane-dense activation frames (plain-XLA layout plumbing).
    x_nhwc = jnp.transpose(x_nchw, (0, 2, 3, 1)).astype(jnp.float32)        # (B, H, W, C)
    xr2 = x_nhwc.reshape(B * H, W * C)                                      # row frame
    xt_nhwc = jnp.transpose(x_nchw, (0, 3, 2, 1)).astype(jnp.float32)       # (B, W, H, C)
    xc2 = xt_nhwc.reshape(B * W, H * C)                                     # column frame

    def act_spec(rows, cols):
        return pl.BlockSpec((rows, cols), lambda g: (g, 0))

    def const_spec(arr):
        return pl.BlockSpec(arr.shape, lambda g: (0, 0))

    in_specs = [act_spec(BB * H, W * C), act_spec(BB * W, H * C)]
    in_specs += [const_spec(a) for a in consts]

    out_shape = (jax.ShapeDtypeStruct((B * H, W * C), jnp.float32),
                 jax.ShapeDtypeStruct((B * W, H * C), jnp.float32))
    out_specs = (act_spec(BB * H, W * C), act_spec(BB * W, H * C))

    # advisory cost estimate for the XLA scheduler
    def _mix_macs(rows, N):
        return rows * (N * C * N * N            # folded logits
                       + N * N * N * N          # group-sum denominator
                       + N * N * N * N * C      # p expansion
                       + N * C * N * N * C      # x expansion
                       + N * N * C * N * C)     # value reduction
    macs = (_mix_macs(B * H, W) + _mix_macs(B * W, H)
            + 3 * B * H * W * C * C)            # projections
    transcendentals = 2 * B * (H * W * W + W * H * H)   # exp + approx reciprocal
    bytes_accessed = int(xr2.size * 4 + xc2.size * 4 + 2 * B * H * W * C * 4
                         + sum(int(np.prod(a.shape)) * a.dtype.itemsize for a in consts))
    cost = pl.CostEstimate(flops=int(2 * macs),
                           transcendentals=int(transcendentals),
                           bytes_accessed=bytes_accessed)

    out_row, out_col = pl.pallas_call(
        dynamixer_block_kernel,
        out_shape=out_shape,
        grid=grid,
        in_specs=in_specs,
        out_specs=out_specs,
        compiler_params=pltpu.CompilerParams(
            dimension_semantics=("parallel",)),     # images are independent
        cost_estimate=cost,
    )(xr2, xc2, *consts)

    # Combine the two frames (8 KB transpose+add, fused by XLA) and go NCHW.
    out_nhwc = (out_row.reshape(B, H, W, C)
                + jnp.transpose(out_col.reshape(B, W, H, C), (0, 2, 1, 3)))
    return jnp.transpose(out_nhwc, (0, 3, 1, 2))


# ----------------------------- parameters -----------------------------------
def make_params(key, channels, h, w, d=D_MIX):
    C = channels
    ks = jax.random.split(key, 6)

    def lin(k, out_f, in_f):
        kw, kb = jax.random.split(k)
        s = 1.0 / np.sqrt(in_f)
        return (jax.random.uniform(kw, (out_f, in_f), jnp.float32, -s, s),
                jax.random.uniform(kb, (out_f,), jnp.float32, -s, s))

    w_nd_h, b_nd_h = lin(ks[0], d, C)            # op_h.fc_ND  (N = w)
    w_ndd_h, b_ndd_h = lin(ks[1], w * w, w * d)  # op_h.fc_Nd
    w_nd_w, b_nd_w = lin(ks[2], d, C)            # op_w.fc_ND  (N = h)
    w_ndd_w, b_ndd_w = lin(ks[3], h * h, h * d)  # op_w.fc_Nd
    wc2, b_c = lin(ks[4], C, C)                  # proj_c (1x1 conv)
    wo2, b_o = lin(ks[5], C, C)                  # proj_o (1x1 conv)
    return dict(w_nd_h=w_nd_h, b_nd_h=b_nd_h, w_ndd_h=w_ndd_h, b_ndd_h=b_ndd_h,
                w_nd_w=w_nd_w, b_nd_w=b_nd_w, w_ndd_w=w_ndd_w, b_ndd_w=b_ndd_w,
                w_c=wc2.reshape(C, C, 1, 1), b_c=b_c,
                w_o=wo2.reshape(C, C, 1, 1), b_o=b_o)


# ------------------------- pure-JAX reference --------------------------------
def _dyna_op_ref(x_gdn, w_nd, b_nd, w_ndd, b_ndd, d):
    G, D, N = x_gdn.shape
    xt = jnp.transpose(x_gdn, (0, 2, 1))                 # (G, N, D)
    p = xt @ w_nd.T + b_nd                               # (G, N, d)
    p = p.reshape(G, N * d) @ w_ndd.T + b_ndd            # (G, N*N)
    p = jax.nn.softmax(p.reshape(G, N, N), axis=2)
    out = jnp.einsum('gns,gsd->gnd', p, xt)
    return jnp.transpose(out, (0, 2, 1))                 # (G, D, N)


def dynamixer_block_ref(x_nchw, params, d=D_MIX):
    B, C, H, W = x_nchw.shape
    rows = jnp.transpose(x_nchw, (0, 2, 1, 3)).reshape(B * H, C, W)
    yh = _dyna_op_ref(rows, params['w_nd_h'], params['b_nd_h'],
                      params['w_ndd_h'], params['b_ndd_h'], d)
    yh = jnp.transpose(yh.reshape(B, H, C, W), (0, 2, 1, 3))
    cols = jnp.transpose(x_nchw, (0, 3, 1, 2)).reshape(B * W, C, H)
    yw = _dyna_op_ref(cols, params['w_nd_w'], params['b_nd_w'],
                      params['w_ndd_w'], params['b_ndd_w'], d)
    yw = jnp.transpose(yw.reshape(B, W, C, H), (0, 2, 3, 1))
    wc2 = params['w_c'].reshape(C, C)
    yc = jnp.einsum('oc,bchw->bohw', wc2, x_nchw) + params['b_c'].reshape(1, C, 1, 1)
    y = yh + yw + yc
    wo2 = params['w_o'].reshape(C, C)
    return jnp.einsum('oc,bchw->bohw', wo2, y) + params['b_o'].reshape(1, C, 1, 1)


if __name__ == "__main__":
    key = jax.random.PRNGKey(0)
    kx, kp = jax.random.split(key)
    B, C, H, W = 2, 4, 16, 16
    x = jax.random.normal(kx, (B, C, H, W), jnp.float32)
    params = make_params(kp, C, H, W)

    # constants are prepared once and reused across forward calls
    consts = prepare_dynamixer_constants(params, C, H, W)

    fwd = jax.jit(dynamixer_block)
    out = jax.block_until_ready(fwd(x, consts))

    ref = dynamixer_block_ref(x, params)
    assert out.shape == (B, C, H, W)
    err = float(jnp.max(jnp.abs(out - ref)))
    # Tolerance: bf16 operands on the value-mixing matmuls plus the approx
    # softmax reciprocal bound the per-element error at ~1-2e-2 of the O(1)
    # activations (logits/softmax/projections stay f32).
    assert err < 3e-2, f"max abs err {err}"
    print("KERNEL_OK")
</pallas_src>

<mosaic_0001>
module attributes {stable_mosaic.version = 11 : i64} {
  func.func @dynamixer_block_kernel(%arg0: i32, %arg1: memref<32x64xf32, #tpu.memory_space<vmem>>, %arg2: memref<32x64xf32, #tpu.memory_space<vmem>>, %arg3: memref<64x256xf32, #tpu.memory_space<vmem>>, %arg4: memref<1x256xf32, #tpu.memory_space<vmem>>, %arg5: memref<256x256xf32, #tpu.memory_space<vmem>>, %arg6: memref<256x1024xbf16, #tpu.memory_space<vmem>>, %arg7: memref<64x1024xbf16, #tpu.memory_space<vmem>>, %arg8: memref<1024x64xf32, #tpu.memory_space<vmem>>, %arg9: memref<64x256xf32, #tpu.memory_space<vmem>>, %arg10: memref<1x256xf32, #tpu.memory_space<vmem>>, %arg11: memref<256x256xf32, #tpu.memory_space<vmem>>, %arg12: memref<256x1024xbf16, #tpu.memory_space<vmem>>, %arg13: memref<64x1024xbf16, #tpu.memory_space<vmem>>, %arg14: memref<1024x64xf32, #tpu.memory_space<vmem>>, %arg15: memref<64x64xf32, #tpu.memory_space<vmem>>, %arg16: memref<64x64xf32, #tpu.memory_space<vmem>>, %arg17: memref<1x64xf32, #tpu.memory_space<vmem>>, %arg18: memref<64x64xf32, #tpu.memory_space<vmem>>, %arg19: memref<32x64xf32, #tpu.memory_space<vmem>>, %arg20: memref<32x64xf32, #tpu.memory_space<vmem>>) attributes {dimension_semantics = [#tpu.dimension_semantics<parallel>], iteration_bounds = array<i64: 1>, scalar_prefetch = 0 : i64, scratch_operands = 0 : i64, tpu.core_type = #tpu.core_type<tc>, window_params = [{transform_indices = @transform_0, window_bounds = array<i64: 32, 64>}, {transform_indices = @transform_1, window_bounds = array<i64: 32, 64>}, {pipeline_mode = #tpu.pipeline_mode<synchronous>, transform_indices = @transform_2, window_bounds = array<i64: 64, 256>}, {pipeline_mode = #tpu.pipeline_mode<synchronous>, transform_indices = @transform_3, window_bounds = array<i64: 1, 256>}, {pipeline_mode = #tpu.pipeline_mode<synchronous>, transform_indices = @transform_4, window_bounds = array<i64: 256, 256>}, {pipeline_mode = #tpu.pipeline_mode<synchronous>, transform_indices = @transform_5, window_bounds = array<i64: 256, 1024>}, {pipeline_mode = #tpu.pipeline_mode<synchronous>, transform_indices = @transform_6, window_bounds = array<i64: 64, 1024>}, {pipeline_mode = #tpu.pipeline_mode<synchronous>, transform_indices = @transform_7, window_bounds = array<i64: 1024, 64>}, {pipeline_mode = #tpu.pipeline_mode<synchronous>, transform_indices = @transform_8, window_bounds = array<i64: 64, 256>}, {pipeline_mode = #tpu.pipeline_mode<synchronous>, transform_indices = @transform_9, window_bounds = array<i64: 1, 256>}, {pipeline_mode = #tpu.pipeline_mode<synchronous>, transform_indices = @transform_10, window_bounds = array<i64: 256, 256>}, {pipeline_mode = #tpu.pipeline_mode<synchronous>, transform_indices = @transform_11, window_bounds = array<i64: 256, 1024>}, {pipeline_mode = #tpu.pipeline_mode<synchronous>, transform_indices = @transform_12, window_bounds = array<i64: 64, 1024>}, {pipeline_mode = #tpu.pipeline_mode<synchronous>, transform_indices = @transform_13, window_bounds = array<i64: 1024, 64>}, {pipeline_mode = #tpu.pipeline_mode<synchronous>, transform_indices = @transform_14, window_bounds = array<i64: 64, 64>}, {pipeline_mode = #tpu.pipeline_mode<synchronous>, transform_indices = @transform_15, window_bounds = array<i64: 64, 64>}, {pipeline_mode = #tpu.pipeline_mode<synchronous>, transform_indices = @transform_16, window_bounds = array<i64: 1, 64>}, {pipeline_mode = #tpu.pipeline_mode<synchronous>, transform_indices = @transform_17, window_bounds = array<i64: 64, 64>}, {transform_indices = @transform_18, window_bounds = array<i64: 32, 64>}, {transform_indices = @transform_19, window_bounds = array<i64: 32, 64>}]} {
    %c0 = arith.constant 0 : index
    %c0_0 = arith.constant 0 : index
    %0 = vector.load %arg1[%c0, %c0_0] : memref<32x64xf32, #tpu.memory_space<vmem>>, vector<32x64xf32>
    %c0_1 = arith.constant 0 : index
    %c0_2 = arith.constant 0 : index
    %1 = vector.load %arg2[%c0_1, %c0_2] : memref<32x64xf32, #tpu.memory_space<vmem>>, vector<32x64xf32>
    %c0_3 = arith.constant 0 : index
    %c0_4 = arith.constant 0 : index
    %2 = vector.load %arg3[%c0_3, %c0_4] : memref<64x256xf32, #tpu.memory_space<vmem>>, vector<64x256xf32>
    %cst = arith.constant dense<0.000000e+00> : vector<32x256xf32>
    %3 = tpu.matmul %0, %2, %cst {dimension_numbers = #tpu.dot_dimension_numbers<[1], [0], [0], [1], [0, 0, 1, 1], [], []>} : vector<32x64xf32>, vector<64x256xf32>, vector<32x256xf32> -> vector<32x256xf32>
    %c0_5 = arith.constant 0 : index
    %c0_6 = arith.constant 0 : index
    %4 = vector.load %arg4[%c0_5, %c0_6] : memref<1x256xf32, #tpu.memory_space<vmem>>, vector<1x256xf32>
    %5 = vector.broadcast %4 : vector<1x256xf32> to vector<32x256xf32>
    %6 = arith.addf %3, %5 : vector<32x256xf32>
    %cst_7 = arith.constant dense<0xFF800000> : vector<32xf32>
    %7 = vector.multi_reduction <maximumf>, %6, %cst_7 [1] : vector<32x256xf32> to vector<32xf32>
    %8 = vector.shape_cast %7 : vector<32xf32> to vector<32x1xf32>
    %9 = vector.broadcast %8 : vector<32x1xf32> to vector<32x256xf32>
    %10 = arith.subf %6, %9 : vector<32x256xf32>
    %11 = math.exp %10 : vector<32x256xf32>
    %c0_8 = arith.constant 0 : index
    %c0_9 = arith.constant 0 : index
    %12 = vector.load %arg5[%c0_8, %c0_9] : memref<256x256xf32, #tpu.memory_space<vmem>>, vector<256x256xf32>
    %cst_10 = arith.constant dense<0.000000e+00> : vector<32x256xf32>
    %13 = tpu.matmul %11, %12, %cst_10 {dimension_numbers = #tpu.dot_dimension_numbers<[1], [0], [0], [1], [0, 0, 1, 1], [], []>} : vector<32x256xf32>, vector<256x256xf32>, vector<32x256xf32> -> vector<32x256xf32>
    %14 = tpu.reciprocal %13 {approx = true} : vector<32x256xf32> -> vector<32x256xf32>
    %15 = arith.mulf %11, %14 : vector<32x256xf32>
    %16 = arith.truncf %15 : vector<32x256xf32> to vector<32x256xbf16>
    %c0_11 = arith.constant 0 : index
    %c0_12 = arith.constant 0 : index
    %17 = vector.load %arg6[%c0_11, %c0_12] : memref<256x1024xbf16, #tpu.memory_space<vmem>>, vector<256x1024xbf16>
    %cst_13 = arith.constant dense<0.000000e+00> : vector<32x1024xf32>
    %18 = tpu.matmul %16, %17, %cst_13 {dimension_numbers = #tpu.dot_dimension_numbers<[1], [0], [0], [1], [0, 0, 1, 1], [], []>} : vector<32x256xbf16>, vector<256x1024xbf16>, vector<32x1024xf32> -> vector<32x1024xf32>
    %19 = arith.truncf %0 : vector<32x64xf32> to vector<32x64xbf16>
    %c0_14 = arith.constant 0 : index
    %c0_15 = arith.constant 0 : index
    %20 = vector.load %arg7[%c0_14, %c0_15] : memref<64x1024xbf16, #tpu.memory_space<vmem>>, vector<64x1024xbf16>
    %cst_16 = arith.constant dense<0.000000e+00> : vector<32x1024xf32>
    %21 = tpu.matmul %19, %20, %cst_16 {dimension_numbers = #tpu.dot_dimension_numbers<[1], [0], [0], [1], [0, 0, 1, 1], [], []>} : vector<32x64xbf16>, vector<64x1024xbf16>, vector<32x1024xf32> -> vector<32x1024xf32>
    %22 = arith.mulf %18, %21 : vector<32x1024xf32>
    %c0_17 = arith.constant 0 : index
    %c0_18 = arith.constant 0 : index
    %23 = vector.load %arg8[%c0_17, %c0_18] : memref<1024x64xf32, #tpu.memory_space<vmem>>, vector<1024x64xf32>
    %cst_19 = arith.constant dense<0.000000e+00> : vector<32x64xf32>
    %24 = tpu.matmul %22, %23, %cst_19 {dimension_numbers = #tpu.dot_dimension_numbers<[1], [0], [0], [1], [0, 0, 1, 1], [], []>} : vector<32x1024xf32>, vector<1024x64xf32>, vector<32x64xf32> -> vector<32x64xf32>
    %c0_20 = arith.constant 0 : index
    %c0_21 = arith.constant 0 : index
    %25 = vector.load %arg15[%c0_20, %c0_21] : memref<64x64xf32, #tpu.memory_space<vmem>>, vector<64x64xf32>
    %cst_22 = arith.constant dense<0.000000e+00> : vector<32x64xf32>
    %26 = tpu.matmul %24, %25, %cst_22 {dimension_numbers = #tpu.dot_dimension_numbers<[1], [0], [0], [1], [0, 0, 1, 1], [], []>} : vector<32x64xf32>, vector<64x64xf32>, vector<32x64xf32> -> vector<32x64xf32>
    %c0_23 = arith.constant 0 : index
    %c0_24 = arith.constant 0 : index
    %27 = vector.load %arg16[%c0_23, %c0_24] : memref<64x64xf32, #tpu.memory_space<vmem>>, vector<64x64xf32>
    %cst_25 = arith.constant dense<0.000000e+00> : vector<32x64xf32>
    %28 = tpu.matmul %0, %27, %cst_25 {dimension_numbers = #tpu.dot_dimension_numbers<[1], [0], [0], [1], [0, 0, 1, 1], [], []>} : vector<32x64xf32>, vector<64x64xf32>, vector<32x64xf32> -> vector<32x64xf32>
    %29 = arith.addf %26, %28 : vector<32x64xf32>
    %c0_26 = arith.constant 0 : index
    %c0_27 = arith.constant 0 : index
    %30 = vector.load %arg17[%c0_26, %c0_27] : memref<1x64xf32, #tpu.memory_space<vmem>>, vector<1x64xf32>
    %31 = vector.broadcast %30 : vector<1x64xf32> to vector<32x64xf32>
    %32 = arith.addf %29, %31 : vector<32x64xf32>
    %c0_28 = arith.constant 0 : index
    %c0_29 = arith.constant 0 : index
    %33 = vector.load %arg19[%c0_28, %c0_29] : memref<32x64xf32, #tpu.memory_space<vmem>>, vector<32x64xf32>
    tpu.vector_store %arg19[%c0_28, %c0_29], %32 {strides = array<i32>} : memref<32x64xf32, #tpu.memory_space<vmem>>, vector<32x64xf32>,
    %c0_30 = arith.constant 0 : index
    %c0_31 = arith.constant 0 : index
    %34 = vector.load %arg9[%c0_30, %c0_31] : memref<64x256xf32, #tpu.memory_space<vmem>>, vector<64x256xf32>
    %cst_32 = arith.constant dense<0.000000e+00> : vector<32x256xf32>
    %35 = tpu.matmul %1, %34, %cst_32 {dimension_numbers = #tpu.dot_dimension_numbers<[1], [0], [0], [1], [0, 0, 1, 1], [], []>} : vector<32x64xf32>, vector<64x256xf32>, vector<32x256xf32> -> vector<32x256xf32>
    %c0_33 = arith.constant 0 : index
    %c0_34 = arith.constant 0 : index
    %36 = vector.load %arg10[%c0_33, %c0_34] : memref<1x256xf32, #tpu.memory_space<vmem>>, vector<1x256xf32>
    %37 = vector.broadcast %36 : vector<1x256xf32> to vector<32x256xf32>
    %38 = arith.addf %35, %37 : vector<32x256xf32>
    %cst_35 = arith.constant dense<0xFF800000> : vector<32xf32>
    %39 = vector.multi_reduction <maximumf>, %38, %cst_35 [1] : vector<32x256xf32> to vector<32xf32>
    %40 = vector.shape_cast %39 : vector<32xf32> to vector<32x1xf32>
    %41 = vector.broadcast %40 : vector<32x1xf32> to vector<32x256xf32>
    %42 = arith.subf %38, %41 : vector<32x256xf32>
    %43 = math.exp %42 : vector<32x256xf32>
    %c0_36 = arith.constant 0 : index
    %c0_37 = arith.constant 0 : index
    %44 = vector.load %arg11[%c0_36, %c0_37] : memref<256x256xf32, #tpu.memory_space<vmem>>, vector<256x256xf32>
    %cst_38 = arith.constant dense<0.000000e+00> : vector<32x256xf32>
    %45 = tpu.matmul %43, %44, %cst_38 {dimension_numbers = #tpu.dot_dimension_numbers<[1], [0], [0], [1], [0, 0, 1, 1], [], []>} : vector<32x256xf32>, vector<256x256xf32>, vector<32x256xf32> -> vector<32x256xf32>
    %46 = tpu.reciprocal %45 {approx = true} : vector<32x256xf32> -> vector<32x256xf32>
    %47 = arith.mulf %43, %46 : vector<32x256xf32>
    %48 = arith.truncf %47 : vector<32x256xf32> to vector<32x256xbf16>
    %c0_39 = arith.constant 0 : index
    %c0_40 = arith.constant 0 : index
    %49 = vector.load %arg12[%c0_39, %c0_40] : memref<256x1024xbf16, #tpu.memory_space<vmem>>, vector<256x1024xbf16>
    %cst_41 = arith.constant dense<0.000000e+00> : vector<32x1024xf32>
    %50 = tpu.matmul %48, %49, %cst_41 {dimension_numbers = #tpu.dot_dimension_numbers<[1], [0], [0], [1], [0, 0, 1, 1], [], []>} : vector<32x256xbf16>, vector<256x1024xbf16>, vector<32x1024xf32> -> vector<32x1024xf32>
    %51 = arith.truncf %1 : vector<32x64xf32> to vector<32x64xbf16>
    %c0_42 = arith.constant 0 : index
    %c0_43 = arith.constant 0 : index
    %52 = vector.load %arg13[%c0_42, %c0_43] : memref<64x1024xbf16, #tpu.memory_space<vmem>>, vector<64x1024xbf16>
    %cst_44 = arith.constant dense<0.000000e+00> : vector<32x1024xf32>
    %53 = tpu.matmul %51, %52, %cst_44 {dimension_numbers = #tpu.dot_dimension_numbers<[1], [0], [0], [1], [0, 0, 1, 1], [], []>} : vector<32x64xbf16>, vector<64x1024xbf16>, vector<32x1024xf32> -> vector<32x1024xf32>
    %54 = arith.mulf %50, %53 : vector<32x1024xf32>
    %c0_45 = arith.constant 0 : index
    %c0_46 = arith.constant 0 : index
    %55 = vector.load %arg14[%c0_45, %c0_46] : memref<1024x64xf32, #tpu.memory_space<vmem>>, vector<1024x64xf32>
    %cst_47 = arith.constant dense<0.000000e+00> : vector<32x64xf32>
    %56 = tpu.matmul %54, %55, %cst_47 {dimension_numbers = #tpu.dot_dimension_numbers<[1], [0], [0], [1], [0, 0, 1, 1], [], []>} : vector<32x1024xf32>, vector<1024x64xf32>, vector<32x64xf32> -> vector<32x64xf32>
    %c0_48 = arith.constant 0 : index
    %c0_49 = arith.constant 0 : index
    %57 = vector.load %arg18[%c0_48, %c0_49] : memref<64x64xf32, #tpu.memory_space<vmem>>, vector<64x64xf32>
    %cst_50 = arith.constant dense<0.000000e+00> : vector<32x64xf32>
    %58 = tpu.matmul %56, %57, %cst_50 {dimension_numbers = #tpu.dot_dimension_numbers<[1], [0], [0], [1], [0, 0, 1, 1], [], []>} : vector<32x64xf32>, vector<64x64xf32>, vector<32x64xf32> -> vector<32x64xf32>
    %c0_51 = arith.constant 0 : index
    %c0_52 = arith.constant 0 : index
    %59 = vector.load %arg20[%c0_51, %c0_52] : memref<32x64xf32, #tpu.memory_space<vmem>>, vector<32x64xf32>
    tpu.vector_store %arg20[%c0_51, %c0_52], %58 {strides = array<i32>} : memref<32x64xf32, #tpu.memory_space<vmem>>, vector<32x64xf32>,
    return
  }
  func.func @transform_0(%arg0: i32) -> (i32, i32) {
    %c0_i32 = arith.constant 0 : i32
    %c0_i32_0 = arith.constant 0 : i32
    return %arg0, %c0_i32 : i32, i32
  }
  func.func @transform_1(%arg0: i32) -> (i32, i32) {
    %c0_i32 = arith.constant 0 : i32
    %c0_i32_0 = arith.constant 0 : i32
    return %arg0, %c0_i32 : i32, i32
  }
  func.func @transform_2(%arg0: i32) -> (i32, i32) {
    %c0_i32 = arith.constant 0 : i32
    %c0_i32_0 = arith.constant 0 : i32
    %c0_i32_1 = arith.constant 0 : i32
    return %c0_i32, %c0_i32_0 : i32, i32
  }
  func.func @transform_3(%arg0: i32) -> (i32, i32) {
    %c0_i32 = arith.constant 0 : i32
    %c0_i32_0 = arith.constant 0 : i32
    %c0_i32_1 = arith.constant 0 : i32
    return %c0_i32, %c0_i32_0 : i32, i32
  }
  func.func @transform_4(%arg0: i32) -> (i32, i32) {
    %c0_i32 = arith.constant 0 : i32
    %c0_i32_0 = arith.constant 0 : i32
    %c0_i32_1 = arith.constant 0 : i32
    return %c0_i32, %c0_i32_0 : i32, i32
  }
  func.func @transform_5(%arg0: i32) -> (i32, i32) {
    %c0_i32 = arith.constant 0 : i32
    %c0_i32_0 = arith.constant 0 : i32
    %c0_i32_1 = arith.constant 0 : i32
    return %c0_i32, %c0_i32_0 : i32, i32
  }
  func.func @transform_6(%arg0: i32) -> (i32, i32) {
    %c0_i32 = arith.constant 0 : i32
    %c0_i32_0 = arith.constant 0 : i32
    %c0_i32_1 = arith.constant 0 : i32
    return %c0_i32, %c0_i32_0 : i32, i32
  }
  func.func @transform_7(%arg0: i32) -> (i32, i32) {
    %c0_i32 = arith.constant 0 : i32
    %c0_i32_0 = arith.constant 0 : i32
    %c0_i32_1 = arith.constant 0 : i32
    return %c0_i32, %c0_i32_0 : i32, i32
  }
  func.func @transform_8(%arg0: i32) -> (i32, i32) {
    %c0_i32 = arith.constant 0 : i32
    %c0_i32_0 = arith.constant 0 : i32
    %c0_i32_1 = arith.constant 0 : i32
    return %c0_i32, %c0_i32_0 : i32, i32
  }
  func.func @transform_9(%arg0: i32) -> (i32, i32) {
    %c0_i32 = arith.constant 0 : i32
    %c0_i32_0 = arith.constant 0 : i32
    %c0_i32_1 = arith.constant 0 : i32
    return %c0_i32, %c0_i32_0 : i32, i32
  }
  func.func @transform_10(%arg0: i32) -> (i32, i32) {
    %c0_i32 = arith.constant 0 : i32
    %c0_i32_0 = arith.constant 0 : i32
    %c0_i32_1 = arith.constant 0 : i32
    return %c0_i32, %c0_i32_0 : i32, i32
  }
  func.func @transform_11(%arg0: i32) -> (i32, i32) {
    %c0_i32 = arith.constant 0 : i32
    %c0_i32_0 = arith.constant 0 : i32
    %c0_i32_1 = arith.constant 0 : i32
    return %c0_i32, %c0_i32_0 : i32, i32
  }
  func.func @transform_12(%arg0: i32) -> (i32, i32) {
    %c0_i32 = arith.constant 0 : i32
    %c0_i32_0 = arith.constant 0 : i32
    %c0_i32_1 = arith.constant 0 : i32
    return %c0_i32, %c0_i32_0 : i32, i32
  }
  func.func @transform_13(%arg0: i32) -> (i32, i32) {
    %c0_i32 = arith.constant 0 : i32
    %c0_i32_0 = arith.constant 0 : i32
    %c0_i32_1 = arith.constant 0 : i32
    return %c0_i32, %c0_i32_0 : i32, i32
  }
  func.func @transform_14(%arg0: i32) -> (i32, i32) {
    %c0_i32 = arith.constant 0 : i32
    %c0_i32_0 = arith.constant 0 : i32
    %c0_i32_1 = arith.constant 0 : i32
    return %c0_i32, %c0_i32_0 : i32, i32
  }
  func.func @transform_15(%arg0: i32) -> (i32, i32) {
    %c0_i32 = arith.constant 0 : i32
    %c0_i32_0 = arith.constant 0 : i32
    %c0_i32_1 = arith.constant 0 : i32
    return %c0_i32, %c0_i32_0 : i32, i32
  }
  func.func @transform_16(%arg0: i32) -> (i32, i32) {
    %c0_i32 = arith.constant 0 : i32
    %c0_i32_0 = arith.constant 0 : i32
    %c0_i32_1 = arith.constant 0 : i32
    return %c0_i32, %c0_i32_0 : i32, i32
  }
  func.func @transform_17(%arg0: i32) -> (i32, i32) {
    %c0_i32 = arith.constant 0 : i32
    %c0_i32_0 = arith.constant 0 : i32
    %c0_i32_1 = arith.constant 0 : i32
    return %c0_i32, %c0_i32_0 : i32, i32
  }
  func.func @transform_18(%arg0: i32) -> (i32, i32) {
    %c0_i32 = arith.constant 0 : i32
    %c0_i32_0 = arith.constant 0 : i32
    return %arg0, %c0_i32 : i32, i32
  }
  func.func @transform_19(%arg0: i32) -> (i32, i32) {
    %c0_i32 = arith.constant 0 : i32
    %c0_i32_0 = arith.constant 0 : i32
    return %arg0, %c0_i32 : i32, i32
  }
}

</mosaic_0001>

<bundles_post_ra>
// kernel: dynamixer_block.1
= control target key start
LH: loop header
LB: loop body
LE: loop exit
PB: predicated region body
PF: predicated region fallthrough
CT: control target
= control target key end

     0   :  { %s9224_s0 = inlined_call_operand.vmem [shape: f32[32,64], index: 0, kind: input, shape index: {}]   ;;  %s9225_s1 = inlined_call_operand.vmem [shape: f32[32,64], index: 1, kind: input, shape index: {}]   ;;  %s9226_s2 = inlined_call_operand.hbm [shape: f32[64,256], index: 2, kind: input, shape index: {}]   ;;  %s9227_s3 = inlined_call_operand.vmem [shape: f32[1,256], index: 3, kind: input, shape index: {}]   ;;  %s9228_s4 = inlined_call_operand.vmem [shape: f32[256,256], index: 4, kind: input, shape index: {}]   ;;  %s9229_s5 = inlined_call_operand.vmem [shape: bf16[256,1024], index: 5, kind: input, shape index: {}]   ;;  %s9230_s6 = inlined_call_operand.hbm [shape: bf16[64,1024], index: 6, kind: input, shape index: {}]   ;;  %s9231_s7 = inlined_call_operand.vmem [shape: f32[1024,64], index: 7, kind: input, shape index: {}]   ;;  %s9232_s8 = inlined_call_operand.hbm [shape: f32[64,256], index: 8, kind: input, shape index: {}]   ;;  %s9233_s9 = inlined_call_operand.vmem [shape: f32[1,256], index: 9, kind: input, shape index: {}]   ;;  %s9234_s10 = inlined_call_operand.vmem [shape: f32[256,256], index: 10, kind: input, shape index: {}]   ;;  %s9235_s11 = inlined_call_operand.vmem [shape: bf16[256,1024], index: 11, kind: input, shape index: {}]   ;;  %s9236_s12 = inlined_call_operand.hbm [shape: bf16[64,1024], index: 12, kind: input, shape index: {}]   ;;  %s9237_s13 = inlined_call_operand.vmem [shape: f32[1024,64], index: 13, kind: input, shape index: {}]   ;;  %s9238_s14 = inlined_call_operand.hbm [shape: f32[64,64], index: 14, kind: input, shape index: {}]   ;;  %s9239_s15 = inlined_call_operand.hbm [shape: f32[64,64], index: 15, kind: input, shape index: {}]   ;;  %s9240_s16 = inlined_call_operand.hbm [shape: f32[1,64], index: 16, kind: input, shape index: {}]   ;;  %s9241_s17 = inlined_call_operand.hbm [shape: f32[64,64], index: 17, kind: input, shape index: {}]   ;;  %s9242_s18 = inlined_call_operand.vmem [shape: f32[32,64], index: 18, kind: output, shape index: {0}]   ;;  %s9243_s19 = inlined_call_operand.vmem [shape: f32[32,64], index: 19, kind: output, shape index: {1}]  }
   0x1   :  { %9249 = sst [smem:[#allocation20_spill]] %s9224_s0 }
   0x2   :  { %9250 = sst [smem:[#allocation21_spill]] %s9225_s1 }
   0x3   :  { %9251 = sst [smem:[#allocation22_spill]] %s9226_s2 }
   0x4   :  { %9252 = sst [smem:[#allocation23_spill]] %s9227_s3 }
   0x5   :  { %25 = vsyncpa [#allocation3], 0 }
   0x6   :  { %26 = vsyncpa [#allocation5], 0 }
   0x7   :  { %27 = vsyncpa [#allocation8], 0 }
   0x8   :  { %28 = vsyncpa [#allocation11], 0 }
   0x9   :  { %29 = vsyncpa [#allocation14], 0  ;;  %s6537_s0 = smov [#allocation4]   ;;  %s6351_s1 = scalar_lea.hbm %s9230_s6, 4096 }
   0xa   :  { %s57_s30 = sshll.u32 %s6537_s0, 4  ;;  %p6352_p0 = scmp.ne.s32.totalorder %s9230_s6, %s6351_s1  ;;  %s58_s30 = int_to_ptr.vmem [resolvable:$true] %s57_s30 }
   0xb   :  { %p6355_p1 = scmp.lt.u32.totalorder %s6351_s1, %s9230_s6 }
   0xd   :  { %p6357_p2 = pnand %p6355_p1, %p6352_p0 }
   0xf   :  { %6360 = shalt.err (!%p6357_p2)
}
  0x10   :  { %s6361_s25 = scalar_lea.vmem %s58_s30, 4096  ;;  %p6366_p4 = scmp.lt.s32.totalorder %s58_s30, %s58_s30 }
  0x11   :  { %p6362_p3 = scmp.ne.s32.totalorder %s58_s30, %s6361_s25  ;;  %p6367_p5 = scmp.lt.s32.totalorder %s6361_s25, %s6361_s25 }
  0x13   :  { %p6368_p6 = por %p6367_p5, %p6366_p4 }
  0x15   :  { %p6369_p7 = pnand %p6368_p6, %p6362_p3 }
  0x17   :  { %6372 = shalt.err (!%p6369_p7)
}
  0x18   :  { %s6538_s3 = smov 512   ;;  %s6539_s26 = smov 32  }
  0x19   :  { %63 = dma.hbm_to_vmem [thread:$0]  %s9230_s6, 4096, %s58_s30, [#allocation5], %s6538_s3, %s6538_s3, %s6539_s26  }
  0x1a   :  { %s6540_s29 = smov [#allocation7]   ;;  %s6373_s1 = scalar_lea.hbm %s9236_s12, 4096 }
  0x1b   :  { %s89_s0 = sshll.u32 %s6540_s29, 4  ;;  %p6374_p8 = scmp.ne.s32.totalorder %s9236_s12, %s6373_s1  ;;  %s90_s0 = int_to_ptr.vmem [resolvable:$true] %s89_s0 }
  0x1c   :  { %p6377_p9 = scmp.lt.u32.totalorder %s6373_s1, %s9236_s12 }
  0x1e   :  { %p6379_p10 = pnand %p6377_p9, %p6374_p8 }
  0x20   :  { %6382 = shalt.err (!%p6379_p10)
}
  0x21   :  { %s6383_s25 = scalar_lea.vmem %s90_s0, 4096  ;;  %p6388_p12 = scmp.lt.s32.totalorder %s90_s0, %s90_s0 }
  0x22   :  { %p6384_p11 = scmp.ne.s32.totalorder %s90_s0, %s6383_s25  ;;  %p6389_p13 = scmp.lt.s32.totalorder %s6383_s25, %s6383_s25 }
  0x24   :  { %p6390_p0 = por %p6389_p13, %p6388_p12 }
  0x26   :  { %p6391_p1 = pnand %p6390_p0, %p6384_p11 }
  0x28   :  { %6394 = shalt.err (!%p6391_p1)
}
  0x29   :  { %95 = dma.hbm_to_vmem [thread:$0]  %s9236_s12, 4096, %s90_s0, [#allocation8], %s6538_s3, %s6538_s3, %s6539_s26  }
  0x2a   :  { %s6541_s27 = smov [#allocation10]   ;;  %s6542_s29 = smov [#allocation2]  }
  0x2b   :  { %s115_s28 = sshll.u32 %s6541_s27, 4  ;;  %s39_s20 = sshll.u32 %s6542_s29, 4  ;;  %s116_s28 = int_to_ptr.vmem [resolvable:$true] %s115_s28  ;;  %s6677_s20 = int_to_ptr.vmem [resolvable:$true] %s39_s20 }
  0x2c   :  { %s6395_s22 = scalar_lea.hbm %s9239_s15, 1024 }
  0x2d   :  { %p6396_p2 = scmp.ne.s32.totalorder %s9239_s15, %s6395_s22  ;;  %p6399_p3 = scmp.lt.u32.totalorder %s6395_s22, %s9239_s15 }
  0x2f   :  { %p6401_p4 = pnand %p6399_p3, %p6396_p2 }
  0x31   :  { %6404 = shalt.err (!%p6401_p4)
}
  0x32   :  { %s6405_s12 = scalar_lea.vmem %s116_s28, 1024  ;;  %p6410_p6 = scmp.lt.s32.totalorder %s116_s28, %s116_s28 }
  0x33   :  { %p6406_p5 = scmp.ne.s32.totalorder %s116_s28, %s6405_s12  ;;  %p6411_p7 = scmp.lt.s32.totalorder %s6405_s12, %s6405_s12 }
  0x35   :  { %p6412_p8 = por %p6411_p7, %p6410_p6 }
  0x37   :  { %p6413_p9 = pnand %p6412_p8, %p6406_p5 }
  0x39   :  { %6416 = shalt.err (!%p6413_p9)
}
  0x3a   :  { %s9247_s3 = smov 128   ;;  %s6544_s26 = smov 8  }
  0x3b   :  { %121 = dma.hbm_to_vmem [thread:$0]  %s9239_s15, 1024, %s116_s28, [#allocation11], %s9247_s3, %s9247_s3, %s6544_s26  }
  0x3c   :  { %s9253_s29 = sld [smem:[#allocation22_spill]] }
  0x42   :  { %s6417_s21 = scalar_lea.hbm %s9253_s29, 2048 }
  0x43   :  { %p6418_p10 = scmp.ne.s32.totalorder %s9253_s29, %s6417_s21  ;;  %p6421_p11 = scmp.lt.u32.totalorder %s6417_s21, %s9253_s29 }
  0x45   :  { %p6423_p12 = pnand %p6421_p11, %p6418_p10 }
  0x47   :  { %6426 = shalt.err (!%p6423_p12)
}
  0x48   :  { %s6427_s24 = scalar_lea.vmem %s6677_s20, 2048  ;;  %p6432_p0 = scmp.lt.s32.totalorder %s6677_s20, %s6677_s20 }
  0x49   :  { %p6428_p13 = scmp.ne.s32.totalorder %s6677_s20, %s6427_s24  ;;  %p6433_p1 = scmp.lt.s32.totalorder %s6427_s24, %s6427_s24 }
  0x4b   :  { %p6434_p2 = por %p6433_p1, %p6432_p0 }
  0x4d   :  { %p6435_p3 = pnand %p6434_p2, %p6428_p13 }
  0x4f   :  { %6438 = shalt.err (!%p6435_p3)
}
  0x50   :  { %s6545_s15 = smov 256   ;;  %s6546_s28 = smov 16  }
  0x51   :  { %45 = dma.hbm_to_vmem [thread:$0]  %s9253_s29, 2048, %s6677_s20, [#allocation3], %s6545_s15, %s6545_s15, %s6546_s28  }
  0x52   :  { %s6547_s0 = smov [#allocation6]   ;;  %s6548_s30 = smov [#allocation9]  }
  0x53   :  { %s71_s6 = sshll.u32 %s6547_s0, 4  ;;  %s103_s27 = sshll.u32 %s6548_s30, 4  ;;  %s72_s6 = int_to_ptr.vmem [resolvable:$true] %s71_s6  ;;  %s6711_s27 = int_to_ptr.vmem [resolvable:$true] %s103_s27 }
  0x54   :  { %s6439_s22 = scalar_lea.hbm %s9232_s8, 2048 }
  0x55   :  { %p6440_p4 = scmp.ne.s32.totalorder %s9232_s8, %s6439_s22  ;;  %p6443_p5 = scmp.lt.u32.totalorder %s6439_s22, %s9232_s8 }
  0x57   :  { %p6445_p6 = pnand %p6443_p5, %p6440_p4 }
  0x59   :  { %6448 = shalt.err (!%p6445_p6)
}
  0x5a   :  { %s6449_s20 = scalar_lea.vmem %s72_s6, 2048  ;;  %p6454_p8 = scmp.lt.s32.totalorder %s72_s6, %s72_s6 }
  0x5b   :  { %p6450_p7 = scmp.ne.s32.totalorder %s72_s6, %s6449_s20  ;;  %p6455_p9 = scmp.lt.s32.totalorder %s6449_s20, %s6449_s20 }
  0x5d   :  { %p6456_p10 = por %p6455_p9, %p6454_p8 }
  0x5f   :  { %p6457_p11 = pnand %p6456_p10, %p6450_p7 }
  0x61   :  { %6460 = shalt.err (!%p6457_p11)
}
  0x62   :  { %77 = dma.hbm_to_vmem [thread:$0]  %s9232_s8, 2048, %s72_s6, [#allocation5], %s6545_s15, %s6545_s15, %s6546_s28  }
  0x63   :  { %s6461_s30 = scalar_lea.hbm %s9238_s14, 1024 }
  0x64   :  { %p6462_p12 = scmp.ne.s32.totalorder %s9238_s14, %s6461_s30  ;;  %p6465_p13 = scmp.lt.u32.totalorder %s6461_s30, %s9238_s14 }
  0x66   :  { %p6467_p0 = pnand %p6465_p13, %p6462_p12 }
  0x68   :  { %6470 = shalt.err (!%p6467_p0)
}
  0x69   :  { %s6471_s2 = scalar_lea.vmem %s6711_s27, 1024  ;;  %p6476_p2 = scmp.lt.s32.totalorder %s6711_s27, %s6711_s27 }
  0x6a   :  { %p6472_p1 = scmp.ne.s32.totalorder %s6711_s27, %s6471_s2  ;;  %p6477_p3 = scmp.lt.s32.totalorder %s6471_s2, %s6471_s2 }
  0x6c   :  { %p6478_p4 = por %p6477_p3, %p6476_p2 }
  0x6e   :  { %p6479_p5 = pnand %p6478_p4, %p6472_p1 }
  0x70   :  { %6482 = shalt.err (!%p6479_p5)
}
  0x71   :  { %s9254_s8 = smov 128   ;;  %s6549_s6 = smov [#allocation12]  }
  0x72   :  { %109 = dma.hbm_to_vmem [thread:$0]  %s9238_s14, 1024, %s6711_s27, [#allocation8], %s9254_s8, %s9254_s8, %s6544_s26  }
  0x73   :  { %s128_s23 = sshll.u32 %s6549_s6, 4  ;;  %s6550_s24 = smov [#allocation13]   ;;  %s129_s23 = int_to_ptr.vmem [resolvable:$true] %s128_s23 }
  0x74   :  { %s137_s20 = sshll.u32 %s6550_s24, 4  ;;  %s6483_s12 = scalar_lea.hbm %s9240_s16, 16  ;;  %s6745_s20 = int_to_ptr.vmem [resolvable:$true] %s137_s20 }
  0x75   :  { %p6484_p6 = scmp.ne.s32.totalorder %s9240_s16, %s6483_s12  ;;  %p6487_p7 = scmp.lt.u32.totalorder %s6483_s12, %s9240_s16 }
  0x77   :  { %p6489_p8 = pnand %p6487_p7, %p6484_p6 }
  0x79   :  { %6492 = shalt.err (!%p6489_p8)
}
  0x7a   :  { %s6493_s14 = scalar_lea.vmem %s129_s23, 16  ;;  %s6497_s27 = scalar_lea.vmem %s129_s23, 32 }
  0x7b   :  { %p6494_p9 = scmp.ne.s32.totalorder %s129_s23, %s6493_s14  ;;  %p6498_p10 = scmp.lt.s32.totalorder %s129_s23, %s129_s23 }
  0x7c   :  { %p6499_p11 = scmp.lt.s32.totalorder %s6497_s27, %s6493_s14 }
  0x7e   :  { %p6500_p12 = por %p6499_p11, %p6498_p10 }
  0x80   :  { %p6501_p13 = pnand %p6500_p12, %p6494_p9 }
  0x82   :  { %6504 = shalt.err (!%p6501_p13)
}
  0x83   :  { %131 = dma.hbm_to_vmem [thread:$0]  %s9240_s16, 16, %s129_s23, [#allocation11]  }
  0x84   :  { %s6505_s28 = scalar_lea.hbm %s9241_s17, 1024 }
  0x85   :  { %p6506_p0 = scmp.ne.s32.totalorder %s9241_s17, %s6505_s28  ;;  %p6509_p1 = scmp.lt.u32.totalorder %s6505_s28, %s9241_s17 }
  0x87   :  { %p6511_p2 = pnand %p6509_p1, %p6506_p0 }
  0x89   :  { %6514 = shalt.err (!%p6511_p2)
}
  0x8a   :  { %s6515_s12 = scalar_lea.vmem %s6745_s20, 1024  ;;  %p6520_p4 = scmp.lt.s32.totalorder %s6745_s20, %s6745_s20 }
  0x8b   :  { %p6516_p3 = scmp.ne.s32.totalorder %s6745_s20, %s6515_s12  ;;  %p6521_p5 = scmp.lt.s32.totalorder %s6515_s12, %s6515_s12 }
  0x8d   :  { %p6522_p6 = por %p6521_p5, %p6520_p4 }
  0x8f   :  { %p6523_p7 = pnand %p6522_p6, %p6516_p3 }
  0x91   :  { %6526 = shalt.err (!%p6523_p7)
}
  0x92   :  { %143 = dma.hbm_to_vmem [thread:$0]  %s9241_s17, 1024, %s6745_s20, [#allocation14], %s9254_s8, %s9254_s8, %s6544_s26  }
  0x93   :  { %6527 = dma.done.wait [#allocation3], 2048  }
  0x94   :  { %6528 = vsyncadd [#allocation3], 4294965248 }
  0x95   :  { %6529 = dma.done.wait [#allocation5], 6144  }
  0x96   :  { %6530 = vsyncadd [#allocation5], 4294961152 }
  0x97   :  { %6531 = dma.done.wait [#allocation8], 5120  }
  0x98   :  { %6532 = vsyncadd [#allocation8], 4294962176 }
  0x99   :  { %6533 = dma.done.wait [#allocation11], 1040  }
  0x9a   :  { %6534 = vsyncadd [#allocation11], 4294966256 }
  0x9b   :  { %6535 = dma.done.wait [#allocation14], 1024  }
  0x9c   :  { %6536 = vsyncadd [#allocation14], 4294966272  ;;  %v6551_v0 = vmov 0.0   ;;  %v178_v1 = vld [vmem:[#allocation2 + $0x8] sm:$0xff]  ;;  %v180_v2 = vld [vmem:[#allocation2 + $0x18] sm:$0xff]  ;;  %s9255_s8 = sld [smem:[#allocation20_spill]] }
  0x9d   :  { %282 = vmatprep.mubr.f32.mxu0 %v6551_v0  ;;  %v177_v3 = vld [vmem:[#allocation2] sm:$0xff]  ;;  %v5784_v4 = vpack.c.bf16 %v180_v2, %v178_v1  ;;  %v179_v5 = vld [vmem:[#allocation2 + $0x10] sm:$0xff]  ;;  %v182_v6 = vld [vmem:[#allocation2 + $0x28] sm:$0xff]  ;;  %vm205_vm0 = vcmask 523264   ;;  %s9256_s26 = sld [smem:[#allocation23_spill]]  ;;  %s9257_s29 = sld [smem:[#allocation21_spill]] }
  0x9e   :  { %v184_v7 = vld [vmem:[#allocation2 + $0x38] sm:$0xff]  ;;  %v5786_v8 = vpack.c.bf16 %v179_v5, %v177_v3  ;;  %v181_v10 = vld [vmem:[#allocation2 + $0x20] sm:$0xff]  ;;  %v183_v11 = vld [vmem:[#allocation2 + $0x30] sm:$0xff] }
  0x9f   :  { %v5788_v9 = vpack.c.bf16 %v184_v7, %v182_v6  ;;  %v186_v12 = vld [vmem:[#allocation2 + $0x48] sm:$0xff]  ;;  %5785 = vmatprep.subr.bf16.mxu0 %v5784_v4  ;;  %v188_v13 = vld [vmem:[#allocation2 + $0x58] sm:$0xff]  ;;  %v5790_v14 = vpack.c.bf16 %v183_v11, %v181_v10  ;;  %v185_v16 = vld [vmem:[#allocation2 + $0x40] sm:$0xff] }
  0xa0   :  { %5787 = vmatpush1.bf16.msra.mxu0 %v5786_v8  ;;  %v5792_v15 = vpack.c.bf16 %v188_v13, %v186_v12  ;;  %v187_v17 = vld [vmem:[#allocation2 + $0x50] sm:$0xff]  ;;  %v190_v18 = vld [vmem:[#allocation2 + $0x68] sm:$0xff]  ;;  %v192_v19 = vld [vmem:[#allocation2 + $0x78] sm:$0xff] }
  0xa1   :  { %5789 = vmatprep.subr.bf16.mxu0 %v5788_v9  ;;  %v5794_v20 = vpack.c.bf16 %v187_v17, %v185_v16  ;;  %v5796_v21 = vpack.c.bf16 %v192_v19, %v190_v18  ;;  %v189_v22 = vld [vmem:[#allocation2 + $0x60] sm:$0xff]  ;;  %v191_v23 = vld [vmem:[#allocation2 + $0x70] sm:$0xff]  ;;  %v344_v29 = vld [vmem:[%s9228_s4 + $0x8] sm:$0xff] }
  0xa2   :  { %v5798_v24 = vpack.c.bf16 %v191_v23, %v189_v22  ;;  %v169_v25 = vld [vmem:[%s9255_s8] sm:$0xff]  ;;  %v170_v26 = vld [vmem:[%s9255_s8 + $0x8] sm:$0xff]  ;;  %v171_v27 = vld [vmem:[%s9255_s8 + $0x10] sm:$0xff] }
  0xa3   :  { %v172_v28 = vld [vmem:[%s9255_s8 + $0x18] sm:$0xff]  ;;  %v343_v31 = vld [vmem:[%s9228_s4] sm:$0xff]  ;;  %v345_v33 = vld [vmem:[%s9228_s4 + $0x10] sm:$0xff] }
  0xa4   :  { %5791 = vmatpush1.bf16.msra.mxu0 %v5790_v14  ;;  %v346_v30 = vld [vmem:[%s9228_s4 + $0x18] sm:$0xff]  ;;  %v348_v34 = vld [vmem:[%s9228_s4 + $0x28] sm:$0xff]  ;;  %v5802_v36 = vpack.c.bf16 %v345_v33, %v343_v31  ;;  %v347_v38 = vld [vmem:[%s9228_s4 + $0x20] sm:$0xff] }
  0xa5   :  { %5793 = vmatprep.subr.bf16.mxu0 %v5792_v15  ;;  %v5800_v32 = vpack.c.bf16 %v346_v30, %v344_v29  ;;  %v350_v35 = vld [vmem:[%s9228_s4 + $0x38] sm:$0xff]  ;;  %v349_v39 = vld [vmem:[%s9228_s4 + $0x30] sm:$0xff]  ;;  %v352_v40 = vld [vmem:[%s9228_s4 + $0x48] sm:$0xff] }
  0xa6   :  { %v5804_v37 = vpack.c.bf16 %v350_v35, %v348_v34  ;;  %v354_v41 = vld [vmem:[%s9228_s4 + $0x58] sm:$0xff]  ;;  %v5806_v42 = vpack.c.bf16 %v349_v39, %v347_v38  ;;  %v351_v44 = vld [vmem:[%s9228_s4 + $0x40] sm:$0xff]  ;;  %v353_v45 = vld [vmem:[%s9228_s4 + $0x50] sm:$0xff]  ;;  %v195_v38 = vlaneseq }
  0xa7   :  { %5801 = vmatprep.subr.bf16.mxu1 %v5800_v32  ;;  %v5808_v43 = vpack.c.bf16 %v354_v41, %v352_v40  ;;  %v356_v46 = vld [vmem:[%s9228_s4 + $0x68] sm:$0xff]  ;;  %v358_v47 = vld [vmem:[%s9228_s4 + $0x78] sm:$0xff]  ;;  %v5810_v48 = vpack.c.bf16 %v353_v45, %v351_v44  ;;  %v355_v50 = vld [vmem:[%s9228_s4 + $0x60] sm:$0xff] }
  0xa8   :  { %5795 = vmatpush1.bf16.msra.mxu0 %v5794_v20  ;;  %5803 = vmatpush1.bf16.msra.mxu1 %v5802_v36  ;;  %v5812_v49 = vpack.c.bf16 %v358_v47, %v356_v46  ;;  %v357_v51 = vld [vmem:[%s9228_s4 + $0x70] sm:$0xff]  ;;  %v360_v52 = vld [vmem:[%s9228_s4 + $0x88] sm:$0xff]  ;;  %v362_v53 = vld [vmem:[%s9228_s4 + $0x98] sm:$0xff]  ;;  %v6943_v39 = vshrl.u32 %v195_v38, 7 }
  0xa9   :  { %5797 = vmatprep.subr.bf16.mxu0 %v5796_v21  ;;  %5805 = vmatprep.subr.bf16.mxu1 %v5804_v37  ;;  %v5814_v54 = vpack.c.bf16 %v357_v51, %v355_v50  ;;  %v5816_v55 = vpack.c.bf16 %v362_v53, %v360_v52  ;;  %v359_v56 = vld [vmem:[%s9228_s4 + $0x80] sm:$0xff]  ;;  %v361_v57 = vld [vmem:[%s9228_s4 + $0x90] sm:$0xff]  ;;  %v364_v58 = vld [vmem:[%s9228_s4 + $0xa8] sm:$0xff] }
  0xaa   :  { %v366_v59 = vld [vmem:[%s9228_s4 + $0xb8] sm:$0xff]  ;;  %v5818_v60 = vpack.c.bf16 %v361_v57, %v359_v56  ;;  %v363_v62 = vld [vmem:[%s9228_s4 + $0xa0] sm:$0xff]  ;;  %v365_v63 = vld [vmem:[%s9228_s4 + $0xb0] sm:$0xff]  ;;  %v197_v40 = vsub.s32 0, %v6943_v39 }
  0xab   :  { %v5820_v61 = vpack.c.bf16 %v366_v59, %v364_v58  ;;  %v368_v1 = vld [vmem:[%s9228_s4 + $0xc8] sm:$0xff]  ;;  %v370_v2 = vld [vmem:[%s9228_s4 + $0xd8] sm:$0xff]  ;;  %v5822_v3 = vpack.c.bf16 %v365_v63, %v363_v62  ;;  %v367_v5 = vld [vmem:[%s9228_s4 + $0xc0] sm:$0xff] }
  0xac   :  { %5799 = vmatpush1.bf16.msra.mxu0 %v5798_v24  ;;  %5807 = vmatpush1.bf16.msra.mxu1 %v5806_v42  ;;  %v5824_v4 = vpack.c.bf16 %v370_v2, %v368_v1  ;;  %v369_v6 = vld [vmem:[%s9228_s4 + $0xd0] sm:$0xff]  ;;  %v372_v7 = vld [vmem:[%s9228_s4 + $0xe8] sm:$0xff]  ;;  %v374_v8 = vld [vmem:[%s9228_s4 + $0xf8] sm:$0xff]  ;;  %v201_v42 = vsub.s32 1, %v6943_v39 }
  0xad   :  { %5809 = vmatprep.subr.bf16.mxu1 %v5808_v43  ;;  %v5826_v9 = vpack.c.bf16 %v369_v6, %v367_v5  ;;  %v5828_v10 = vpack.c.bf16 %v374_v8, %v372_v7  ;;  %v371_v11 = vld [vmem:[%s9228_s4 + $0xe0] sm:$0xff]  ;;  %v373_v12 = vld [vmem:[%s9228_s4 + $0xf0] sm:$0xff]  ;;  %v376_v13 = vld [vmem:[%s9228_s4 + $0x108] sm:$0xff] }
  0xae   :  { %v378_v14 = vld [vmem:[%s9228_s4 + $0x118] sm:$0xff]  ;;  %v5830_v15 = vpack.c.bf16 %v373_v12, %v371_v11  ;;  %v375_v17 = vld [vmem:[%s9228_s4 + $0x100] sm:$0xff]  ;;  %v377_v18 = vld [vmem:[%s9228_s4 + $0x110] sm:$0xff] }
  0xaf   :  { %4973 = vmatmul.mubr.msk.f32.vlgmr.msra.gmra.mrb[0].mxu0 %vm205_vm0, %v169_v25  ;;  %v5832_v16 = vpack.c.bf16 %v378_v14, %v376_v13  ;;  %v380_v19 = vld [vmem:[%s9228_s4 + $0x128] sm:$0xff]  ;;  %v382_v20 = vld [vmem:[%s9228_s4 + $0x138] sm:$0xff]  ;;  %v5834_v21 = vpack.c.bf16 %v377_v18, %v375_v17  ;;  %v379_v23 = vld [vmem:[%s9228_s4 + $0x120] sm:$0xff] }
  0xb0   :  { %288 = vmatprep.mubr.f32.mxu0 %v6551_v0  ;;  %5811 = vmatpush1.bf16.msra.mxu1 %v5810_v48  ;;  %v5836_v22 = vpack.c.bf16 %v382_v20, %v380_v19  ;;  %v381_v24 = vld [vmem:[%s9228_s4 + $0x130] sm:$0xff]  ;;  %v384_v25 = vld [vmem:[%s9228_s4 + $0x148] sm:$0xff]  ;;  %v383_v29 = vld [vmem:[%s9228_s4 + $0x140] sm:$0xff] }
  0xb1   :  { %5813 = vmatprep.subr.bf16.mxu1 %v5812_v49  ;;  %v385_v30 = vld [vmem:[%s9228_s4 + $0x150] sm:$0xff]  ;;  %v388_v31 = vld [vmem:[%s9228_s4 + $0x168] sm:$0xff]  ;;  %v390_v32 = vld [vmem:[%s9228_s4 + $0x178] sm:$0xff] }
  0xb2   :  { %v5842_v33 = vpack.c.bf16 %v385_v30, %v383_v29  ;;  %v5844_v34 = vpack.c.bf16 %v390_v32, %v388_v31  ;;  %v387_v35 = vld [vmem:[%s9228_s4 + $0x160] sm:$0xff]  ;;  %v389_v36 = vld [vmem:[%s9228_s4 + $0x170] sm:$0xff]  ;;  %v392_v2 = vld [vmem:[%s9228_s4 + $0x188] sm:$0xff] }
  0xb3   :  { %4974 = vmatmul.mubr.msk.f32.gmra.mrb[2].mxu0 %vm205_vm0, %v170_v26  ;;  %v386_v26 = vld [vmem:[%s9228_s4 + $0x158] sm:$0xff]  ;;  %v5846_v37 = vpack.c.bf16 %v389_v36, %v387_v35  ;;  %v193_v41 = vld [vmem:[%s9256_s26] sm:$0x3]  ;;  %v393_v6 = vld [vmem:[%s9228_s4 + $0x190] sm:$0xff] }
  0xb4   :  { %294 = vmatprep.mubr.f32.mxu0 %v6551_v0  ;;  %5815 = vmatpush1.bf16.msra.mxu1 %v5814_v54  ;;  %v198_v43 = vrot.slane %v193_v41, %v197_v40  ;;  %v202_v44 = vrot.slane %v193_v41, %v201_v42  ;;  %v391_v5 = vld [vmem:[%s9228_s4 + $0x180] sm:$0xff]  ;;  %v396_v8 = vld [vmem:[%s9228_s4 + $0x1a8] sm:$0xff]  ;;  %v397_v12 = vld [vmem:[%s9228_s4 + $0x1b0] sm:$0xff] }
  0xb5   :  { %5817 = vmatprep.subr.bf16.mxu1 %v5816_v55  ;;  %v5850_v7 = vpack.c.bf16 %v393_v6, %v391_v5  ;;  %v395_v11 = vld [vmem:[%s9228_s4 + $0x1a0] sm:$0xff]  ;;  %v400_v14 = vld [vmem:[%s9228_s4 + $0x1c8] sm:$0xff]  ;;  %v401_v18 = vld [vmem:[%s9228_s4 + $0x1d0] sm:$0xff] }
  0xb6   :  { %v5854_v13 = vpack.c.bf16 %v397_v12, %v395_v11  ;;  %v399_v17 = vld [vmem:[%s9228_s4 + $0x1c0] sm:$0xff]  ;;  %v404_v20 = vld [vmem:[%s9228_s4 + $0x1e8] sm:$0xff] }
  0xb7   :  { %4975 = vmatmul.mubr.msk.f32.gmra.mrb[4].mxu0 %vm205_vm0, %v171_v27  ;;  %v5838_v27 = vpack.c.bf16 %v381_v24, %v379_v23  ;;  %v5858_v19 = vpack.c.bf16 %v401_v18, %v399_v17  ;;  %v403_v23 = vld [vmem:[%s9228_s4 + $0x1e0] sm:$0xff]  ;;  %v405_v24 = vld [vmem:[%s9228_s4 + $0x1f0] sm:$0xff]  ;;  %v7040_v31 = vld [vmem:[%s9229_s5 + $0x28] sm:$0xff] }
  0xb8   :  { %300 = vmatprep.mubr.f32.mxu0 %v6551_v0  ;;  %5819 = vmatpush1.bf16.msra.mxu1 %v5818_v60  ;;  %v524_v32 = vld [vmem:[%s9229_s5 + $0x40] sm:$0xff] }
  0xb9   :  { %5821 = vmatprep.subr.bf16.mxu1 %v5820_v61  ;;  %v536_v38 = vld [vmem:[%s9229_s5 + $0xa0] sm:$0xff] }
  0xba   :  { %v572_v5 = vld [vmem:[%s9229_s5 + $0x1c0] sm:$0xff] }
  0xbb   :  { %4976 = vmatmul.mubr.msk.f32.gmra.mrb[6].mxu0 %vm205_vm0, %v172_v28  ;;  %v5840_v28 = vpack.c.bf16 %v386_v26, %v384_v25  ;;  %v5862_v25 = vpack.c.bf16 %v405_v24, %v403_v23  ;;  %v516_v26 = vld [vmem:[%s9229_s5] sm:$0xff] }
  0xbc   :  { %5823 = vmatpush1.bf16.msra.mxu1 %v5822_v3  ;;  %v394_v3 = vld [vmem:[%s9228_s4 + $0x198] sm:$0xff]  ;;  %v576_v6 = vld [vmem:[%s9229_s5 + $0x1e0] sm:$0xff] }
  0xbd   :  { %5825 = vmatprep.subr.bf16.mxu1 %v5824_v4  ;;  %v5848_v4 = vpack.c.bf16 %v394_v3, %v392_v2  ;;  %v568_v2 = vld [vmem:[%s9229_s5 + $0x1a0] sm:$0xff]  ;;  %v5033_v11 = vcombine.low %v572_v5, %v576_v6 }
  0xbe   :  { %v596_v17 = vld [vmem:[%s9229_s5 + $0x280] sm:$0xff] }
  0xbf   :  { %v600_v18 = vld [vmem:[%s9229_s5 + $0x2a0] sm:$0xff] }
  0xc0   :  { %5827 = vmatpush1.bf16.msra.mxu1 %v5826_v9  ;;  %v398_v9 = vld [vmem:[%s9228_s4 + $0x1b8] sm:$0xff] }
  0xc1   :  { %5829 = vmatprep.subr.bf16.mxu1 %v5828_v10  ;;  %v5852_v10 = vpack.c.bf16 %v398_v9, %v396_v8  ;;  %v5034_v8 = vcombine.high %v572_v5, %v576_v6  ;;  %v580_v9 = vld [vmem:[%s9229_s5 + $0x200] sm:$0xff]  ;;  %v557_v5 = vld [vmem:[%s9229_s5 + $0x148] sm:$0xff] }
  0xc2   :  { %v561_v6 = vld [vmem:[%s9229_s5 + $0x168] sm:$0xff] }
  0xc4   :  { %5831 = vmatpush1.bf16.msra.mxu1 %v5830_v15  ;;  %v402_v15 = vld [vmem:[%s9228_s4 + $0x1d8] sm:$0xff] }
  0xc5   :  { %5833 = vmatprep.subr.bf16.mxu1 %v5832_v16  ;;  %v5856_v16 = vpack.c.bf16 %v402_v15, %v400_v14  ;;  %v592_v14 = vld [vmem:[%s9229_s5 + $0x260] sm:$0xff] }
  0xc8   :  { %5835 = vmatpush1.bf16.msra.mxu1 %v5834_v21  ;;  %v406_v21 = vld [vmem:[%s9228_s4 + $0x1f8] sm:$0xff] }
  0xc9   :  { %5837 = vmatprep.subr.bf16.mxu1 %v5836_v22  ;;  %v5860_v22 = vpack.c.bf16 %v406_v21, %v404_v20  ;;  %v5058_v20 = vcombine.high %v596_v17, %v600_v18  ;;  %v5057_v21 = vcombine.low %v596_v17, %v600_v18  ;;  %v581_v17 = vld [vmem:[%s9229_s5 + $0x208] sm:$0xff] }
  0xca   :  { %v585_v18 = vld [vmem:[%s9229_s5 + $0x228] sm:$0xff] }
  0xcc   :  { %5839 = vmatpush1.bf16.msra.mxu1 %v5838_v27  ;;  %v520_v27 = vld [vmem:[%s9229_s5 + $0x20] sm:$0xff] }
  0xcd   :  { %5841 = vmatprep.subr.bf16.mxu1 %v5840_v28  ;;  %v7035_v28 = vld [vmem:[%s9229_s5 + $0x8] sm:$0xff]  ;;  %v4977_v29 = vcombine.low %v516_v26, %v520_v27  ;;  %v4978_v30 = vcombine.high %v516_v26, %v520_v27 }
  0xce   :  { %v4980_v35 = vcombine.high %v7035_v28, %v7040_v31 }
  0xcf   :  { %1284 = vmatprep.subr.bf16.mxu0 %v4978_v30 }
  0xd0   :  { %5843 = vmatpush1.bf16.msra.mxu1 %v5842_v33  ;;  %v528_v33 = vld [vmem:[%s9229_s5 + $0x60] sm:$0xff]  ;;  %1285 = vmatpush1.bf16.msra.mxu0 %v4977_v29 }
  0xd1   :  { %5845 = vmatprep.subr.bf16.mxu1 %v5844_v34  ;;  %v4979_v34 = vcombine.low %v7035_v28, %v7040_v31  ;;  %v4986_v36 = vcombine.high %v524_v32, %v528_v33  ;;  %v4985_v41 = vcombine.low %v524_v32, %v528_v33 }
  0xd3   :  { %1286 = vmatprep.subr.bf16.mxu0 %v4986_v36 }
  0xd4   :  { %5847 = vmatpush1.bf16.msra.mxu1 %v5846_v37  ;;  %v532_v37 = vld [vmem:[%s9229_s5 + $0x80] sm:$0xff]  ;;  %1287 = vmatpush1.bf16.msra.mxu0 %v4985_v41 }
  0xd5   :  { %5849 = vmatprep.subr.bf16.mxu1 %v5848_v4 }
  0xd8   :  { %5851 = vmatpush1.bf16.msra.mxu1 %v5850_v7 }
  0xd9   :  { %5853 = vmatprep.subr.bf16.mxu1 %v5852_v10  ;;  %v584_v10 = vld [vmem:[%s9229_s5 + $0x220] sm:$0xff] }
  0xda   :  { %v5042_v12 = vcombine.high %v580_v9, %v584_v10  ;;  %v5041_v15 = vcombine.low %v580_v9, %v584_v10  ;;  %v565_v9 = vld [vmem:[%s9229_s5 + $0x188] sm:$0xff] }
  0xdb   :  { %v569_v10 = vld [vmem:[%s9229_s5 + $0x1a8] sm:$0xff] }
  0xdc   :  { %5855 = vmatpush1.bf16.msra.mxu1 %v5854_v13  ;;  %v588_v13 = vld [vmem:[%s9229_s5 + $0x240] sm:$0xff] }
  0xdd   :  { %5857 = vmatprep.subr.bf16.mxu1 %v5856_v16  ;;  %v5050_v16 = vcombine.high %v588_v13, %v592_v14 }
  0xe0   :  { %5859 = vmatpush1.bf16.msra.mxu1 %v5858_v19  ;;  %v5049_v19 = vcombine.low %v588_v13, %v592_v14  ;;  %v573_v13 = vld [vmem:[%s9229_s5 + $0x1c8] sm:$0xff] }
  0xe1   :  { %5861 = vmatprep.subr.bf16.mxu1 %v5860_v22  ;;  %v577_v14 = vld [vmem:[%s9229_s5 + $0x1e8] sm:$0xff] }
  0xe4   :  { %5863 = vmatpush1.bf16.msra.mxu1 %v5862_v25 }
  0xe5   :  { %1337 = vmatprep.subr.bf16.mxu1 %v4980_v35 }
 0x182   :  { %v284_v45 = vpop.f32.mrb[0].mxu0 }
 0x183   :  { %v6954_v46 = vadd.f32 %v284_v45, %v198_v43  ;;  %v286_v47 = vpop.f32.mrb[1].mxu0  ;;  %v544_v45 = vld [vmem:[%s9229_s5 + $0xe0] sm:$0xff] }
 0x184   :  { %v6956_v48 = vadd.f32 %v286_v47, %v202_v44  ;;  %v4993_v47 = vcombine.low %v532_v37, %v536_v38 }
 0x186   :  { %v290_v49 = vpop.f32.mrb[2].mxu0  ;;  %v307_v50 = vmax.f32 %v6954_v46, %v6956_v48 }
 0x187   :  { %v6960_v51 = vadd.f32 %v290_v49, %v198_v43  ;;  %v292_v52 = vpop.f32.mrb[3].mxu0 }
 0x188   :  { %v6962_v53 = vadd.f32 %v292_v52, %v202_v44  ;;  %308 = vmax.xlane.f32.xlu0 %v307_v50  ;;  %v548_v50 = vld [vmem:[%s9229_s5 + $0x100] sm:$0xff] }
 0x189   :  { %v552_v52 = vld [vmem:[%s9229_s5 + $0x120] sm:$0xff] }
 0x18a   :  { %v296_v54 = vpop.f32.mrb[4].mxu0  ;;  %v310_v55 = vmax.f32 %v6960_v51, %v6962_v53 }
 0x18b   :  { %v6966_v56 = vadd.f32 %v296_v54, %v198_v43  ;;  %v298_v57 = vpop.f32.mrb[5].mxu0 }
 0x18c   :  { %v6968_v58 = vadd.f32 %v298_v57, %v202_v44  ;;  %311 = vmax.xlane.f32.xlu0 %v310_v55  ;;  %v5010_v55 = vcombine.high %v548_v50, %v552_v52  ;;  %v556_v57 = vld [vmem:[%s9229_s5 + $0x140] sm:$0xff] }
 0x18e   :  { %v302_v59 = vpop.f32.mrb[6].mxu0  ;;  %v313_v60 = vmax.f32 %v6966_v56, %v6968_v58 }
 0x18f   :  { %v6972_v61 = vadd.f32 %v302_v59, %v198_v43  ;;  %v304_v62 = vpop.f32.mrb[7].mxu0  ;;  %v4994_v43 = vcombine.high %v532_v37, %v536_v38  ;;  %v560_v59 = vld [vmem:[%s9229_s5 + $0x160] sm:$0xff] }
 0x190   :  { %v6974_v63 = vadd.f32 %v304_v62, %v202_v44  ;;  %314 = vmax.xlane.f32.xlu1 %v313_v60  ;;  %v540_v44 = vld [vmem:[%s9229_s5 + $0xc0] sm:$0xff]  ;;  %v5009_v60 = vcombine.low %v548_v50, %v552_v52  ;;  %v5018_v62 = vcombine.high %v556_v57, %v560_v59  ;;  %v5017_v3 = vcombine.low %v556_v57, %v560_v59  ;;  %v545_v57 = vld [vmem:[%s9229_s5 + $0xe8] sm:$0xff] }
 0x191   :  { %1288 = vmatprep.subr.bf16.mxu0 %v4994_v43  ;;  %v5002_v49 = vcombine.high %v540_v44, %v544_v45  ;;  %v5001_v54 = vcombine.low %v540_v44, %v544_v45  ;;  %v529_v43 = vld [vmem:[%s9229_s5 + $0x68] sm:$0xff] }
 0x192   :  { %v316_v1 = vmax.f32 %v6972_v61, %v6974_v63  ;;  %1289 = vmatpush1.bf16.msra.mxu0 %v4993_v47 }
 0x193   :  { %1290 = vmatprep.subr.bf16.mxu0 %v5002_v49 }
 0x194   :  { %317 = vmax.xlane.f32.xlu1 %v316_v1  ;;  %v564_v1 = vld [vmem:[%s9229_s5 + $0x180] sm:$0xff] }
 0x195   :  { %v5026_v4 = vcombine.high %v564_v1, %v568_v2  ;;  %v5025_v7 = vcombine.low %v564_v1, %v568_v2 }
 0x196   :  { %1291 = vmatpush1.bf16.msra.mxu0 %v5001_v54 }
 0x197   :  { %1292 = vmatprep.subr.bf16.mxu0 %v5010_v55  ;;  %v541_v55 = vld [vmem:[%s9229_s5 + $0xc8] sm:$0xff] }
 0x198   :  { %v5003_v2 = vcombine.low %v541_v55, %v545_v57 }
 0x19a   :  { %1293 = vmatpush1.bf16.msra.mxu0 %v5009_v60  ;;  %v549_v60 = vld [vmem:[%s9229_s5 + $0x108] sm:$0xff] }
 0x19b   :  { %1294 = vmatprep.subr.bf16.mxu0 %v5018_v62  ;;  %v553_v62 = vld [vmem:[%s9229_s5 + $0x128] sm:$0xff] }
 0x19e   :  { %1295 = vmatpush1.bf16.msra.mxu0 %v5017_v3 }
 0x19f   :  { %1296 = vmatprep.subr.bf16.mxu0 %v5026_v4  ;;  %v5012_v4 = vcombine.high %v549_v60, %v553_v62 }
 0x1a2   :  { %1297 = vmatpush1.bf16.msra.mxu0 %v5025_v7  ;;  %v5011_v7 = vcombine.low %v549_v60, %v553_v62  ;;  %v628_v62 = vld [vmem:[%s9229_s5 + $0x380] sm:$0xff] }
 0x1a3   :  { %1298 = vmatprep.subr.bf16.mxu0 %v5034_v8  ;;  %v5020_v8 = vcombine.high %v557_v5, %v561_v6 }
 0x1a6   :  { %1299 = vmatpush1.bf16.msra.mxu0 %v5033_v11  ;;  %v5019_v11 = vcombine.low %v557_v5, %v561_v6  ;;  %v633_v6 = vld [vmem:[%s9229_s5 + $0x3a8] sm:$0xff] }
 0x1a7   :  { %1300 = vmatprep.subr.bf16.mxu0 %v5042_v12  ;;  %v5028_v12 = vcombine.high %v565_v9, %v569_v10 }
 0x1aa   :  { %1301 = vmatpush1.bf16.msra.mxu0 %v5041_v15  ;;  %v5027_v15 = vcombine.low %v565_v9, %v569_v10  ;;  %v636_v10 = vld [vmem:[%s9229_s5 + $0x3c0] sm:$0xff] }
 0x1ab   :  { %1302 = vmatprep.subr.bf16.mxu0 %v5050_v16  ;;  %v5036_v16 = vcombine.high %v573_v13, %v577_v14 }
 0x1ae   :  { %1303 = vmatpush1.bf16.msra.mxu0 %v5049_v19  ;;  %v5035_v19 = vcombine.low %v573_v13, %v577_v14  ;;  %v641_v14 = vld [vmem:[%s9229_s5 + $0x3e8] sm:$0xff] }
 0x1af   :  { %1304 = vmatprep.subr.bf16.mxu0 %v5058_v20  ;;  %v5044_v20 = vcombine.high %v581_v17, %v585_v18 }
 0x1b2   :  { %1305 = vmatpush1.bf16.msra.mxu0 %v5057_v21  ;;  %v589_v21 = vld [vmem:[%s9229_s5 + $0x248] sm:$0xff] }
 0x215   :  { %v309_v22 = vpop.xlane.xlu0 %308 }
 0x216   :  { %v319_v23 = vsub.f32 %v6954_v46, %v309_v22  ;;  %v320_v24 = vsub.f32 %v6956_v48, %v309_v22  ;;  %v593_v22 = vld [vmem:[%s9229_s5 + $0x268] sm:$0xff] }
 0x218   :  { %v327_v25 = vmul.f32 1.442695, %v319_v23  ;;  %v329_v26 = vmul.f32 1.442695, %v320_v24  ;;  %v5043_v23 = vcombine.low %v581_v17, %v585_v18  ;;  %v5052_v24 = vcombine.high %v589_v21, %v593_v22  ;;  %v518_v18 = vld [vmem:[%s9229_s5 + $0x10] sm:$0xff] }
 0x219   :  { %v312_v27 = vpop.xlane.xlu0 %311 }
 0x21a   :  { %6276 = vpow2.f32 %v327_v25  ;;  %v321_v29 = vsub.f32 %v6960_v51, %v312_v27  ;;  %v322_v30 = vsub.f32 %v6962_v53, %v312_v27  ;;  %v525_v53 = vld [vmem:[%s9229_s5 + $0x48] sm:$0xff]  ;;  %v5051_v27 = vcombine.low %v589_v21, %v593_v22  ;;  %v523_v22 = vld [vmem:[%s9229_s5 + $0x38] sm:$0xff] }
 0x21b   :  { %6278 = vpow2.f32 %v329_v26  ;;  %v4988_v47 = vcombine.high %v525_v53, %v529_v43  ;;  %v4987_v50 = vcombine.low %v525_v53, %v529_v43  ;;  %v597_v25 = vld [vmem:[%s9229_s5 + $0x288] sm:$0xff] }
 0x21c   :  { %v331_v32 = vmul.f32 1.442695, %v321_v29  ;;  %v333_v33 = vmul.f32 1.442695, %v322_v30  ;;  %v601_v26 = vld [vmem:[%s9229_s5 + $0x2a8] sm:$0xff] }
 0x21d   :  { %v315_v35 = vpop.xlane.xlu1 %314  ;;  %v5060_v29 = vcombine.high %v597_v25, %v601_v26  ;;  %v5059_v30 = vcombine.low %v597_v25, %v601_v26  ;;  %v613_v53 = vld [vmem:[%s9229_s5 + $0x308] sm:$0xff] }
 0x21e   :  { %6280 = vpow2.f32 %v331_v32  ;;  %v323_v36 = vsub.f32 %v6966_v56, %v315_v35  ;;  %v324_v37 = vsub.f32 %v6968_v58, %v315_v35  ;;  %v604_v32 = vld [vmem:[%s9229_s5 + $0x2c0] sm:$0xff]  ;;  %v605_v35 = vld [vmem:[%s9229_s5 + $0x2c8] sm:$0xff] }
 0x21f   :  { %6282 = vpow2.f32 %v333_v33  ;;  %v608_v33 = vld [vmem:[%s9229_s5 + $0x2e0] sm:$0xff] }
 0x220   :  { %v335_v46 = vmul.f32 1.442695, %v323_v36  ;;  %v337_v48 = vmul.f32 1.442695, %v324_v37  ;;  %v5066_v36 = vcombine.high %v604_v32, %v608_v33  ;;  %v609_v37 = vld [vmem:[%s9229_s5 + $0x2e8] sm:$0xff] }
 0x221   :  { %v318_v38 = vpop.xlane.xlu1 %317 }
 0x222   :  { %6284 = vpow2.f32 %v335_v46  ;;  %v325_v41 = vsub.f32 %v6972_v61, %v318_v38  ;;  %v326_v51 = vsub.f32 %v6974_v63, %v318_v38  ;;  %v533_v61 = vld [vmem:[%s9229_s5 + $0x88] sm:$0xff]  ;;  %v5065_v46 = vcombine.low %v604_v32, %v608_v33  ;;  %1306 = vmatprep.subr.bf16.mxu0 %v5066_v36 }
 0x223   :  { %6286 = vpow2.f32 %v337_v48  ;;  %v537_v63 = vld [vmem:[%s9229_s5 + $0xa8] sm:$0xff]  ;;  %v5067_v48 = vcombine.low %v605_v35, %v609_v37  ;;  %v5068_v38 = vcombine.high %v605_v35, %v609_v37 }
 0x224   :  { %v7120_v56 = vpop.eup %6276  ;;  %v339_v58 = vmul.f32 1.442695, %v325_v41  ;;  %v341_v44 = vmul.f32 1.442695, %v326_v51  ;;  %v4996_v54 = vcombine.high %v533_v61, %v537_v63  ;;  %v4995_v28 = vcombine.low %v533_v61, %v537_v63  ;;  %1307 = vmatpush1.bf16.msra.mxu0 %v5065_v46  ;;  %v612_v41 = vld [vmem:[%s9229_s5 + $0x300] sm:$0xff] }
 0x225   :  { %v7122_v45 = vpop.eup %6278  ;;  %v616_v51 = vld [vmem:[%s9229_s5 + $0x320] sm:$0xff] }
 0x226   :  { %6288 = vpow2.f32 %v339_v58  ;;  %471 = vmatprep.mubr.f32.mxu1 %v7122_v45  ;;  %v5074_v43 = vcombine.high %v612_v41, %v616_v51  ;;  %v617_v58 = vld [vmem:[%s9229_s5 + $0x328] sm:$0xff]  ;;  %v620_v63 = vld [vmem:[%s9229_s5 + $0x340] sm:$0xff] }
 0x227   :  { %6290 = vpow2.f32 %v341_v44  ;;  %472 = vmatmul.mubr.f32.vlgmr.msra.gmra.mrb[0].mxu1 %v7120_v56  ;;  %v5073_v44 = vcombine.low %v612_v41, %v616_v51  ;;  %v5076_v61 = vcombine.high %v613_v53, %v617_v58 }
 0x228   :  { %v7132_v49 = vpop.eup %6280  ;;  %1338 = vmatpush1.bf16.msra.mxu1 %v4979_v34  ;;  %v5004_v34 = vcombine.high %v541_v55, %v545_v57  ;;  %1308 = vmatprep.subr.bf16.mxu0 %v5074_v43  ;;  %v625_v57 = vld [vmem:[%s9229_s5 + $0x368] sm:$0xff] }
 0x229   :  { %v7137_v52 = vpop.eup %6282  ;;  %1339 = vmatprep.subr.bf16.mxu1 %v4988_v47  ;;  %v5075_v47 = vcombine.low %v613_v53, %v617_v58  ;;  %1309 = vmatpush1.bf16.msra.mxu0 %v5073_v44  ;;  %v526_v53 = vld [vmem:[%s9229_s5 + $0x50] sm:$0xff] }
 0x22a   :  { %477 = vmatprep.mubr.f32.mxu1 %v7137_v52  ;;  %v530_v44 = vld [vmem:[%s9229_s5 + $0x70] sm:$0xff] }
 0x22b   :  { %478 = vmatmul.mubr.f32.gmra.mrb[2].mxu1 %v7132_v49 }
 0x22c   :  { %v7147_v59 = vpop.eup %6284  ;;  %1340 = vmatpush1.bf16.msra.mxu1 %v4987_v50  ;;  %v624_v50 = vld [vmem:[%s9229_s5 + $0x360] sm:$0xff] }
 0x22d   :  { %v7149_v31 = vpop.eup %6286  ;;  %1341 = vmatprep.subr.bf16.mxu1 %v4996_v54  ;;  %v621_v54 = vld [vmem:[%s9229_s5 + $0x348] sm:$0xff]  ;;  %v5082_v55 = vcombine.high %v620_v63, %v624_v50 }
 0x22e   :  { %483 = vmatprep.mubr.f32.mxu1 %v7149_v31  ;;  %v5084_v60 = vcombine.high %v621_v54, %v625_v57 }
 0x22f   :  { %484 = vmatmul.mubr.f32.gmra.mrb[4].mxu1 %v7147_v59  ;;  %1310 = vmatprep.subr.bf16.mxu0 %v5082_v55  ;;  %v535_v55 = vld [vmem:[%s9229_s5 + $0x98] sm:$0xff] }
 0x230   :  { %v7159_v1 = vpop.eup %6288  ;;  %1342 = vmatpush1.bf16.msra.mxu1 %v4995_v28  ;;  %v5081_v28 = vcombine.low %v620_v63, %v624_v50  ;;  %v4990_v63 = vcombine.high %v526_v53, %v530_v44 }
 0x231   :  { %v7161_v3 = vpop.eup %6290  ;;  %1343 = vmatprep.subr.bf16.mxu1 %v5004_v34  ;;  %v5083_v34 = vcombine.low %v621_v54, %v625_v57  ;;  %v539_v57 = vld [vmem:[%s9229_s5 + $0xb8] sm:$0xff] }
 0x232   :  { %489 = vmatprep.mubr.f32.mxu1 %v7161_v3  ;;  %1311 = vmatpush1.bf16.msra.mxu0 %v5081_v28 }
 0x233   :  { %490 = vmatmul.mubr.f32.gmra.mrb[6].mxu1 %v7159_v1 }
 0x234   :  { %1344 = vmatpush1.bf16.msra.mxu1 %v5003_v2  ;;  %v632_v2 = vld [vmem:[%s9229_s5 + $0x3a0] sm:$0xff] }
 0x235   :  { %1345 = vmatprep.subr.bf16.mxu1 %v5012_v4  ;;  %v629_v4 = vld [vmem:[%s9229_s5 + $0x388] sm:$0xff]  ;;  %v5090_v5 = vcombine.high %v628_v62, %v632_v2 }
 0x236   :  { %v5092_v9 = vcombine.high %v629_v4, %v633_v6 }
 0x237   :  { %1312 = vmatprep.subr.bf16.mxu0 %v5090_v5  ;;  %v5000_v5 = vcombine.high %v535_v55, %v539_v57 }
 0x238   :  { %1346 = vmatpush1.bf16.msra.mxu1 %v5011_v7  ;;  %v5089_v7 = vcombine.low %v628_v62, %v632_v2 }
 0x239   :  { %1347 = vmatprep.subr.bf16.mxu1 %v5020_v8  ;;  %v5091_v8 = vcombine.low %v629_v4, %v633_v6 }
 0x23a   :  { %1313 = vmatpush1.bf16.msra.mxu0 %v5089_v7 }
 0x23c   :  { %1348 = vmatpush1.bf16.msra.mxu1 %v5019_v11  ;;  %v640_v11 = vld [vmem:[%s9229_s5 + $0x3e0] sm:$0xff] }
 0x23d   :  { %1349 = vmatprep.subr.bf16.mxu1 %v5028_v12  ;;  %v637_v12 = vld [vmem:[%s9229_s5 + $0x3c8] sm:$0xff]  ;;  %v5098_v13 = vcombine.high %v636_v10, %v640_v11 }
 0x23e   :  { %v5100_v17 = vcombine.high %v637_v12, %v641_v14 }
 0x23f   :  { %1314 = vmatprep.subr.bf16.mxu0 %v5098_v13  ;;  %v4999_v13 = vcombine.low %v535_v55, %v539_v57 }
 0x240   :  { %1350 = vmatpush1.bf16.msra.mxu1 %v5027_v15  ;;  %v5097_v15 = vcombine.low %v636_v10, %v640_v11  ;;  %v542_v10 = vld [vmem:[%s9229_s5 + $0xd0] sm:$0xff] }
 0x241   :  { %1351 = vmatprep.subr.bf16.mxu1 %v5036_v16  ;;  %v5099_v16 = vcombine.low %v637_v12, %v641_v14  ;;  %v546_v12 = vld [vmem:[%s9229_s5 + $0xf0] sm:$0xff] }
 0x242   :  { %1315 = vmatpush1.bf16.msra.mxu0 %v5097_v15  ;;  %v550_v14 = vld [vmem:[%s9229_s5 + $0x110] sm:$0xff]  ;;  %v5006_v15 = vcombine.high %v542_v10, %v546_v12 }
 0x244   :  { %1352 = vmatpush1.bf16.msra.mxu1 %v5035_v19  ;;  %v522_v19 = vld [vmem:[%s9229_s5 + $0x30] sm:$0xff] }
 0x245   :  { %1353 = vmatprep.subr.bf16.mxu1 %v5044_v20  ;;  %v519_v20 = vld [vmem:[%s9229_s5 + $0x18] sm:$0xff]  ;;  %v4982_v21 = vcombine.high %v518_v18, %v522_v19 }
 0x246   :  { %v4984_v25 = vcombine.high %v519_v20, %v523_v22 }
 0x247   :  { %1390 = vmatprep.subr.bf16.mxu0 %v4982_v21 }
 0x248   :  { %1354 = vmatpush1.bf16.msra.mxu1 %v5043_v23  ;;  %v4981_v23 = vcombine.low %v518_v18, %v522_v19  ;;  %v551_v18 = vld [vmem:[%s9229_s5 + $0x118] sm:$0xff] }
 0x249   :  { %1355 = vmatprep.subr.bf16.mxu1 %v5052_v24  ;;  %v4983_v24 = vcombine.low %v519_v20, %v523_v22  ;;  %v555_v19 = vld [vmem:[%s9229_s5 + $0x138] sm:$0xff]  ;;  %v5005_v20 = vcombine.low %v542_v10, %v546_v12  ;;  %v602_v10 = vld [vmem:[%s9229_s5 + $0x2b0] sm:$0xff] }
 0x24a   :  { %v599_v12 = vld [vmem:[%s9229_s5 + $0x298] sm:$0xff] }
 0x24c   :  { %1356 = vmatpush1.bf16.msra.mxu1 %v5051_v27 }
 0x24d   :  { %1357 = vmatprep.subr.bf16.mxu1 %v5060_v29 }
 0x250   :  { %1358 = vmatpush1.bf16.msra.mxu1 %v5059_v30 }
 0x251   :  { %1359 = vmatprep.subr.bf16.mxu1 %v5068_v38 }
 0x254   :  { %1360 = vmatpush1.bf16.msra.mxu1 %v5067_v48 }
 0x255   :  { %1361 = vmatprep.subr.bf16.mxu1 %v5076_v61 }
 0x258   :  { %1362 = vmatpush1.bf16.msra.mxu1 %v5075_v47  ;;  %v527_v47 = vld [vmem:[%s9229_s5 + $0x58] sm:$0xff] }
 0x259   :  { %1363 = vmatprep.subr.bf16.mxu1 %v5084_v60  ;;  %v4989_v60 = vcombine.low %v526_v53, %v530_v44  ;;  %v574_v53 = vld [vmem:[%s9229_s5 + $0x1d0] sm:$0xff]  ;;  %v579_v44 = vld [vmem:[%s9229_s5 + $0x1f8] sm:$0xff] }
 0x25c   :  { %1364 = vmatpush1.bf16.msra.mxu1 %v5083_v34 }
 0x25d   :  { %1365 = vmatprep.subr.bf16.mxu1 %v5092_v9 }
 0x260   :  { %1366 = vmatpush1.bf16.msra.mxu1 %v5091_v8 }
 0x261   :  { %1367 = vmatprep.subr.bf16.mxu1 %v5100_v17  ;;  %v554_v17 = vld [vmem:[%s9229_s5 + $0x130] sm:$0xff] }
 0x262   :  { %v5014_v22 = vcombine.high %v550_v14, %v554_v17 }
 0x264   :  { %1368 = vmatpush1.bf16.msra.mxu1 %v5099_v16 }
 0x265   :  { %1443 = vmatprep.subr.bf16.mxu1 %v4984_v25  ;;  %v562_v25 = vld [vmem:[%s9229_s5 + $0x170] sm:$0xff] }
 0x2fa   :  { %v473_v26 = vpop.f32.mrb[0].mxu1 }
 0x2fb   :  { %v475_v27 = vpop.f32.mrb[1].mxu1  ;;  %6292 = vrcp.f32 %v473_v26  ;;  %v559_v26 = vld [vmem:[%s9229_s5 + $0x158] sm:$0xff] }
 0x2fc   :  { %6294 = vrcp.f32 %v475_v27  ;;  %v563_v27 = vld [vmem:[%s9229_s5 + $0x178] sm:$0xff] }
 0x2fe   :  { %v479_v29 = vpop.f32.mrb[2].mxu1 }
 0x2ff   :  { %6296 = vrcp.f32 %v479_v29  ;;  %v481_v30 = vpop.f32.mrb[3].mxu1  ;;  %v5013_v29 = vcombine.low %v550_v14, %v554_v17  ;;  %v607_v17 = vld [vmem:[%s9229_s5 + $0x2d8] sm:$0xff] }
 0x300   :  { %6298 = vrcp.f32 %v481_v30  ;;  %v5015_v30 = vcombine.low %v551_v18, %v555_v19 }
 0x302   :  { %v485_v32 = vpop.f32.mrb[4].mxu1 }
 0x303   :  { %v487_v33 = vpop.f32.mrb[5].mxu1  ;;  %6300 = vrcp.f32 %v485_v32 }
 0x304   :  { %6302 = vrcp.f32 %v487_v33  ;;  %v5024_v33 = vcombine.high %v559_v26, %v563_v27 }
 0x305   :  { %v6293_v36 = vpop.eup %6292 }
 0x306   :  { %v491_v35 = vpop.f32.mrb[6].mxu1  ;;  %v6295_v46 = vpop.eup %6294  ;;  %v504_v41 = vmul.f32 %v6293_v36, %v7120_v56  ;;  %v531_v56 = vld [vmem:[%s9229_s5 + $0x78] sm:$0xff]  ;;  %v570_v36 = vld [vmem:[%s9229_s5 + $0x1b0] sm:$0xff] }
 0x307   :  { %6304 = vrcp.f32 %v491_v35  ;;  %v493_v37 = vpop.f32.mrb[7].mxu1  ;;  %v505_v43 = vmul.f32 %v6295_v46, %v7122_v45  ;;  %v4992_v50 = vcombine.high %v527_v47, %v531_v56  ;;  %v534_v45 = vld [vmem:[%s9229_s5 + $0x90] sm:$0xff]  ;;  %v4991_v62 = vcombine.low %v527_v47, %v531_v56  ;;  %v571_v46 = vld [vmem:[%s9229_s5 + $0x1b8] sm:$0xff] }
 0x308   :  { %6306 = vrcp.f32 %v493_v37  ;;  %v566_v35 = vld [vmem:[%s9229_s5 + $0x190] sm:$0xff]  ;;  %v567_v37 = vld [vmem:[%s9229_s5 + $0x198] sm:$0xff] }
 0x309   :  { %v6297_v48 = vpop.eup %6296  ;;  %v5029_v47 = vcombine.low %v566_v35, %v570_v36  ;;  %v5031_v56 = vcombine.low %v567_v37, %v571_v46 }
 0x30a   :  { %v6299_v38 = vpop.eup %6298  ;;  %v506_v51 = vmul.f32 %v6297_v48, %v7132_v49 }
 0x30b   :  { %v507_v58 = vmul.f32 %v6299_v38, %v7137_v52  ;;  %v538_v52 = vld [vmem:[%s9229_s5 + $0xb0] sm:$0xff]  ;;  %v5023_v38 = vcombine.low %v559_v26, %v563_v27  ;;  %v619_v26 = vld [vmem:[%s9229_s5 + $0x338] sm:$0xff] }
 0x30c   :  { %v7289_v49 = vpack.c.bf16 %v506_v51, %v504_v41  ;;  %v4998_v2 = vcombine.high %v534_v45, %v538_v52  ;;  %v5030_v41 = vcombine.high %v566_v35, %v570_v36  ;;  %v5032_v51 = vcombine.high %v567_v37, %v571_v46  ;;  %v626_v35 = vld [vmem:[%s9229_s5 + $0x370] sm:$0xff]  ;;  %v623_v36 = vld [vmem:[%s9229_s5 + $0x358] sm:$0xff] }
 0x30d   :  { %v513_v61 = vpack.c.bf16 %v507_v58, %v505_v43  ;;  %v6301_v54 = vpop.eup %6300  ;;  %v578_v43 = vld [vmem:[%s9229_s5 + $0x1f0] sm:$0xff]  ;;  %v575_v58 = vld [vmem:[%s9229_s5 + $0x1d8] sm:$0xff] }
 0x30e   :  { %v6303_v28 = vpop.eup %6302  ;;  %v508_v6 = vmul.f32 %v6301_v54, %v7147_v59  ;;  %v543_v59 = vld [vmem:[%s9229_s5 + $0xd8] sm:$0xff]  ;;  %v5037_v55 = vcombine.low %v574_v53, %v578_v43  ;;  %v5039_v57 = vcombine.low %v575_v58, %v579_v44 }
 0x30f   :  { %1316 = vmatprep.mubr.bf16.mxu0 %v513_v61  ;;  %1369 = vmatprep.mubr.bf16.mxu1 %v513_v61  ;;  %v509_v8 = vmul.f32 %v6303_v28, %v7149_v31  ;;  %v547_v31 = vld [vmem:[%s9229_s5 + $0xf8] sm:$0xff] }
 0x310   :  { %1317 = vmatmul.mubr.bf16.vlgmr.msra.gmra.mrb[8].mxu0 %v7289_v49  ;;  %1370 = vmatmul.mubr.bf16.vlgmr.msra.gmra.mrb[8].mxu1 %v7289_v49  ;;  %v5008_v16 = vcombine.high %v543_v59, %v547_v31  ;;  %v5007_v21 = vcombine.low %v543_v59, %v547_v31  ;;  %v587_v54 = vld [vmem:[%s9229_s5 + $0x238] sm:$0xff] }
 0x311   :  { %v6305_v34 = vpop.eup %6304  ;;  %1391 = vmatpush1.bf16.msra.mxu0 %v4981_v23  ;;  %1444 = vmatpush1.bf16.msra.mxu1 %v4983_v24  ;;  %v5016_v23 = vcombine.high %v551_v18, %v555_v19  ;;  %v558_v24 = vld [vmem:[%s9229_s5 + $0x150] sm:$0xff]  ;;  %v603_v59 = vld [vmem:[%s9229_s5 + $0x2b8] sm:$0xff] }
 0x312   :  { %v6307_v4 = vpop.eup %6306  ;;  %1392 = vmatprep.subr.bf16.mxu0 %v4990_v63  ;;  %1445 = vmatprep.subr.bf16.mxu1 %v4992_v50  ;;  %v510_v7 = vmul.f32 %v6305_v34, %v7159_v1  ;;  %v5022_v32 = vcombine.high %v558_v24, %v562_v25  ;;  %v5021_v48 = vcombine.low %v558_v24, %v562_v25  ;;  %v582_v50 = vld [vmem:[%s9229_s5 + $0x210] sm:$0xff]  ;;  %v611_v18 = vld [vmem:[%s9229_s5 + $0x2f8] sm:$0xff] }
 0x313   :  { %v511_v9 = vmul.f32 %v6307_v4, %v7161_v3  ;;  %v4997_v3 = vcombine.low %v534_v45, %v538_v52  ;;  %v5040_v63 = vcombine.high %v575_v58, %v579_v44  ;;  %v586_v45 = vld [vmem:[%s9229_s5 + $0x230] sm:$0xff]  ;;  %v583_v52 = vld [vmem:[%s9229_s5 + $0x218] sm:$0xff]  ;;  %v5064_v14 = vcombine.high %v599_v12, %v603_v59 }
 0x314   :  { %v7312_v11 = vpack.c.bf16 %v510_v7, %v508_v6  ;;  %v5046_v28 = vcombine.high %v582_v50, %v586_v45  ;;  %v5048_v34 = vcombine.high %v583_v52, %v587_v54  ;;  %v595_v4 = vld [vmem:[%s9229_s5 + $0x278] sm:$0xff]  ;;  %v5047_v6 = vcombine.low %v583_v52, %v587_v54  ;;  %v618_v24 = vld [vmem:[%s9229_s5 + $0x330] sm:$0xff] }
 0x315   :  { %1393 = vmatpush1.bf16.msra.mxu0 %v4989_v60  ;;  %1446 = vmatpush1.bf16.msra.mxu1 %v4991_v62  ;;  %v7323_v1 = vpack.c.bf16 %v511_v9, %v509_v8  ;;  %v590_v60 = vld [vmem:[%s9229_s5 + $0x250] sm:$0xff]  ;;  %v615_v25 = vld [vmem:[%s9229_s5 + $0x318] sm:$0xff] }
 0x316   :  { %1394 = vmatprep.subr.bf16.mxu0 %v4998_v2  ;;  %1447 = vmatprep.subr.bf16.mxu1 %v5000_v5  ;;  %v594_v62 = vld [vmem:[%s9229_s5 + $0x270] sm:$0xff]  ;;  %v591_v2 = vld [vmem:[%s9229_s5 + $0x258] sm:$0xff]  ;;  %v5045_v5 = vcombine.low %v582_v50, %v586_v45 }
 0x317   :  { %1326 = vmatprep.mubr.bf16.mxu0 %v7323_v1  ;;  %1379 = vmatprep.mubr.bf16.mxu1 %v7323_v1  ;;  %v5054_v7 = vcombine.high %v590_v60, %v594_v62  ;;  %v5056_v8 = vcombine.high %v591_v2, %v595_v4  ;;  %v598_v9 = vld [vmem:[%s9229_s5 + $0x290] sm:$0xff]  ;;  %v5053_v31 = vcombine.low %v590_v60, %v594_v62  ;;  %v627_v37 = vld [vmem:[%s9229_s5 + $0x378] sm:$0xff]  ;;  %v1502_v60 = vld [vmem:[#allocation4 + $0x20] sm:$0xff] }
 0x318   :  { %1327 = vmatmul.mubr.bf16.gmra.mrb[12].mxu0 %v7312_v11  ;;  %1380 = vmatmul.mubr.bf16.gmra.mrb[12].mxu1 %v7312_v11  ;;  %v5061_v19 = vcombine.low %v598_v9, %v602_v10  ;;  %v635_v58 = vld [vmem:[%s9229_s5 + $0x3b8] sm:$0xff]  ;;  %v642_v50 = vld [vmem:[%s9229_s5 + $0x3f0] sm:$0xff] }
 0x319   :  { %1395 = vmatpush1.bf16.msra.mxu0 %v4997_v3  ;;  %1448 = vmatpush1.bf16.msra.mxu1 %v4999_v13  ;;  %v5055_v3 = vcombine.low %v591_v2, %v595_v4  ;;  %v5062_v13 = vcombine.high %v598_v9, %v602_v10  ;;  %v639_v45 = vld [vmem:[%s9229_s5 + $0x3d8] sm:$0xff]  ;;  %v1514_v9 = vld [vmem:[#allocation4 + $0x80] sm:$0xff] }
 0x31a   :  { %1422 = vmatprep.mubr.bf16.mxu0 %v513_v61  ;;  %1475 = vmatprep.mubr.bf16.mxu1 %v513_v61  ;;  %v5038_v61 = vcombine.high %v574_v53, %v578_v43  ;;  %v634_v53 = vld [vmem:[%s9229_s5 + $0x3b0] sm:$0xff]  ;;  %v631_v43 = vld [vmem:[%s9229_s5 + $0x398] sm:$0xff]  ;;  %v1518_v10 = vld [vmem:[#allocation4 + $0xa0] sm:$0xff] }
 0x31b   :  { %1396 = vmatprep.subr.bf16.mxu0 %v5006_v15  ;;  %1449 = vmatprep.subr.bf16.mxu1 %v5008_v16  ;;  %v606_v15 = vld [vmem:[%s9229_s5 + $0x2d0] sm:$0xff]  ;;  %v643_v52 = vld [vmem:[%s9229_s5 + $0x3f8] sm:$0xff] }
 0x31c   :  { %v610_v16 = vld [vmem:[%s9229_s5 + $0x2f0] sm:$0xff]  ;;  %v5103_v2 = vcombine.low %v639_v45, %v643_v52 }
 0x31d   :  { %1397 = vmatpush1.bf16.msra.mxu0 %v5005_v20  ;;  %1450 = vmatpush1.bf16.msra.mxu1 %v5007_v21  ;;  %v5063_v20 = vcombine.low %v599_v12, %v603_v59  ;;  %v5070_v21 = vcombine.high %v606_v15, %v610_v16  ;;  %v5069_v27 = vcombine.low %v606_v15, %v610_v16  ;;  %v1503_v15 = vld [vmem:[#allocation4 + $0x28] sm:$0xff]  ;;  %v6552_v16 = vmov 0  }
 0x31e   :  { %1398 = vmatprep.subr.bf16.mxu0 %v5014_v22  ;;  %1451 = vmatprep.subr.bf16.mxu1 %v5016_v23  ;;  %v5072_v22 = vcombine.high %v607_v17, %v611_v18  ;;  %v614_v23 = vld [vmem:[%s9229_s5 + $0x310] sm:$0xff]  ;;  %v5122_v59 = vcombine.high %v1514_v9, %v1518_v10 }
 0x31f   :  { %v5077_v46 = vcombine.low %v614_v23, %v618_v24 }
 0x321   :  { %1399 = vmatpush1.bf16.msra.mxu0 %v5013_v29  ;;  %1452 = vmatpush1.bf16.msra.mxu1 %v5015_v30  ;;  %v5071_v29 = vcombine.low %v607_v17, %v611_v18  ;;  %v5078_v30 = vcombine.high %v614_v23, %v618_v24  ;;  %v1507_v18 = vld [vmem:[#allocation4 + $0x48] sm:$0xff] }
 0x322   :  { %1400 = vmatprep.subr.bf16.mxu0 %v5022_v32  ;;  %1453 = vmatprep.subr.bf16.mxu1 %v5024_v33  ;;  %v5080_v32 = vcombine.high %v615_v25, %v619_v26  ;;  %v622_v33 = vld [vmem:[%s9229_s5 + $0x350] sm:$0xff]  ;;  %v1515_v24 = vld [vmem:[#allocation4 + $0x88] sm:$0xff] }
 0x323   :  { %v5085_v44 = vcombine.low %v622_v33, %v626_v35 }
 0x325   :  { %1401 = vmatpush1.bf16.msra.mxu0 %v5021_v48  ;;  %1454 = vmatpush1.bf16.msra.mxu1 %v5023_v38  ;;  %v5079_v48 = vcombine.low %v615_v25, %v619_v26  ;;  %v5086_v38 = vcombine.high %v622_v33, %v626_v35  ;;  %v1519_v25 = vld [vmem:[#allocation4 + $0xa8] sm:$0xff]  ;;  %v6343_v33 = vld [vmem:[%s9255_s8 + $0x18] sm:$0xff] }
 0x326   :  { %1402 = vmatprep.subr.bf16.mxu0 %v5030_v41  ;;  %1455 = vmatprep.subr.bf16.mxu1 %v5032_v51  ;;  %v5088_v41 = vcombine.high %v623_v36, %v627_v37  ;;  %v630_v51 = vld [vmem:[%s9229_s5 + $0x390] sm:$0xff] }
 0x327   :  { %v5093_v54 = vcombine.low %v630_v51, %v634_v53 }
 0x329   :  { %1403 = vmatpush1.bf16.msra.mxu0 %v5029_v47  ;;  %1456 = vmatpush1.bf16.msra.mxu1 %v5031_v56  ;;  %v5087_v47 = vcombine.low %v623_v36, %v627_v37  ;;  %v5094_v56 = vcombine.high %v630_v51, %v634_v53  ;;  %v5123_v36 = vcombine.low %v1515_v24, %v1519_v25  ;;  %v1508_v51 = vld [vmem:[#allocation4 + $0x50] sm:$0xff] }
 0x32a   :  { %1404 = vmatprep.subr.bf16.mxu0 %v5038_v61  ;;  %1457 = vmatprep.subr.bf16.mxu1 %v5040_v63  ;;  %v5096_v61 = vcombine.high %v631_v43, %v635_v58  ;;  %v638_v63 = vld [vmem:[%s9229_s5 + $0x3d0] sm:$0xff] }
 0x32b   :  { %v5101_v62 = vcombine.low %v638_v63, %v642_v50  ;;  %v1512_v53 = vld [vmem:[#allocation4 + $0x70] sm:$0xff] }
 0x32d   :  { %1405 = vmatpush1.bf16.msra.mxu0 %v5037_v55  ;;  %1458 = vmatpush1.bf16.msra.mxu1 %v5039_v57  ;;  %v5095_v55 = vcombine.low %v631_v43, %v635_v58  ;;  %v5102_v57 = vcombine.high %v638_v63, %v642_v50  ;;  %v1516_v58 = vld [vmem:[#allocation4 + $0x90] sm:$0xff]  ;;  %v1941_v50 = vld [vmem:[%s9231_s7 + $0x8] sm:$0xff] }
 0x32e   :  { %1406 = vmatprep.subr.bf16.mxu0 %v5046_v28  ;;  %1459 = vmatprep.subr.bf16.mxu1 %v5048_v34  ;;  %v5104_v28 = vcombine.high %v639_v45, %v643_v52  ;;  %v1498_v34 = vld [vmem:[#allocation4] sm:$0xff]  ;;  %v1958_v45 = vld [vmem:[%s9231_s7 + $0x90] sm:$0xff]  ;;  %v1959_v52 = vld [vmem:[%s9231_s7 + $0x98] sm:$0xff] }
 0x32f   :  { %v5106_v4 = vcombine.high %v1498_v34, %v1502_v60 }
 0x331   :  { %1407 = vmatpush1.bf16.msra.mxu0 %v5045_v5  ;;  %1460 = vmatpush1.bf16.msra.mxu1 %v5047_v6  ;;  %v1506_v5 = vld [vmem:[#allocation4 + $0x40] sm:$0xff] }
 0x332   :  { %1408 = vmatprep.subr.bf16.mxu0 %v5054_v7  ;;  %1461 = vmatprep.subr.bf16.mxu1 %v5056_v8  ;;  %v1510_v6 = vld [vmem:[#allocation4 + $0x60] sm:$0xff]  ;;  %v5105_v7 = vcombine.low %v1498_v34, %v1502_v60  ;;  %v1943_v34 = vld [vmem:[%s9231_s7 + $0x18] sm:$0xff] }
 0x333   :  { %v5114_v8 = vcombine.high %v1506_v5, %v1510_v6  ;;  %v5113_v12 = vcombine.low %v1506_v5, %v1510_v6  ;;  %v1960_v60 = vld [vmem:[%s9231_s7 + $0xa0] sm:$0xff]  ;;  %v1524_v5 = vld [vmem:[#allocation4 + $0xd0] sm:$0xff] }
 0x335   :  { %1409 = vmatpush1.bf16.msra.mxu0 %v5053_v31  ;;  %1462 = vmatpush1.bf16.msra.mxu1 %v5055_v3  ;;  %v1522_v31 = vld [vmem:[#allocation4 + $0xc0] sm:$0xff] }
 0x336   :  { %1410 = vmatprep.subr.bf16.mxu0 %v5062_v13  ;;  %1463 = vmatprep.subr.bf16.mxu1 %v5064_v14  ;;  %v1526_v3 = vld [vmem:[#allocation4 + $0xe0] sm:$0xff]  ;;  %v5121_v13 = vcombine.low %v1514_v9, %v1518_v10  ;;  %v1945_v10 = vld [vmem:[%s9231_s7 + $0x28] sm:$0xff] }
 0x337   :  { %v5130_v14 = vcombine.high %v1522_v31, %v1526_v3  ;;  %v1944_v9 = vld [vmem:[%s9231_s7 + $0x20] sm:$0xff] }
 0x339   :  { %1411 = vmatpush1.bf16.msra.mxu0 %v5061_v19  ;;  %1464 = vmatpush1.bf16.msra.mxu1 %v5063_v20  ;;  %v1511_v19 = vld [vmem:[#allocation4 + $0x68] sm:$0xff]  ;;  %v7483_v20 = vld [vmem:[%s9255_s8] sm:$0xff] }
 0x33a   :  { %1412 = vmatprep.subr.bf16.mxu0 %v5070_v21  ;;  %1465 = vmatprep.subr.bf16.mxu1 %v5072_v22  ;;  %v5116_v23 = vcombine.high %v1507_v18, %v1511_v19  ;;  %v5115_v26 = vcombine.low %v1507_v18, %v1511_v19  ;;  %v1517_v19 = vld [vmem:[#allocation4 + $0x98] sm:$0xff] }
 0x33d   :  { %1413 = vmatpush1.bf16.msra.mxu0 %v5069_v27  ;;  %1466 = vmatpush1.bf16.msra.mxu1 %v5071_v29  ;;  %v5124_v27 = vcombine.high %v1515_v24, %v1519_v25  ;;  %v1523_v29 = vld [vmem:[#allocation4 + $0xc8] sm:$0xff]  ;;  %v1525_v24 = vld [vmem:[#allocation4 + $0xd8] sm:$0xff] }
 0x33e   :  { %1414 = vmatprep.subr.bf16.mxu0 %v5078_v30  ;;  %1467 = vmatprep.subr.bf16.mxu1 %v5080_v32  ;;  %v1527_v30 = vld [vmem:[#allocation4 + $0xe8] sm:$0xff]  ;;  %v6342_v32 = vld [vmem:[%s9255_s8 + $0x10] sm:$0xff]  ;;  %v1529_v25 = vld [vmem:[#allocation4 + $0xf8] sm:$0xff] }
 0x33f   :  { %v7500_v35 = vpack.c.bf16 %v6343_v33, %v6342_v32  ;;  %v5132_v37 = vcombine.high %v1523_v29, %v1527_v30  ;;  %v1963_v32 = vld [vmem:[%s9231_s7 + $0xb8] sm:$0xff] }
 0x341   :  { %1415 = vmatpush1.bf16.msra.mxu0 %v5077_v46  ;;  %1468 = vmatpush1.bf16.msra.mxu1 %v5079_v48  ;;  %v1500_v46 = vld [vmem:[#allocation4 + $0x10] sm:$0xff] }
 0x342   :  { %1416 = vmatprep.subr.bf16.mxu0 %v5086_v38  ;;  %1469 = vmatprep.subr.bf16.mxu1 %v5088_v41  ;;  %v1504_v48 = vld [vmem:[#allocation4 + $0x30] sm:$0xff]  ;;  %v5131_v38 = vcombine.low %v1523_v29, %v1527_v30  ;;  %v5135_v29 = vcombine.low %v1525_v24, %v1529_v25 }
 0x343   :  { %v5110_v41 = vcombine.high %v1500_v46, %v1504_v48  ;;  %v5109_v43 = vcombine.low %v1500_v46, %v1504_v48  ;;  %v1962_v30 = vld [vmem:[%s9231_s7 + $0xb0] sm:$0xff]  ;;  %v1965_v46 = vld [vmem:[%s9231_s7 + $0xc8] sm:$0xff]  ;;  %v1988_v48 = vld [vmem:[%s9231_s7 + $0x180] sm:$0xff] }
 0x344   :  { %v5876_v33 = vpack.c.bf16 %v1963_v32, %v1962_v30  ;;  %v2021_v30 = vld [vmem:[%s9231_s7 + $0x288] sm:$0xff]  ;;  %v1980_v32 = vld [vmem:[%s9231_s7 + $0x140] sm:$0xff] }
 0x345   :  { %1417 = vmatpush1.bf16.msra.mxu0 %v5085_v44  ;;  %1470 = vmatpush1.bf16.msra.mxu1 %v5087_v47  ;;  %v1956_v44 = vld [vmem:[%s9231_s7 + $0x80] sm:$0xff]  ;;  %v1957_v47 = vld [vmem:[%s9231_s7 + $0x88] sm:$0xff] }
 0x346   :  { %1418 = vmatprep.subr.bf16.mxu0 %v5094_v56  ;;  %1471 = vmatprep.subr.bf16.mxu1 %v5096_v61  ;;  %v1940_v56 = vld [vmem:[%s9231_s7] sm:$0xff]  ;;  %v5118_v61 = vcombine.high %v1508_v51, %v1512_v53  ;;  %v5864_v63 = vpack.c.bf16 %v1957_v47, %v1956_v44  ;;  %v1973_v47 = vld [vmem:[%s9231_s7 + $0x108] sm:$0xff] }
 0x347   :  { %v1972_v44 = vld [vmem:[%s9231_s7 + $0x100] sm:$0xff] }
 0x349   :  { %1419 = vmatpush1.bf16.msra.mxu0 %v5093_v54  ;;  %1472 = vmatpush1.bf16.msra.mxu1 %v5095_v55  ;;  %v1520_v54 = vld [vmem:[#allocation4 + $0xb0] sm:$0xff]  ;;  %v5866_v55 = vpack.c.bf16 %v1941_v50, %v1940_v56  ;;  %v5898_v56 = vpack.c.bf16 %v1973_v47, %v1972_v44  ;;  %v1985_v44 = vld [vmem:[%s9231_s7 + $0x168] sm:$0xff] }
 0x34a   :  { %1420 = vmatprep.subr.bf16.mxu0 %v5102_v57  ;;  %1473 = vmatprep.subr.bf16.mxu1 %v5104_v28  ;;  %v5868_v57 = vpack.c.bf16 %v1959_v52, %v1958_v45  ;;  %v1942_v28 = vld [vmem:[%s9231_s7 + $0x10] sm:$0xff]  ;;  %v1991_v52 = vld [vmem:[%s9231_s7 + $0x198] sm:$0xff] }
 0x34b   :  { %v5870_v6 = vpack.c.bf16 %v1943_v34, %v1942_v28  ;;  %v1990_v50 = vld [vmem:[%s9231_s7 + $0x190] sm:$0xff] }
 0x34c   :  { %v1974_v34 = vld [vmem:[%s9231_s7 + $0x110] sm:$0xff] }
 0x34d   :  { %1421 = vmatpush1.bf16.msra.mxu0 %v5101_v62  ;;  %1474 = vmatpush1.bf16.msra.mxu1 %v5103_v2  ;;  %v1961_v62 = vld [vmem:[%s9231_s7 + $0xa8] sm:$0xff]  ;;  %v5117_v2 = vcombine.low %v1508_v51, %v1512_v53  ;;  %v1948_v51 = vld [vmem:[%s9231_s7 + $0x40] sm:$0xff] }
 0x34e   :  { %1696 = vmatprep.subr.bf16.mxu0 %v5106_v4  ;;  %5865 = vmatprep.subr.bf16.mxu1 %v5864_v63  ;;  %v5126_v4 = vcombine.high %v1516_v58, %v1520_v54  ;;  %v1949_v53 = vld [vmem:[%s9231_s7 + $0x48] sm:$0xff]  ;;  %v1967_v63 = vld [vmem:[%s9231_s7 + $0xd8] sm:$0xff] }
 0x350   :  { %1423 = vmatmul.mubr.bf16.vlgmr.msra.gmra.mrb[16].mxu0 %v7289_v49  ;;  %1476 = vmatmul.mubr.bf16.vlgmr.msra.gmra.mrb[16].mxu1 %v7289_v49  ;;  %v1499_v49 = vld [vmem:[#allocation4 + $0x8] sm:$0xff] }
 0x351   :  { %1432 = vmatprep.mubr.bf16.mxu0 %v7323_v1  ;;  %1485 = vmatprep.mubr.bf16.mxu1 %v7323_v1  ;;  %v5129_v1 = vcombine.low %v1522_v31, %v1526_v3  ;;  %v5108_v17 = vcombine.high %v1499_v49, %v1503_v15  ;;  %v5107_v22 = vcombine.low %v1499_v49, %v1503_v15  ;;  %v1501_v3 = vld [vmem:[#allocation4 + $0x18] sm:$0xff] }
 0x352   :  { %1697 = vmatpush1.bf16.msra.mxu0 %v5105_v7  ;;  %5867 = vmatpush3.bf16.msra.mxu1 %v5866_v55  ;;  %v1528_v7 = vld [vmem:[#allocation4 + $0xf0] sm:$0xff]  ;;  %v5874_v31 = vpack.c.bf16 %v1945_v10, %v1944_v9  ;;  %v1509_v15 = vld [vmem:[#allocation4 + $0x58] sm:$0xff]  ;;  %v1953_v9 = vld [vmem:[%s9231_s7 + $0x68] sm:$0xff] }
 0x353   :  { %1698 = vmatprep.subr.bf16.mxu0 %v5114_v8  ;;  %5869 = vmatprep.subr.bf16.mxu1 %v5868_v57  ;;  %v5872_v8 = vpack.c.bf16 %v1961_v62, %v1960_v60  ;;  %v1951_v55 = vld [vmem:[%s9231_s7 + $0x58] sm:$0xff]  ;;  %v5900_v57 = vpack.c.bf16 %v1991_v52, %v1990_v50  ;;  %v1986_v50 = vld [vmem:[%s9231_s7 + $0x170] sm:$0xff] }
 0x354   :  { %v1975_v60 = vld [vmem:[%s9231_s7 + $0x118] sm:$0xff] }
 0x355   :  { %v5902_v62 = vpack.c.bf16 %v1975_v60, %v1974_v34 }
 0x356   :  { %1699 = vmatpush1.bf16.msra.mxu0 %v5113_v12  ;;  %v5125_v12 = vcombine.low %v1516_v58, %v1520_v54  ;;  %5871 = vmatpush3.bf16.msra.mxu1 %v5870_v6  ;;  %v5882_v58 = vpack.c.bf16 %v1949_v53, %v1948_v51  ;;  %v1950_v54 = vld [vmem:[%s9231_s7 + $0x50] sm:$0xff]  ;;  %v2000_v51 = vld [vmem:[%s9231_s7 + $0x1e0] sm:$0xff]  ;;  %v2001_v53 = vld [vmem:[%s9231_s7 + $0x1e8] sm:$0xff] }
 0x357   :  { %1700 = vmatprep.subr.bf16.mxu0 %v5122_v59  ;;  %v5134_v59 = vcombine.high %v1524_v5, %v1528_v7  ;;  %5873 = vmatprep.subr.bf16.mxu1 %v5872_v8  ;;  %v5886_v28 = vpack.c.bf16 %v1951_v55, %v1950_v54  ;;  %v1952_v8 = vld [vmem:[%s9231_s7 + $0x60] sm:$0xff]  ;;  %v2053_v55 = vld [vmem:[%s9231_s7 + $0x388] sm:$0xff] }
 0x358   :  { %1433 = vmatmul.mubr.bf16.gmra.mrb[20].mxu0 %v7312_v11  ;;  %1486 = vmatmul.mubr.bf16.gmra.mrb[20].mxu1 %v7312_v11  ;;  %v6341_v11 = vld [vmem:[%s9255_s8 + $0x8] sm:$0xff]  ;;  %v2052_v54 = vld [vmem:[%s9231_s7 + $0x380] sm:$0xff] }
 0x359   :  { %1728 = vmatprep.mubr.bf16.mxu0 %v6552_v16  ;;  %v7489_v21 = vpack.c.bf16 %v6341_v11, %v7483_v20  ;;  %v1521_v11 = vld [vmem:[#allocation4 + $0xb8] sm:$0xff] }
 0x35a   :  { %1701 = vmatpush1.bf16.msra.mxu0 %v5121_v13  ;;  %v1505_v13 = vld [vmem:[#allocation4 + $0x38] sm:$0xff]  ;;  %5875 = vmatpush3.bf16.msra.mxu1 %v5874_v31  ;;  %v1977_v31 = vld [vmem:[%s9231_s7 + $0x128] sm:$0xff] }
 0x35b   :  { %1702 = vmatprep.subr.bf16.mxu0 %v5130_v14  ;;  %v5133_v14 = vcombine.low %v1524_v5, %v1528_v7  ;;  %v5112_v49 = vcombine.high %v1501_v3, %v1505_v13  ;;  %5877 = vmatprep.subr.bf16.mxu1 %v5876_v33  ;;  %v1992_v5 = vld [vmem:[%s9231_s7 + $0x1a0] sm:$0xff]  ;;  %v1993_v7 = vld [vmem:[%s9231_s7 + $0x1a8] sm:$0xff] }
 0x35c   :  { %v5904_v10 = vpack.c.bf16 %v1993_v7, %v1992_v5  ;;  %v1981_v33 = vld [vmem:[%s9231_s7 + $0x148] sm:$0xff] }
 0x35e   :  { %1703 = vmatpush1.bf16.msra.mxu0 %v5129_v1  ;;  %v1513_v1 = vld [vmem:[#allocation4 + $0x78] sm:$0xff] }
 0x35f   :  { %1749 = vmatprep.subr.bf16.mxu0 %v5108_v17  ;;  %v5111_v17 = vcombine.low %v1501_v3, %v1505_v13  ;;  %v5120_v18 = vcombine.high %v1509_v15, %v1513_v1  ;;  %v1970_v13 = vld [vmem:[%s9231_s7 + $0xf0] sm:$0xff] }
 0x361   :  { %5137 = vmatmul.mubr.msk.bf16.vlgmr.msra.gmra.mrb[24].mxu0 %vm205_vm0, %v7489_v21 }
 0x362   :  { %1750 = vmatpush1.bf16.msra.mxu0 %v5107_v22  ;;  %1738 = vmatprep.mubr.bf16.mxu0 %v6552_v16  ;;  %v5119_v22 = vcombine.low %v1509_v15, %v1513_v1  ;;  %v1995_v1 = vld [vmem:[%s9231_s7 + $0x1b8] sm:$0xff] }
 0x363   :  { %1751 = vmatprep.subr.bf16.mxu0 %v5116_v23  ;;  %v5128_v23 = vcombine.high %v1517_v19, %v1521_v11 }
 0x366   :  { %1752 = vmatpush1.bf16.msra.mxu0 %v5115_v26  ;;  %v5127_v26 = vcombine.low %v1517_v19, %v1521_v11 }
 0x367   :  { %1753 = vmatprep.subr.bf16.mxu0 %v5124_v27  ;;  %v5136_v27 = vcombine.high %v1525_v24, %v1529_v25  ;;  %v1996_v25 = vld [vmem:[%s9231_s7 + $0x1c0] sm:$0xff] }
 0x369   :  { %5138 = vmatmul.mubr.msk.bf16.gmra.mrb[28].mxu0 %vm205_vm0, %v7500_v35 }
 0x36a   :  { %1754 = vmatpush1.bf16.msra.mxu0 %v5123_v36  ;;  %1781 = vmatprep.mubr.bf16.mxu0 %v6552_v16  ;;  %v1946_v36 = vld [vmem:[%s9231_s7 + $0x30] sm:$0xff] }
 0x36b   :  { %1755 = vmatprep.subr.bf16.mxu0 %v5132_v37 }
 0x36e   :  { %1756 = vmatpush1.bf16.msra.mxu0 %v5131_v38 }
 0x36f   :  { %1802 = vmatprep.subr.bf16.mxu0 %v5110_v41  ;;  %v1989_v41 = vld [vmem:[%s9231_s7 + $0x188] sm:$0xff] }
 0x371   :  { %5139 = vmatmul.mubr.msk.bf16.vlgmr.msra.gmra.mrb[32].mxu0 %vm205_vm0, %v7489_v21 }
 0x372   :  { %1803 = vmatpush1.bf16.msra.mxu0 %v5109_v43  ;;  %1791 = vmatprep.mubr.bf16.mxu0 %v6552_v16  ;;  %v5896_v43 = vpack.c.bf16 %v1989_v41, %v1988_v48  ;;  %v1982_v48 = vld [vmem:[%s9231_s7 + $0x150] sm:$0xff] }
 0x373   :  { %1804 = vmatprep.subr.bf16.mxu0 %v5118_v61  ;;  %v1966_v61 = vld [vmem:[%s9231_s7 + $0xd0] sm:$0xff] }
 0x374   :  { %v5884_v45 = vpack.c.bf16 %v1967_v63, %v1966_v61  ;;  %v2003_v61 = vld [vmem:[%s9231_s7 + $0x1f8] sm:$0xff] }
 0x376   :  { %1805 = vmatpush1.bf16.msra.mxu0 %v5117_v2  ;;  %v1968_v2 = vld [vmem:[%s9231_s7 + $0xe0] sm:$0xff] }
 0x377   :  { %1806 = vmatprep.subr.bf16.mxu0 %v5126_v4  ;;  %v1969_v4 = vld [vmem:[%s9231_s7 + $0xe8] sm:$0xff] }
 0x378   :  { %v5888_v6 = vpack.c.bf16 %v1969_v4, %v1968_v2 }
 0x379   :  { %5140 = vmatmul.mubr.msk.bf16.gmra.mrb[36].mxu0 %vm205_vm0, %v7500_v35 }
 0x37a   :  { %1807 = vmatpush1.bf16.msra.mxu0 %v5125_v12  ;;  %1834 = vmatprep.mubr.bf16.mxu0 %v6552_v16  ;;  %v5890_v12 = vpack.c.bf16 %v1953_v9, %v1952_v8 }
 0x37b   :  { %1808 = vmatprep.subr.bf16.mxu0 %v5134_v59  ;;  %v1976_v59 = vld [vmem:[%s9231_s7 + $0x120] sm:$0xff] }
 0x37c   :  { %v5906_v3 = vpack.c.bf16 %v1977_v31, %v1976_v59 }
 0x37e   :  { %1809 = vmatpush1.bf16.msra.mxu0 %v5133_v14  ;;  %v1971_v14 = vld [vmem:[%s9231_s7 + $0xf8] sm:$0xff] }
 0x37f   :  { %1855 = vmatprep.subr.bf16.mxu0 %v5112_v49  ;;  %v1994_v49 = vld [vmem:[%s9231_s7 + $0x1b0] sm:$0xff]  ;;  %v5892_v15 = vpack.c.bf16 %v1971_v14, %v1970_v13 }
 0x380   :  { %v5908_v19 = vpack.c.bf16 %v1995_v1, %v1994_v49 }
 0x381   :  { %5141 = vmatmul.mubr.msk.bf16.vlgmr.msra.gmra.mrb[40].mxu0 %vm205_vm0, %v7489_v21 }
 0x382   :  { %1856 = vmatpush1.bf16.msra.mxu0 %v5111_v17  ;;  %1844 = vmatprep.mubr.bf16.mxu0 %v6552_v16  ;;  %v1954_v17 = vld [vmem:[%s9231_s7 + $0x70] sm:$0xff] }
 0x383   :  { %1857 = vmatprep.subr.bf16.mxu0 %v5120_v18  ;;  %v1955_v18 = vld [vmem:[%s9231_s7 + $0x78] sm:$0xff] }
 0x384   :  { %v5894_v11 = vpack.c.bf16 %v1955_v18, %v1954_v17 }
 0x386   :  { %1858 = vmatpush1.bf16.msra.mxu0 %v5119_v22  ;;  %v1978_v22 = vld [vmem:[%s9231_s7 + $0x130] sm:$0xff] }
 0x387   :  { %1859 = vmatprep.subr.bf16.mxu0 %v5128_v23  ;;  %v1979_v23 = vld [vmem:[%s9231_s7 + $0x138] sm:$0xff] }
 0x388   :  { %v5910_v24 = vpack.c.bf16 %v1979_v23, %v1978_v22 }
 0x389   :  { %5142 = vmatmul.mubr.msk.bf16.gmra.mrb[44].mxu0 %vm205_vm0, %v7500_v35 }
 0x38a   :  { %1860 = vmatpush1.bf16.msra.mxu0 %v5127_v26  ;;  %1887 = vmatprep.mubr.bf16.mxu0 %v6552_v16  ;;  %v1997_v26 = vld [vmem:[%s9231_s7 + $0x1c8] sm:$0xff] }
 0x38b   :  { %1861 = vmatprep.subr.bf16.mxu0 %v5136_v27  ;;  %v2020_v27 = vld [vmem:[%s9231_s7 + $0x280] sm:$0xff] }
 0x38e   :  { %1862 = vmatpush1.bf16.msra.mxu0 %v5135_v29  ;;  %v5912_v29 = vpack.c.bf16 %v1997_v26, %v1996_v25 }
 0x38f   :  { %5897 = vmatprep.subr.bf16.mxu0 %v5896_v43  ;;  %v5920_v43 = vpack.c.bf16 %v2001_v53, %v2000_v51 }
 0x391   :  { %5143 = vmatmul.mubr.msk.bf16.vlgmr.msra.gmra.mrb[48].mxu0 %vm205_vm0, %v7489_v21  ;;  %v1947_v21 = vld [vmem:[%s9231_s7 + $0x38] sm:$0xff] }
 0x392   :  { %1897 = vmatprep.mubr.bf16.mxu0 %v6552_v16  ;;  %v5878_v37 = vpack.c.bf16 %v1947_v21, %v1946_v36  ;;  %5899 = vmatpush3.bf16.msra.mxu0 %v5898_v56  ;;  %v5928_v36 = vpack.c.bf16 %v2021_v30, %v2020_v27  ;;  %v5914_v21 = vpack.c.bf16 %v1981_v33, %v1980_v32  ;;  %v2002_v56 = vld [vmem:[%s9231_s7 + $0x1f0] sm:$0xff]  ;;  %v2004_v30 = vld [vmem:[%s9231_s7 + $0x200] sm:$0xff]  ;;  %v2005_v32 = vld [vmem:[%s9231_s7 + $0x208] sm:$0xff] }
 0x393   :  { %5901 = vmatprep.subr.bf16.mxu0 %v5900_v57  ;;  %v5924_v63 = vpack.c.bf16 %v2003_v61, %v2002_v56  ;;  %v5960_v57 = vpack.c.bf16 %v2053_v55, %v2052_v54  ;;  %v2025_v56 = vld [vmem:[%s9231_s7 + $0x2a8] sm:$0xff]  ;;  %v2026_v54 = vld [vmem:[%s9231_s7 + $0x2b0] sm:$0xff]  ;;  %v2027_v55 = vld [vmem:[%s9231_s7 + $0x2b8] sm:$0xff] }
 0x394   :  { %5879 = vmatpush3.bf16.msra.mxu1 %v5878_v37  ;;  %v1998_v37 = vld [vmem:[%s9231_s7 + $0x1d0] sm:$0xff] }
 0x396   :  { %5903 = vmatpush3.bf16.msra.mxu0 %v5902_v62 }
 0x397   :  { %5905 = vmatprep.subr.bf16.mxu0 %v5904_v10 }
 0x399   :  { %5144 = vmatmul.mubr.msk.bf16.gmra.mrb[52].mxu0 %vm205_vm0, %v7500_v35  ;;  %v1964_v35 = vld [vmem:[%s9231_s7 + $0xc0] sm:$0xff] }
 0x39a   :  { %v5880_v38 = vpack.c.bf16 %v1965_v46, %v1964_v35  ;;  %5907 = vmatpush3.bf16.msra.mxu0 %v5906_v3  ;;  %v1999_v35 = vld [vmem:[%s9231_s7 + $0x1d8] sm:$0xff] }
 0x39b   :  { %5909 = vmatprep.subr.bf16.mxu0 %v5908_v19  ;;  %v5916_v46 = vpack.c.bf16 %v1999_v35, %v1998_v37 }
 0x39c   :  { %5881 = vmatprep.subr.bf16.mxu1 %v5880_v38  ;;  %v1983_v38 = vld [vmem:[%s9231_s7 + $0x158] sm:$0xff] }
 0x39d   :  { %5883 = vmatpush3.bf16.msra.mxu1 %v5882_v58  ;;  %v5918_v41 = vpack.c.bf16 %v1983_v38, %v1982_v48  ;;  %v1984_v58 = vld [vmem:[%s9231_s7 + $0x160] sm:$0xff]  ;;  %v5930_v38 = vpack.c.bf16 %v2005_v32, %v2004_v30 }
 0x39e   :  { %5885 = vmatprep.subr.bf16.mxu1 %v5884_v45  ;;  %5911 = vmatpush3.bf16.msra.mxu0 %v5910_v24  ;;  %v5922_v47 = vpack.c.bf16 %v1985_v44, %v1984_v58  ;;  %v1987_v45 = vld [vmem:[%s9231_s7 + $0x178] sm:$0xff] }
 0x39f   :  { %5913 = vmatprep.subr.bf16.mxu0 %v5912_v29  ;;  %v5926_v52 = vpack.c.bf16 %v1987_v45, %v1986_v50  ;;  %v2007_v58 = vld [vmem:[%s9231_s7 + $0x218] sm:$0xff]  ;;  %v2008_v50 = vld [vmem:[%s9231_s7 + $0x220] sm:$0xff]  ;;  %v2009_v45 = vld [vmem:[%s9231_s7 + $0x228] sm:$0xff] }
 0x3a1   :  { %5887 = vmatpush3.bf16.msra.mxu1 %v5886_v28 }
 0x3a2   :  { %5889 = vmatprep.subr.bf16.mxu1 %v5888_v6  ;;  %5915 = vmatpush3.bf16.msra.mxu0 %v5914_v21  ;;  %v2023_v21 = vld [vmem:[%s9231_s7 + $0x298] sm:$0xff] }
 0x3a3   :  { %5917 = vmatprep.subr.bf16.mxu0 %v5916_v46 }
 0x3a5   :  { %5891 = vmatpush3.bf16.msra.mxu1 %v5890_v12 }
 0x3a6   :  { %5893 = vmatprep.subr.bf16.mxu1 %v5892_v15  ;;  %5919 = vmatpush3.bf16.msra.mxu0 %v5918_v41 }
 0x3a7   :  { %5921 = vmatprep.subr.bf16.mxu0 %v5920_v43  ;;  %v2006_v43 = vld [vmem:[%s9231_s7 + $0x210] sm:$0xff] }
 0x3a8   :  { %v5934_v61 = vpack.c.bf16 %v2007_v58, %v2006_v43 }
 0x3a9   :  { %5895 = vmatpush3.bf16.msra.mxu1 %v5894_v11 }
 0x3aa   :  { %5929 = vmatprep.subr.bf16.mxu1 %v5928_v36  ;;  %5923 = vmatpush3.bf16.msra.mxu0 %v5922_v47  ;;  %v2022_v36 = vld [vmem:[%s9231_s7 + $0x290] sm:$0xff]  ;;  %v2024_v47 = vld [vmem:[%s9231_s7 + $0x2a0] sm:$0xff] }
 0x3ab   :  { %5925 = vmatprep.subr.bf16.mxu0 %v5924_v63  ;;  %v5932_v53 = vpack.c.bf16 %v2023_v21, %v2022_v36  ;;  %v5936_v63 = vpack.c.bf16 %v2025_v56, %v2024_v47  ;;  %v2010_v36 = vld [vmem:[%s9231_s7 + $0x230] sm:$0xff]  ;;  %v2011_v21 = vld [vmem:[%s9231_s7 + $0x238] sm:$0xff] }
 0x3ac   :  { %v2055_v47 = vld [vmem:[%s9231_s7 + $0x398] sm:$0xff] }
 0x3ae   :  { %5927 = vmatpush3.bf16.msra.mxu0 %v5926_v52 }
 0x3af   :  { %5961 = vmatprep.subr.bf16.mxu0 %v5960_v57 }
 0x3e3   :  { %v1318_v28 = vpop.f32.mrb[8].mxu0  ;;  %v7726_v34 = vpop.f32.mrb[8].mxu1 }
 0x3e4   :  { %v1320_v60 = vpop.f32.mrb[9].mxu0  ;;  %v7728_v62 = vpop.f32.mrb[9].mxu1 }
 0x3e5   :  { %v1322_v2 = vpop.f32.mrb[10].mxu0  ;;  %v7730_v4 = vpop.f32.mrb[10].mxu1 }
 0x3e6   :  { %v1324_v5 = vpop.f32.mrb[11].mxu0  ;;  %v7732_v6 = vpop.f32.mrb[11].mxu1 }
 0x3eb   :  { %v1328_v7 = vpop.f32.mrb[12].mxu0  ;;  %v7734_v8 = vpop.f32.mrb[12].mxu1 }
 0x3ec   :  { %v1330_v9 = vpop.f32.mrb[13].mxu0  ;;  %v7736_v10 = vpop.f32.mrb[13].mxu1 }
 0x3ed   :  { %v1332_v12 = vpop.f32.mrb[14].mxu0  ;;  %v7738_v59 = vpop.f32.mrb[14].mxu1 }
 0x3ee   :  { %v1334_v31 = vpop.f32.mrb[15].mxu0  ;;  %v7740_v3 = vpop.f32.mrb[15].mxu1 }
 0x423   :  { %v7742_v13 = vpop.f32.mrb[16].mxu0  ;;  %v7744_v14 = vpop.f32.mrb[16].mxu1 }
 0x424   :  { %v7746_v49 = vpop.f32.mrb[17].mxu0  ;;  %v7748_v15 = vpop.f32.mrb[17].mxu1 }
 0x425   :  { %v7750_v1 = vpop.f32.mrb[18].mxu0  ;;  %v7752_v17 = vpop.f32.mrb[18].mxu1 }
 0x426   :  { %v7754_v18 = vpop.f32.mrb[19].mxu0  ;;  %v7756_v19 = vpop.f32.mrb[19].mxu1 }
 0x42b   :  { %v7758_v11 = vpop.f32.mrb[20].mxu0  ;;  %v7760_v22 = vpop.f32.mrb[20].mxu1 }
 0x42c   :  { %v7762_v23 = vpop.f32.mrb[21].mxu0  ;;  %v7764_v24 = vpop.f32.mrb[21].mxu1 }
 0x42d   :  { %v7766_v25 = vpop.f32.mrb[22].mxu0  ;;  %v7768_v26 = vpop.f32.mrb[22].mxu1 }
 0x42e   :  { %v7770_v27 = vpop.f32.mrb[23].mxu0  ;;  %v7772_v29 = vpop.f32.mrb[23].mxu1 }
 0x434   :  { %v1730_v33 = vpop.f32.mrb[24].mxu0 }
 0x435   :  { %v1908_v37 = vmul.f32 %v1730_v33, %v1318_v28  ;;  %v1732_v35 = vpop.f32.mrb[25].mxu0  ;;  %v5940_v33 = vpack.c.bf16 %v2027_v55, %v2026_v54  ;;  %v2014_v54 = vld [vmem:[%s9231_s7 + $0x250] sm:$0xff]  ;;  %v2015_v55 = vld [vmem:[%s9231_s7 + $0x258] sm:$0xff] }
 0x436   :  { %v1909_v46 = vmul.f32 %v1732_v35, %v1320_v60  ;;  %v1734_v48 = vpop.f32.mrb[26].mxu0 }
 0x437   :  { %v1916_v41 = vmul.f32 %v1734_v48, %v1322_v2  ;;  %v1736_v51 = vpop.f32.mrb[27].mxu0  ;;  %v2036_v48 = vld [vmem:[%s9231_s7 + $0x300] sm:$0xff] }
 0x438   :  { %v1917_v44 = vmul.f32 %v1736_v51, %v1324_v5  ;;  %2132 = vmatprep.mubr.f32.mxu1 %v1909_v46  ;;  %v5938_v5 = vpack.c.bf16 %v2009_v45, %v2008_v50  ;;  %v2012_v46 = vld [vmem:[%s9231_s7 + $0x240] sm:$0xff]  ;;  %v2030_v51 = vld [vmem:[%s9231_s7 + $0x2d0] sm:$0xff] }
 0x439   :  { %2133 = vmatmul.mubr.f32.vlgmr.msra.gmra.mrb[24].mxu1 %v1908_v37 }
 0x43a   :  { %2137 = vmatprep.mubr.f32.mxu1 %v1917_v44  ;;  %5931 = vmatpush3.bf16.msra.mxu1 %v5930_v38  ;;  %v2054_v44 = vld [vmem:[%s9231_s7 + $0x390] sm:$0xff] }
 0x43b   :  { %5933 = vmatprep.subr.bf16.mxu1 %v5932_v53  ;;  %v2031_v53 = vld [vmem:[%s9231_s7 + $0x2d8] sm:$0xff] }
 0x43c   :  { %v1740_v52 = vpop.f32.mrb[28].mxu0 }
 0x43d   :  { %v1924_v57 = vmul.f32 %v1740_v52, %v1328_v7  ;;  %v1742_v28 = vpop.f32.mrb[29].mxu0  ;;  %2138 = vmatmul.mubr.f32.gmra.mrb[26].mxu1 %v1916_v41  ;;  %v2028_v7 = vld [vmem:[%s9231_s7 + $0x2c0] sm:$0xff]  ;;  %v2037_v41 = vld [vmem:[%s9231_s7 + $0x308] sm:$0xff]  ;;  %v5948_v52 = vpack.c.bf16 %v2031_v53, %v2030_v51 }
 0x43e   :  { %v1925_v60 = vmul.f32 %v1742_v28, %v1330_v9  ;;  %v1744_v2 = vpop.f32.mrb[30].mxu0  ;;  %5935 = vmatpush3.bf16.msra.mxu1 %v5934_v61  ;;  %v2029_v9 = vld [vmem:[%s9231_s7 + $0x2c8] sm:$0xff]  ;;  %v2039_v28 = vld [vmem:[%s9231_s7 + $0x318] sm:$0xff] }
 0x43f   :  { %v1932_v30 = vmul.f32 %v1744_v2, %v1332_v12  ;;  %v1746_v32 = vpop.f32.mrb[31].mxu0  ;;  %5937 = vmatprep.subr.bf16.mxu1 %v5936_v63  ;;  %v5942_v12 = vpack.c.bf16 %v2011_v21, %v2010_v36  ;;  %v5944_v35 = vpack.c.bf16 %v2029_v9, %v2028_v7  ;;  %v2033_v2 = vld [vmem:[%s9231_s7 + $0x2e8] sm:$0xff]  ;;  %v2016_v36 = vld [vmem:[%s9231_s7 + $0x260] sm:$0xff] }
 0x440   :  { %v1933_v37 = vmul.f32 %v1746_v32, %v1334_v31  ;;  %2142 = vmatprep.mubr.f32.mxu1 %v1925_v60  ;;  %v2013_v31 = vld [vmem:[%s9231_s7 + $0x248] sm:$0xff]  ;;  %v2032_v60 = vld [vmem:[%s9231_s7 + $0x2e0] sm:$0xff] }
 0x441   :  { %2143 = vmatmul.mubr.f32.gmra.mrb[28].mxu1 %v1924_v57  ;;  %v5946_v63 = vpack.c.bf16 %v2013_v31, %v2012_v46  ;;  %v2017_v21 = vld [vmem:[%s9231_s7 + $0x268] sm:$0xff]  ;;  %v2035_v46 = vld [vmem:[%s9231_s7 + $0x2f8] sm:$0xff] }
 0x442   :  { %2147 = vmatprep.mubr.f32.mxu1 %v1933_v37  ;;  %5939 = vmatpush3.bf16.msra.mxu1 %v5938_v5  ;;  %v2056_v5 = vld [vmem:[%s9231_s7 + $0x3a0] sm:$0xff] }
 0x443   :  { %5941 = vmatprep.subr.bf16.mxu1 %v5940_v33  ;;  %v5952_v33 = vpack.c.bf16 %v2033_v2, %v2032_v60  ;;  %v2040_v37 = vld [vmem:[%s9231_s7 + $0x320] sm:$0xff]  ;;  %v2062_v60 = vld [vmem:[%s9231_s7 + $0x3d0] sm:$0xff]  ;;  %v2063_v2 = vld [vmem:[%s9231_s7 + $0x3d8] sm:$0xff] }
 0x444   :  { %v1783_v38 = vpop.f32.mrb[32].mxu0 }
 0x445   :  { %v1910_v43 = vmul.f32 %v1783_v38, %v7726_v34  ;;  %v1785_v58 = vpop.f32.mrb[33].mxu0  ;;  %2148 = vmatmul.mubr.f32.gmra.mrb[30].mxu1 %v1932_v30  ;;  %v5962_v34 = vpack.c.bf16 %v2037_v41, %v2036_v48  ;;  %v5950_v30 = vpack.c.bf16 %v2015_v55, %v2014_v54  ;;  %v2058_v38 = vld [vmem:[%s9231_s7 + $0x3b0] sm:$0xff]  ;;  %v2059_v41 = vld [vmem:[%s9231_s7 + $0x3b8] sm:$0xff] }
 0x446   :  { %v1911_v56 = vmul.f32 %v1785_v58, %v7728_v62  ;;  %v1787_v61 = vpop.f32.mrb[34].mxu0  ;;  %5943 = vmatpush3.bf16.msra.mxu1 %v5942_v12  ;;  %v2038_v62 = vld [vmem:[%s9231_s7 + $0x310] sm:$0xff]  ;;  %v2041_v12 = vld [vmem:[%s9231_s7 + $0x328] sm:$0xff] }
 0x447   :  { %v1918_v50 = vmul.f32 %v1787_v61, %v7730_v4  ;;  %v1789_v45 = vpop.f32.mrb[35].mxu0  ;;  %5945 = vmatprep.subr.bf16.mxu1 %v5944_v35  ;;  %v5964_v4 = vpack.c.bf16 %v2055_v47, %v2054_v44  ;;  %v5966_v32 = vpack.c.bf16 %v2039_v28, %v2038_v62  ;;  %v2034_v35 = vld [vmem:[%s9231_s7 + $0x2f0] sm:$0xff]  ;;  %v2019_v61 = vld [vmem:[%s9231_s7 + $0x278] sm:$0xff]  ;;  %v2044_v62 = vld [vmem:[%s9231_s7 + $0x340] sm:$0xff] }
 0x448   :  { %v1919_v57 = vmul.f32 %v1789_v45, %v7732_v6  ;;  %2217 = vmatprep.mubr.f32.mxu0 %v1911_v56  ;;  %v2057_v6 = vld [vmem:[%s9231_s7 + $0x3a8] sm:$0xff]  ;;  %v5956_v47 = vpack.c.bf16 %v2035_v46, %v2034_v35  ;;  %v2018_v56 = vld [vmem:[%s9231_s7 + $0x270] sm:$0xff]  ;;  %v2060_v45 = vld [vmem:[%s9231_s7 + $0x3c0] sm:$0xff] }
 0x449   :  { %2218 = vmatmul.mubr.f32.vlgmr.msra.gmra.mrb[56].mxu0 %v1910_v43  ;;  %v5968_v9 = vpack.c.bf16 %v2057_v6, %v2056_v5  ;;  %v5954_v43 = vpack.c.bf16 %v2017_v21, %v2016_v36  ;;  %v5980_v36 = vpack.c.bf16 %v2063_v2, %v2062_v60  ;;  %v2046_v21 = vld [vmem:[%s9231_s7 + $0x350] sm:$0xff]  ;;  %v2049_v35 = vld [vmem:[%s9231_s7 + $0x368] sm:$0xff]  ;;  %v2632_v2 = vld [vmem:[#allocation6 + $0x58] sm:$0xff] }
 0x44a   :  { %2222 = vmatprep.mubr.f32.mxu0 %v1919_v57  ;;  %5947 = vmatpush3.bf16.msra.mxu1 %v5946_v63  ;;  %v5972_v63 = vpack.c.bf16 %v2059_v41, %v2058_v38  ;;  %v2045_v57 = vld [vmem:[%s9231_s7 + $0x348] sm:$0xff]  ;;  %v2067_v38 = vld [vmem:[%s9231_s7 + $0x3f8] sm:$0xff] }
 0x44b   :  { %5963 = vmatpush3.bf16.msra.mxu0 %v5962_v34  ;;  %5949 = vmatprep.subr.bf16.mxu1 %v5948_v52  ;;  %v5958_v34 = vpack.c.bf16 %v2019_v61, %v2018_v56  ;;  %v2624_v56 = vld [vmem:[#allocation6 + $0x18] sm:$0xff]  ;;  %v2630_v60 = vld [vmem:[#allocation6 + $0x48] sm:$0xff] }
 0x44c   :  { %v1793_v7 = vpop.f32.mrb[36].mxu0  ;;  %5965 = vmatprep.subr.bf16.mxu0 %v5964_v4 }
 0x44d   :  { %v1926_v31 = vmul.f32 %v1793_v7, %v7734_v8  ;;  %v1795_v48 = vpop.f32.mrb[37].mxu0  ;;  %2223 = vmatmul.mubr.f32.gmra.mrb[58].mxu0 %v1918_v50  ;;  %v5970_v8 = vpack.c.bf16 %v2041_v12, %v2040_v37  ;;  %v2043_v50 = vld [vmem:[%s9231_s7 + $0x338] sm:$0xff]  ;;  %v2048_v12 = vld [vmem:[%s9231_s7 + $0x360] sm:$0xff] }
 0x44e   :  { %v1927_v51 = vmul.f32 %v1795_v48, %v7736_v10  ;;  %v1797_v53 = vpop.f32.mrb[38].mxu0  ;;  %5951 = vmatpush3.bf16.msra.mxu1 %v5950_v30  ;;  %v2066_v48 = vld [vmem:[%s9231_s7 + $0x3f0] sm:$0xff] }
 0x44f   :  { %v1934_v58 = vmul.f32 %v1797_v53, %v7738_v59  ;;  %5967 = vmatpush3.bf16.msra.mxu0 %v5966_v32  ;;  %v1799_v44 = vpop.f32.mrb[39].mxu0  ;;  %5953 = vmatprep.subr.bf16.mxu1 %v5952_v33  ;;  %v2042_v59 = vld [vmem:[%s9231_s7 + $0x330] sm:$0xff]  ;;  %v5978_v33 = vpack.c.bf16 %v2045_v57, %v2044_v62 }
 0x450   :  { %v1935_v10 = vmul.f32 %v1799_v44, %v7740_v3  ;;  %2227 = vmatprep.mubr.f32.mxu0 %v1927_v51  ;;  %5969 = vmatprep.subr.bf16.mxu0 %v5968_v9  ;;  %v2061_v3 = vld [vmem:[%s9231_s7 + $0x3c8] sm:$0xff]  ;;  %v5974_v52 = vpack.c.bf16 %v2043_v50, %v2042_v59  ;;  %v5988_v44 = vpack.c.bf16 %v2067_v38, %v2066_v48  ;;  %v2418_v48 = vld [vmem:[#allocation10 + $0x10] sm:$0xff]  ;;  %v2419_v38 = vld [vmem:[#allocation10 + $0x18] sm:$0xff] }
 0x451   :  { %2228 = vmatmul.mubr.f32.gmra.mrb[60].mxu0 %v1926_v31  ;;  %v5976_v55 = vpack.c.bf16 %v2061_v3, %v2060_v45  ;;  %v2626_v45 = vld [vmem:[#allocation6 + $0x28] sm:$0xff]  ;;  %v2628_v3 = vld [vmem:[#allocation6 + $0x38] sm:$0xff] }
 0x452   :  { %2232 = vmatprep.mubr.f32.mxu0 %v1935_v10  ;;  %5955 = vmatpush3.bf16.msra.mxu1 %v5954_v43  ;;  %v2621_v10 = vld [vmem:[#allocation6] sm:$0xff] }
 0x453   :  { %5971 = vmatpush3.bf16.msra.mxu0 %v5970_v8  ;;  %5957 = vmatprep.subr.bf16.mxu1 %v5956_v47  ;;  %v2050_v8 = vld [vmem:[%s9231_s7 + $0x370] sm:$0xff]  ;;  %v2051_v47 = vld [vmem:[%s9231_s7 + $0x378] sm:$0xff] }
 0x454   :  { %v1836_v54 = vpop.f32.mrb[40].mxu0  ;;  %5973 = vmatprep.subr.bf16.mxu0 %v5972_v63  ;;  %v2623_v63 = vld [vmem:[#allocation6 + $0x10] sm:$0xff] }
 0x455   :  { %v1912_v4 = vmul.f32 %v1836_v54, %v7742_v13  ;;  %v1838_v28 = vpop.f32.mrb[41].mxu0  ;;  %2233 = vmatmul.mubr.f32.gmra.mrb[62].mxu0 %v1934_v58  ;;  %v5986_v58 = vpack.c.bf16 %v2049_v35, %v2048_v12  ;;  %v6026_v62 = vpack.c.bf16 %v2623_v63, %v2621_v10  ;;  %v176_v12 = vld [vmem:[%s9257_s29 + $0x18] sm:$0xff]  ;;  %v2416_v35 = vld [vmem:[#allocation10] sm:$0xff] }
 0x456   :  { %v1913_v5 = vmul.f32 %v1838_v28, %v7746_v49  ;;  %v1840_v6 = vpop.f32.mrb[42].mxu0  ;;  %5959 = vmatpush3.bf16.msra.mxu1 %v5958_v34  ;;  %v2047_v49 = vld [vmem:[%s9231_s7 + $0x358] sm:$0xff]  ;;  %v2627_v28 = vld [vmem:[#allocation6 + $0x30] sm:$0xff]  ;;  %v2412_v63 = vld [vmem:[#allocation9 + $0x20] sm:$0xff] }
 0x457   :  { %v1920_v30 = vmul.f32 %v1840_v6, %v7750_v1  ;;  %5975 = vmatpush3.bf16.msra.mxu0 %v5974_v52  ;;  %v1842_v32 = vpop.f32.mrb[43].mxu0  ;;  %v2064_v1 = vld [vmem:[%s9231_s7 + $0x3e0] sm:$0xff]  ;;  %v5982_v37 = vpack.c.bf16 %v2047_v49, %v2046_v21  ;;  %v2631_v6 = vld [vmem:[#allocation6 + $0x50] sm:$0xff]  ;;  %v6346_v10 = vld [vmem:[%s9255_s8 + $0x18] sm:$0xff] }
 0x458   :  { %v1921_v13 = vmul.f32 %v1842_v32, %v7754_v18  ;;  %2302 = vmatprep.mubr.f32.mxu1 %v1913_v5  ;;  %5977 = vmatprep.subr.bf16.mxu0 %v5976_v55  ;;  %v2065_v18 = vld [vmem:[%s9231_s7 + $0x3e8] sm:$0xff] }
 0x459   :  { %2303 = vmatmul.mubr.f32.vlgmr.msra.gmra.mrb[32].mxu1 %v1912_v4  ;;  %v5984_v9 = vpack.c.bf16 %v2065_v18, %v2064_v1  ;;  %v2625_v4 = vld [vmem:[#allocation6 + $0x20] sm:$0xff] }
 0x45a   :  { %2307 = vmatprep.mubr.f32.mxu1 %v1921_v13 }
 0x45b   :  { %5979 = vmatpush3.bf16.msra.mxu0 %v5978_v33  ;;  %v2636_v33 = vld [vmem:[#allocation6 + $0x78] sm:$0xff] }
 0x45c   :  { %v1846_v7 = vpop.f32.mrb[44].mxu0  ;;  %5981 = vmatprep.subr.bf16.mxu0 %v5980_v36 }
 0x45d   :  { %v1928_v46 = vmul.f32 %v1846_v7, %v7758_v11  ;;  %v1848_v31 = vpop.f32.mrb[45].mxu0  ;;  %2308 = vmatmul.mubr.f32.gmra.mrb[34].mxu1 %v1920_v30  ;;  %v2633_v7 = vld [vmem:[#allocation6 + $0x60] sm:$0xff] }
 0x45e   :  { %v1929_v41 = vmul.f32 %v1848_v31, %v7762_v23  ;;  %v1850_v51 = vpop.f32.mrb[46].mxu0  ;;  %v2622_v23 = vld [vmem:[#allocation6 + $0x8] sm:$0xff] }
 0x45f   :  { %v1936_v53 = vmul.f32 %v1850_v51, %v7766_v25  ;;  %5983 = vmatpush3.bf16.msra.mxu0 %v5982_v37  ;;  %v1852_v43 = vpop.f32.mrb[47].mxu0  ;;  %v5990_v25 = vpack.c.bf16 %v2051_v47, %v2050_v8  ;;  %v2420_v51 = vld [vmem:[#allocation10 + $0x20] sm:$0xff]  ;;  %v2409_v8 = vld [vmem:[#allocation9 + $0x8] sm:$0xff] }
 0x460   :  { %v1937_v11 = vmul.f32 %v1852_v43, %v7770_v27  ;;  %2312 = vmatprep.mubr.f32.mxu1 %v1929_v41  ;;  %5985 = vmatprep.subr.bf16.mxu0 %v5984_v9  ;;  %v6024_v27 = vpack.c.bf16 %v2624_v56, %v2622_v23  ;;  %v2635_v9 = vld [vmem:[#allocation6 + $0x70] sm:$0xff]  ;;  %v5996_v41 = vpack.c.bf16 %v2419_v38, %v2418_v48  ;;  %v6344_v23 = vld [vmem:[%s9255_s8 + $0x8] sm:$0xff]  ;;  %v2813_v48 = vld [vmem:[%s9234_s10 + $0xd8] sm:$0xff] }
 0x461   :  { %2313 = vmatmul.mubr.f32.gmra.mrb[36].mxu1 %v1928_v46  ;;  %v2417_v46 = vld [vmem:[#allocation10 + $0x8] sm:$0xff]  ;;  %v2410_v56 = vld [vmem:[#allocation9 + $0x10] sm:$0xff] }
 0x462   :  { %2317 = vmatprep.mubr.f32.mxu1 %v1937_v11  ;;  %v5992_v31 = vpack.c.bf16 %v2417_v46, %v2416_v35  ;;  %v2806_v35 = vld [vmem:[%s9234_s10 + $0xa0] sm:$0xff]  ;;  %v2808_v46 = vld [vmem:[%s9234_s10 + $0xb0] sm:$0xff] }
 0x463   :  { %5987 = vmatpush3.bf16.msra.mxu0 %v5986_v58  ;;  %v2423_v58 = vld [vmem:[#allocation10 + $0x38] sm:$0xff]  ;;  %v6062_v38 = vpack.c.bf16 %v2808_v46, %v2806_v35 }
 0x464   :  { %v1889_v61 = vpop.f32.mrb[48].mxu0  ;;  %5989 = vmatprep.subr.bf16.mxu0 %v5988_v44  ;;  %5993 = vmatprep.subr.bf16.mxu1 %v5992_v31  ;;  %v2408_v44 = vld [vmem:[#allocation9] sm:$0xff] }
 0x465   :  { %v1914_v59 = vmul.f32 %v1889_v61, %v7744_v14  ;;  %v1891_v50 = vpop.f32.mrb[49].mxu0  ;;  %2318 = vmatmul.mubr.f32.gmra.mrb[38].mxu1 %v1936_v53  ;;  %v6028_v14 = vpack.c.bf16 %v2628_v3, %v2626_v45  ;;  %v2421_v53 = vld [vmem:[#allocation10 + $0x28] sm:$0xff]  ;;  %v6008_v47 = vpack.c.bf16 %v2409_v8, %v2408_v44  ;;  %v6345_v61 = vld [vmem:[%s9255_s8 + $0x10] sm:$0xff]  ;;  %v2415_v3 = vld [vmem:[#allocation9 + $0x38] sm:$0xff] }
 0x466   :  { %v1915_v34 = vmul.f32 %v1891_v50, %v7748_v15  ;;  %v1893_v52 = vpop.f32.mrb[50].mxu0  ;;  %5734 = vmatprep.mubr.msk.f32.mxu1 %vm205_vm0, %v7483_v20  ;;  %v6030_v15 = vpack.c.bf16 %v2627_v28, %v2625_v4  ;;  %v6032_v20 = vpack.c.bf16 %v2632_v2, %v2630_v60  ;;  %5995 = vmatpush3.bf16.msra.mxu1 %v5992_v31  ;;  %v2414_v45 = vld [vmem:[#allocation9 + $0x30] sm:$0xff]  ;;  %v2793_v4 = vld [vmem:[%s9234_s10 + $0x38] sm:$0xff]  ;;  %v2790_v2 = vld [vmem:[%s9234_s10 + $0x20] sm:$0xff] }
 0x467   :  { %v1922_v54 = vmul.f32 %v1893_v52, %v7752_v17  ;;  %5991 = vmatpush3.bf16.msra.mxu0 %v5990_v25  ;;  %v1895_v55 = vpop.f32.mrb[51].mxu0  ;;  %v2629_v17 = vld [vmem:[#allocation6 + $0x40] sm:$0xff]  ;;  %5997 = vmatprep.subr.bf16.mxu1 %v5996_v41  ;;  %v6000_v43 = vpack.c.bf16 %v2421_v53, %v2420_v51  ;;  %v2411_v25 = vld [vmem:[#allocation9 + $0x18] sm:$0xff]  ;;  %v2787_v52 = vld [vmem:[%s9234_s10 + $0x8] sm:$0xff] }
 0x468   :  { %v1923_v57 = vmul.f32 %v1895_v55, %v7756_v19  ;;  %2387 = vmatprep.mubr.f32.mxu0 %v1915_v34  ;;  %6025 = vmatprep.subr.bf16.mxu0 %v6024_v27  ;;  %v2634_v19 = vld [vmem:[#allocation6 + $0x68] sm:$0xff]  ;;  %v6034_v1 = vpack.c.bf16 %v2631_v6, %v2629_v17  ;;  %v6012_v27 = vpack.c.bf16 %v2411_v25, %v2410_v56  ;;  %v2786_v55 = vld [vmem:[%s9234_s10] sm:$0xff]  ;;  %v2812_v53 = vld [vmem:[%s9234_s10 + $0xd0] sm:$0xff] }
 0x469   :  { %v6036_v37 = vpack.c.bf16 %v2636_v33, %v2634_v19  ;;  %v6020_v34 = vpack.c.bf16 %v2415_v3, %v2414_v45  ;;  %v2799_v19 = vld [vmem:[%s9234_s10 + $0x68] sm:$0xff]  ;;  %v2801_v33 = vld [vmem:[%s9234_s10 + $0x78] sm:$0xff]  ;;  %v2810_v51 = vld [vmem:[%s9234_s10 + $0xc0] sm:$0xff] }
 0x46a   :  { %2388 = vmatmul.mubr.f32.vlgmr.msra.gmra.mrb[64].mxu0 %v1914_v59  ;;  %5999 = vmatpush3.bf16.msra.mxu1 %v5996_v41  ;;  %v2413_v59 = vld [vmem:[#allocation9 + $0x28] sm:$0xff]  ;;  %v2814_v44 = vld [vmem:[%s9234_s10 + $0xe0] sm:$0xff]  ;;  %v2816_v8 = vld [vmem:[%s9234_s10 + $0xf0] sm:$0xff] }
 0x46b   :  { %2392 = vmatprep.mubr.f32.mxu0 %v1923_v57  ;;  %6027 = vmatpush1.bf16.msra.mxu0 %v6026_v62  ;;  %v6016_v50 = vpack.c.bf16 %v2413_v59, %v2412_v63  ;;  %v2788_v57 = vld [vmem:[%s9234_s10 + $0x10] sm:$0xff]  ;;  %v2811_v31 = vld [vmem:[%s9234_s10 + $0xc8] sm:$0xff]  ;;  %v6070_v56 = vpack.c.bf16 %v2816_v8, %v2814_v44  ;;  %v2825_v63 = vld [vmem:[%s9234_s10 + $0x138] sm:$0xff] }
 0x46c   :  { %v1899_v5 = vpop.f32.mrb[52].mxu0  ;;  %6029 = vmatprep.subr.bf16.mxu0 %v6028_v14  ;;  %6001 = vmatprep.subr.bf16.mxu1 %v6000_v43  ;;  %v2791_v14 = vld [vmem:[%s9234_s10 + $0x28] sm:$0xff]  ;;  %v6042_v28 = vpack.c.bf16 %v2788_v57, %v2786_v55  ;;  %v6064_v41 = vpack.c.bf16 %v2813_v48, %v2811_v31  ;;  %v2822_v45 = vld [vmem:[%s9234_s10 + $0x120] sm:$0xff]  ;;  %v2824_v3 = vld [vmem:[%s9234_s10 + $0x130] sm:$0xff] }
 0x46d   :  { %v1930_v30 = vmul.f32 %v1899_v5, %v7760_v22  ;;  %v1901_v32 = vpop.f32.mrb[53].mxu0  ;;  %v6038_v22 = vpack.c.bf16 %v2635_v9, %v2633_v7  ;;  %v6044_v60 = vpack.c.bf16 %v2793_v4, %v2791_v14  ;;  %v2795_v5 = vld [vmem:[%s9234_s10 + $0x48] sm:$0xff]  ;;  %v2802_v9 = vld [vmem:[%s9234_s10 + $0x80] sm:$0xff]  ;;  %v2828_v57 = vld [vmem:[%s9234_s10 + $0x150] sm:$0xff] }
 0x46e   :  { %v1931_v13 = vmul.f32 %v1901_v32, %v7764_v24  ;;  %2393 = vmatmul.mubr.f32.gmra.mrb[66].mxu0 %v1922_v54  ;;  %v1903_v36 = vpop.f32.mrb[54].mxu0  ;;  %v173_v24 = vld [vmem:[%s9257_s29] sm:$0xff]  ;;  %6003 = vmatpush3.bf16.msra.mxu1 %v6000_v43  ;;  %v2789_v54 = vld [vmem:[%s9234_s10 + $0x18] sm:$0xff]  ;;  %v2796_v32 = vld [vmem:[%s9234_s10 + $0x50] sm:$0xff] }
 0x46f   :  { %v1938_v21 = vmul.f32 %v1903_v36, %v7768_v26  ;;  %6031 = vmatpush1.bf16.msra.mxu0 %v6030_v15  ;;  %v1905_v49 = vpop.f32.mrb[55].mxu0  ;;  %v174_v26 = vld [vmem:[%s9257_s29 + $0x8] sm:$0xff]  ;;  %v6040_v62 = vpack.c.bf16 %v2789_v54, %v2787_v52  ;;  %v2792_v15 = vld [vmem:[%s9234_s10 + $0x30] sm:$0xff]  ;;  %v6052_v36 = vpack.c.bf16 %v2801_v33, %v2799_v19  ;;  %v2829_v52 = vld [vmem:[%s9234_s10 + $0x158] sm:$0xff]  ;;  %v6078_v54 = vpack.c.bf16 %v2824_v3, %v2822_v45 }
 0x470   :  { %v1939_v18 = vmul.f32 %v1905_v49, %v7772_v29  ;;  %2397 = vmatprep.mubr.f32.mxu0 %v1931_v13  ;;  %6033 = vmatprep.subr.bf16.mxu0 %v6032_v20  ;;  %v175_v29 = vld [vmem:[%s9257_s29 + $0x10] sm:$0xff]  ;;  %v2797_v20 = vld [vmem:[%s9234_s10 + $0x58] sm:$0xff]  ;;  %v6046_v17 = vpack.c.bf16 %v2792_v15, %v2790_v2  ;;  %v2815_v43 = vld [vmem:[%s9234_s10 + $0xe8] sm:$0xff] }
 0x471   :  { %v6048_v6 = vpack.c.bf16 %v2797_v20, %v2795_v5  ;;  %v2800_v49 = vld [vmem:[%s9234_s10 + $0x70] sm:$0xff]  ;;  %v2831_v14 = vld [vmem:[%s9234_s10 + $0x168] sm:$0xff]  ;;  %v2833_v4 = vld [vmem:[%s9234_s10 + $0x178] sm:$0xff] }
 0x472   :  { %2398 = vmatmul.mubr.f32.gmra.mrb[68].mxu0 %v1930_v30  ;;  %v2794_v30 = vld [vmem:[%s9234_s10 + $0x40] sm:$0xff]  ;;  %v2832_v15 = vld [vmem:[%s9234_s10 + $0x170] sm:$0xff] }
 0x473   :  { %2402 = vmatprep.mubr.f32.mxu0 %v1939_v18  ;;  %6035 = vmatpush1.bf16.msra.mxu0 %v6034_v1  ;;  %v6050_v13 = vpack.c.bf16 %v2796_v32, %v2794_v30  ;;  %v2803_v1 = vld [vmem:[%s9234_s10 + $0x88] sm:$0xff]  ;;  %v2805_v18 = vld [vmem:[%s9234_s10 + $0x98] sm:$0xff]  ;;  %v2830_v2 = vld [vmem:[%s9234_s10 + $0x160] sm:$0xff] }
 0x474   :  { %6037 = vmatprep.subr.bf16.mxu0 %v6036_v37  ;;  %v6056_v7 = vpack.c.bf16 %v2805_v18, %v2803_v1  ;;  %v6086_v5 = vpack.c.bf16 %v2832_v15, %v2830_v2 }
 0x476   :  { %2403 = vmatmul.mubr.f32.gmra.mrb[70].mxu0 %v1938_v21  ;;  %v2798_v21 = vld [vmem:[%s9234_s10 + $0x60] sm:$0xff] }
 0x477   :  { %6039 = vmatpush1.bf16.msra.mxu0 %v6038_v22  ;;  %2725 = vmatprep.mubr.f32.mxu0 %v6551_v0  ;;  %v6054_v37 = vpack.c.bf16 %v2800_v49, %v2798_v21  ;;  %v2804_v22 = vld [vmem:[%s9234_s10 + $0x90] sm:$0xff] }
 0x478   :  { %6041 = vmatprep.subr.bf16.mxu0 %v6040_v62  ;;  %v2826_v62 = vld [vmem:[%s9234_s10 + $0x140] sm:$0xff] }
 0x47a   :  { %5154 = vmatmul.mubr.msk.f32.vlgmr.msra.gmra.mrb[72].mxu0 %vm205_vm0, %v173_v24  ;;  %v2807_v24 = vld [vmem:[%s9234_s10 + $0xa8] sm:$0xff] }
 0x47b   :  { %2731 = vmatprep.mubr.f32.mxu0 %v6551_v0  ;;  %6043 = vmatpush1.bf16.msra.mxu0 %v6042_v28  ;;  %v6082_v28 = vpack.c.bf16 %v2828_v57, %v2826_v62 }
 0x47c   :  { %6045 = vmatprep.subr.bf16.mxu0 %v6044_v60  ;;  %v6084_v60 = vpack.c.bf16 %v2833_v4, %v2831_v14 }
 0x47e   :  { %5155 = vmatmul.mubr.msk.f32.gmra.mrb[74].mxu0 %vm205_vm0, %v174_v26  ;;  %v2809_v26 = vld [vmem:[%s9234_s10 + $0xb8] sm:$0xff] }
 0x47f   :  { %2737 = vmatprep.mubr.f32.mxu0 %v6551_v0  ;;  %6047 = vmatpush1.bf16.msra.mxu0 %v6046_v17 }
 0x480   :  { %6049 = vmatprep.subr.bf16.mxu0 %v6048_v6 }
 0x482   :  { %5156 = vmatmul.mubr.msk.f32.gmra.mrb[76].mxu0 %vm205_vm0, %v175_v29  ;;  %v6058_v29 = vpack.c.bf16 %v2804_v22, %v2802_v9 }
 0x483   :  { %2743 = vmatprep.mubr.f32.mxu0 %v6551_v0  ;;  %v2422_v0 = vld [vmem:[#allocation10 + $0x30] sm:$0xff]  ;;  %6051 = vmatpush1.bf16.msra.mxu0 %v6050_v13 }
 0x484   :  { %v6004_v11 = vpack.c.bf16 %v2423_v58, %v2422_v0  ;;  %6053 = vmatprep.subr.bf16.mxu0 %v6052_v36  ;;  %v2817_v0 = vld [vmem:[%s9234_s10 + $0xf8] sm:$0xff]  ;;  %v6066_v58 = vpack.c.bf16 %v2812_v53, %v2810_v51 }
 0x486   :  { %5157 = vmatmul.mubr.msk.f32.gmra.mrb[78].mxu0 %vm205_vm0, %v176_v12  ;;  %6005 = vmatprep.subr.bf16.mxu1 %v6004_v11  ;;  %v6060_v12 = vpack.c.bf16 %v2809_v26, %v2807_v24 }
 0x487   :  { %6007 = vmatpush3.bf16.msra.mxu1 %v6004_v11  ;;  %6055 = vmatpush1.bf16.msra.mxu0 %v6054_v37  ;;  %v6068_v11 = vpack.c.bf16 %v2817_v0, %v2815_v43 }
 0x488   :  { %6009 = vmatprep.subr.bf16.mxu1 %v6008_v47  ;;  %6057 = vmatprep.subr.bf16.mxu0 %v6056_v7 }
 0x48a   :  { %5735 = vmatmul.mubr.msk.f32.vlgmr.msra.gmra.mrb[40].mxu1 %vm205_vm0, %v6344_v23  ;;  %v2821_v23 = vld [vmem:[%s9234_s10 + $0x118] sm:$0xff] }
 0x48b   :  { %6011 = vmatpush3.bf16.msra.mxu1 %v6008_v47  ;;  %5737 = vmatprep.mubr.msk.f32.mxu1 %vm205_vm0, %v6345_v61  ;;  %v2819_v47 = vld [vmem:[%s9234_s10 + $0x108] sm:$0xff]  ;;  %v2818_v61 = vld [vmem:[%s9234_s10 + $0x100] sm:$0xff] }
 0x48c   :  { %6013 = vmatprep.subr.bf16.mxu1 %v6012_v27  ;;  %6059 = vmatpush1.bf16.msra.mxu0 %v6058_v29  ;;  %v6072_v25 = vpack.c.bf16 %v2821_v23, %v2819_v47 }
 0x48d   :  { %6061 = vmatprep.subr.bf16.mxu0 %v6060_v12 }
 0x48e   :  { %5738 = vmatmul.mubr.msk.f32.gmra.mrb[42].mxu1 %vm205_vm0, %v6346_v10  ;;  %v2823_v10 = vld [vmem:[%s9234_s10 + $0x128] sm:$0xff] }
 0x48f   :  { %6015 = vmatpush3.bf16.msra.mxu1 %v6012_v27  ;;  %v2820_v27 = vld [vmem:[%s9234_s10 + $0x110] sm:$0xff] }
 0x490   :  { %6017 = vmatprep.subr.bf16.mxu1 %v6016_v50  ;;  %6063 = vmatpush1.bf16.msra.mxu0 %v6062_v38  ;;  %v6074_v59 = vpack.c.bf16 %v2820_v27, %v2818_v61 }
 0x491   :  { %6065 = vmatprep.subr.bf16.mxu0 %v6064_v41 }
 0x493   :  { %6019 = vmatpush3.bf16.msra.mxu1 %v6016_v50  ;;  %v6076_v50 = vpack.c.bf16 %v2825_v63, %v2823_v10 }
 0x494   :  { %6021 = vmatprep.subr.bf16.mxu1 %v6020_v34  ;;  %6067 = vmatpush1.bf16.msra.mxu0 %v6066_v58 }
 0x495   :  { %6069 = vmatprep.subr.bf16.mxu0 %v6068_v11 }
 0x497   :  { %6023 = vmatpush3.bf16.msra.mxu1 %v6020_v34  ;;  %v2827_v34 = vld [vmem:[%s9234_s10 + $0x148] sm:$0xff] }
 0x498   :  { %6071 = vmatpush1.bf16.msra.mxu0 %v6070_v56  ;;  %v6080_v55 = vpack.c.bf16 %v2829_v52, %v2827_v34 }
 0x499   :  { %6073 = vmatprep.subr.bf16.mxu0 %v6072_v25 }
 0x49c   :  { %6075 = vmatpush1.bf16.msra.mxu0 %v6074_v59 }
 0x49d   :  { %6077 = vmatprep.subr.bf16.mxu0 %v6076_v50 }
 0x4a0   :  { %6079 = vmatpush1.bf16.msra.mxu0 %v6078_v54 }
 0x4a1   :  { %6081 = vmatprep.subr.bf16.mxu0 %v6080_v55 }
 0x4a4   :  { %6083 = vmatpush1.bf16.msra.mxu0 %v6082_v28  ;;  %v2637_v28 = vld [vmem:[%s9233_s9] sm:$0x3] }
 0x4a5   :  { %6085 = vmatprep.subr.bf16.mxu0 %v6084_v60 }
 0x4a8   :  { %6087 = vmatpush1.bf16.msra.mxu0 %v6086_v5  ;;  %v2642_v5 = vrot.slane %v2637_v28, %v197_v40 }
 0x50c   :  { %v5362_v20 = vpop.f32.mrb[24].mxu1 }
 0x50d   :  { %v5363_v17 = vpop.f32.mrb[25].mxu1 }
 0x50e   :  { %v5364_v6 = vadd.f32 %v5363_v17, %v5362_v20  ;;  %v2646_v17 = vrot.slane %v2637_v28, %v201_v42  ;;  %v2975_v28 = vld [vmem:[%s9235_s11 + $0x80] sm:$0xff] }
 0x510   :  { %v5365_v30 = vpop.f32.mrb[26].mxu1 }
 0x511   :  { %v5366_v32 = vpop.f32.mrb[27].mxu1 }
 0x512   :  { %v5367_v19 = vadd.f32 %v5366_v32, %v5365_v30 }
 0x514   :  { %v5368_v33 = vpop.f32.mrb[28].mxu1 }
 0x515   :  { %v5369_v13 = vpop.f32.mrb[29].mxu1 }
 0x516   :  { %v5370_v36 = vadd.f32 %v5369_v13, %v5368_v33 }
 0x518   :  { %v5371_v21 = vpop.f32.mrb[30].mxu1 }
 0x519   :  { %v5372_v49 = vpop.f32.mrb[31].mxu1 }
 0x51a   :  { %v5373_v1 = vadd.f32 %v5372_v49, %v5371_v21 }
 0x51c   :  { %v5406_v18 = vpop.f32.mrb[56].mxu0 }
 0x51d   :  { %v5407_v37 = vpop.f32.mrb[57].mxu0 }
 0x51e   :  { %v5408_v7 = vadd.f32 %v5407_v37, %v5406_v18 }
 0x520   :  { %v2220_v9 = vadd.f32 %v5408_v7, %v5364_v6  ;;  %v5409_v22 = vpop.f32.mrb[58].mxu0 }
 0x521   :  { %v5410_v24 = vpop.f32.mrb[59].mxu0 }
 0x522   :  { %v5411_v26 = vadd.f32 %v5410_v24, %v5409_v22 }
 0x524   :  { %v2225_v29 = vadd.f32 %v5411_v26, %v5367_v19  ;;  %v5412_v12 = vpop.f32.mrb[60].mxu0 }
 0x525   :  { %v5413_v35 = vpop.f32.mrb[61].mxu0 }
 0x526   :  { %v5414_v46 = vadd.f32 %v5413_v35, %v5412_v12  ;;  %v2835_v12 = vld [vmem:[%s9234_s10 + $0x188] sm:$0xff]  ;;  %v2837_v35 = vld [vmem:[%s9234_s10 + $0x198] sm:$0xff] }
 0x528   :  { %v2230_v31 = vadd.f32 %v5414_v46, %v5370_v36  ;;  %v5415_v48 = vpop.f32.mrb[62].mxu0  ;;  %v6088_v46 = vpack.c.bf16 %v2837_v35, %v2835_v12  ;;  %v3015_v12 = vld [vmem:[%s9235_s11 + $0x1c0] sm:$0xff] }
 0x529   :  { %v5416_v38 = vpop.f32.mrb[63].mxu0  ;;  %v3019_v35 = vld [vmem:[%s9235_s11 + $0x1e0] sm:$0xff] }
 0x52a   :  { %v5417_v41 = vadd.f32 %v5416_v38, %v5415_v48  ;;  %v2836_v48 = vld [vmem:[%s9234_s10 + $0x190] sm:$0xff]  ;;  %6089 = vmatprep.subr.bf16.mxu0 %v6088_v46 }
 0x52c   :  { %v2235_v51 = vadd.f32 %v5417_v41, %v5373_v1  ;;  %v5450_v53 = vpop.f32.mrb[32].mxu1  ;;  %v2839_v41 = vld [vmem:[%s9234_s10 + $0x1a8] sm:$0xff] }
 0x52d   :  { %v5451_v43 = vpop.f32.mrb[33].mxu1 }
 0x52e   :  { %v5452_v0 = vadd.f32 %v5451_v43, %v5450_v53  ;;  %v2838_v43 = vld [vmem:[%s9234_s10 + $0x1a0] sm:$0xff] }
 0x530   :  { %v2305_v58 = vadd.f32 %v5452_v0, %v2220_v9  ;;  %v5453_v11 = vpop.f32.mrb[34].mxu1  ;;  %v2840_v0 = vld [vmem:[%s9234_s10 + $0x1b0] sm:$0xff] }
 0x531   :  { %v5454_v44 = vpop.f32.mrb[35].mxu1 }
 0x532   :  { %v5455_v8 = vadd.f32 %v5454_v44, %v5453_v11  ;;  %v2843_v11 = vld [vmem:[%s9234_s10 + $0x1c8] sm:$0xff]  ;;  %v2845_v44 = vld [vmem:[%s9234_s10 + $0x1d8] sm:$0xff] }
 0x534   :  { %v2310_v47 = vadd.f32 %v5455_v8, %v2225_v29  ;;  %v5456_v23 = vpop.f32.mrb[36].mxu1  ;;  %v6096_v8 = vpack.c.bf16 %v2845_v44, %v2843_v11  ;;  %v3039_v11 = vld [vmem:[%s9235_s11 + $0x280] sm:$0xff] }
 0x535   :  { %v5457_v56 = vpop.f32.mrb[37].mxu1  ;;  %v3043_v44 = vld [vmem:[%s9235_s11 + $0x2a0] sm:$0xff] }
 0x536   :  { %v5458_v25 = vadd.f32 %v5457_v56, %v5456_v23  ;;  %v2844_v23 = vld [vmem:[%s9234_s10 + $0x1d0] sm:$0xff] }
 0x538   :  { %v2315_v61 = vadd.f32 %v5458_v25, %v2230_v31  ;;  %v5459_v27 = vpop.f32.mrb[38].mxu1  ;;  %v2834_v31 = vld [vmem:[%s9234_s10 + $0x180] sm:$0xff]  ;;  %v2847_v25 = vld [vmem:[%s9234_s10 + $0x1e8] sm:$0xff] }
 0x539   :  { %v5460_v10 = vpop.f32.mrb[39].mxu1  ;;  %v6090_v38 = vpack.c.bf16 %v2836_v48, %v2834_v31  ;;  %v5215_v31 = vcombine.high %v3015_v12, %v3019_v35  ;;  %v3023_v48 = vld [vmem:[%s9235_s11 + $0x200] sm:$0xff] }
 0x53a   :  { %v5461_v63 = vadd.f32 %v5460_v10, %v5459_v27  ;;  %v2846_v10 = vld [vmem:[%s9234_s10 + $0x1e0] sm:$0xff] }
 0x53b   :  { %6091 = vmatpush1.bf16.msra.mxu0 %v6090_v38  ;;  %v3027_v38 = vld [vmem:[%s9235_s11 + $0x220] sm:$0xff] }
 0x53c   :  { %v2320_v59 = vadd.f32 %v5461_v63, %v2235_v51  ;;  %v2841_v51 = vld [vmem:[%s9234_s10 + $0x1b8] sm:$0xff]  ;;  %v2848_v63 = vld [vmem:[%s9234_s10 + $0x1f0] sm:$0xff] }
 0x53d   :  { %v5494_v50 = vpop.f32.mrb[64].mxu0  ;;  %v6092_v53 = vpack.c.bf16 %v2841_v51, %v2839_v41  ;;  %v5214_v41 = vcombine.low %v3015_v12, %v3019_v35  ;;  %v5223_v51 = vcombine.high %v3023_v48, %v3027_v38  ;;  %v3008_v35 = vld [vmem:[%s9235_s11 + $0x188] sm:$0xff] }
 0x53e   :  { %v5495_v45 = vpop.f32.mrb[65].mxu0 }
 0x53f   :  { %v5496_v3 = vadd.f32 %v5495_v45, %v5494_v50  ;;  %6093 = vmatprep.subr.bf16.mxu0 %v6092_v53  ;;  %v2959_v50 = vld [vmem:[%s9235_s11] sm:$0xff] }
 0x540   :  { %v2963_v45 = vld [vmem:[%s9235_s11 + $0x20] sm:$0xff] }
 0x541   :  { %v2390_v34 = vadd.f32 %v5496_v3, %v2305_v58  ;;  %v5497_v52 = vpop.f32.mrb[66].mxu0  ;;  %v6094_v58 = vpack.c.bf16 %v2840_v0, %v2838_v43  ;;  %v8248_v3 = vld [vmem:[%s9235_s11 + $0x8] sm:$0xff]  ;;  %v3031_v53 = vld [vmem:[%s9235_s11 + $0x240] sm:$0xff]  ;;  %v5222_v0 = vcombine.low %v3023_v48, %v3027_v38 }
 0x542   :  { %v5498_v54 = vpop.f32.mrb[67].mxu0  ;;  %v3035_v43 = vld [vmem:[%s9235_s11 + $0x260] sm:$0xff]  ;;  %v3016_v38 = vld [vmem:[%s9235_s11 + $0x1c8] sm:$0xff] }
 0x543   :  { %v5499_v55 = vadd.f32 %v5498_v54, %v5497_v52  ;;  %5756 = vmatprep.mubr.msk.f32.mxu1 %vm205_vm0, %v2390_v34  ;;  %6095 = vmatpush1.bf16.msra.mxu0 %v6094_v58  ;;  %v5158_v34 = vcombine.low %v2959_v50, %v2963_v45  ;;  %v5159_v52 = vcombine.high %v2959_v50, %v2963_v45  ;;  %v8253_v54 = vld [vmem:[%s9235_s11 + $0x28] sm:$0xff] }
 0x544   :  { %6097 = vmatprep.subr.bf16.mxu0 %v6096_v8  ;;  %v5231_v58 = vcombine.high %v3031_v53, %v3035_v43  ;;  %v5230_v8 = vcombine.low %v3031_v53, %v3035_v43  ;;  %v3024_v43 = vld [vmem:[%s9235_s11 + $0x208] sm:$0xff] }
 0x545   :  { %v2395_v62 = vadd.f32 %v5499_v55, %v2310_v47  ;;  %v5500_v57 = vpop.f32.mrb[68].mxu0  ;;  %v2842_v47 = vld [vmem:[%s9234_s10 + $0x1c0] sm:$0xff]  ;;  %3727 = vmatprep.subr.bf16.mxu1 %v5159_v52 }
 0x546   :  { %v5501_v14 = vpop.f32.mrb[69].mxu0  ;;  %v6098_v56 = vpack.c.bf16 %v2844_v23, %v2842_v47  ;;  %v2967_v55 = vld [vmem:[%s9235_s11 + $0x40] sm:$0xff]  ;;  %v5239_v47 = vcombine.high %v3039_v11, %v3043_v44  ;;  %v5238_v23 = vcombine.low %v3039_v11, %v3043_v44  ;;  %v3032_v44 = vld [vmem:[%s9235_s11 + $0x248] sm:$0xff] }
 0x547   :  { %v5502_v4 = vadd.f32 %v5501_v14, %v5500_v57  ;;  %5757 = vmatmul.mubr.msk.f32.vlgmr.msra.gmra.mrb[40].mxu1 %vm205_vm0, %v2395_v62  ;;  %v2971_v62 = vld [vmem:[%s9235_s11 + $0x60] sm:$0xff]  ;;  %v5160_v57 = vcombine.low %v8248_v3, %v8253_v54  ;;  %v5161_v14 = vcombine.high %v8248_v3, %v8253_v54 }
 0x548   :  { %6099 = vmatpush1.bf16.msra.mxu0 %v6098_v56  ;;  %3728 = vmatpush1.bf16.msra.mxu1 %v5158_v34 }
 0x549   :  { %v2400_v60 = vadd.f32 %v5502_v4, %v2315_v61  ;;  %v5503_v2 = vpop.f32.mrb[70].mxu0  ;;  %v2849_v61 = vld [vmem:[%s9234_s10 + $0x1f8] sm:$0xff]  ;;  %v5167_v4 = vcombine.high %v2967_v55, %v2971_v62 }
 0x54a   :  { %v5504_v15 = vpop.f32.mrb[71].mxu0  ;;  %v6100_v27 = vpack.c.bf16 %v2849_v61, %v2847_v25 }
 0x54b   :  { %v5505_v20 = vadd.f32 %v5504_v15, %v5503_v2  ;;  %5759 = vmatprep.mubr.msk.f32.mxu1 %vm205_vm0, %v2400_v60  ;;  %v2979_v60 = vld [vmem:[%s9235_s11 + $0xa0] sm:$0xff]  ;;  %v5166_v2 = vcombine.low %v2967_v55, %v2971_v62  ;;  %3729 = vmatprep.subr.bf16.mxu1 %v5167_v4 }
 0x54c   :  { %6101 = vmatprep.subr.bf16.mxu0 %v6100_v27  ;;  %v5175_v15 = vcombine.high %v2975_v28, %v2979_v60 }
 0x54d   :  { %v2405_v6 = vadd.f32 %v5505_v20, %v2320_v59  ;;  %v2727_v30 = vpop.f32.mrb[72].mxu0  ;;  %v6102_v59 = vpack.c.bf16 %v2848_v63, %v2846_v10  ;;  %v2987_v20 = vld [vmem:[%s9235_s11 + $0xe0] sm:$0xff]  ;;  %3730 = vmatpush1.bf16.msra.mxu1 %v5166_v2 }
 0x54e   :  { %v8166_v32 = vadd.f32 %v2727_v30, %v2642_v5  ;;  %v2729_v19 = vpop.f32.mrb[73].mxu0  ;;  %3731 = vmatprep.subr.bf16.mxu1 %v5175_v15  ;;  %v2991_v30 = vld [vmem:[%s9235_s11 + $0x100] sm:$0xff] }
 0x54f   :  { %v8168_v33 = vadd.f32 %v2729_v19, %v2646_v17  ;;  %5760 = vmatmul.mubr.msk.f32.gmra.mrb[42].mxu1 %vm205_vm0, %v2405_v6  ;;  %6103 = vmatpush1.bf16.msra.mxu0 %v6102_v59  ;;  %v2995_v19 = vld [vmem:[%s9235_s11 + $0x120] sm:$0xff] }
 0x550   :  { %3780 = vmatprep.subr.bf16.mxu0 %v5161_v14 }
 0x551   :  { %v2733_v13 = vpop.f32.mrb[74].mxu0  ;;  %v2750_v36 = vmax.f32 %v8166_v32, %v8168_v33 }
 0x552   :  { %v8173_v40 = vadd.f32 %v2733_v13, %v2642_v5  ;;  %v2735_v21 = vpop.f32.mrb[75].mxu0 }
 0x553   :  { %v8175_v49 = vadd.f32 %v2735_v21, %v2646_v17  ;;  %2751 = vmax.xlane.f32.xlu0 %v2750_v36  ;;  %v5191_v36 = vcombine.high %v2991_v30, %v2995_v19  ;;  %v2999_v21 = vld [vmem:[%s9235_s11 + $0x140] sm:$0xff] }
 0x555   :  { %v2739_v39 = vpop.f32.mrb[76].mxu0  ;;  %v2753_v42 = vmax.f32 %v8173_v40, %v8175_v49 }
 0x556   :  { %v8179_v1 = vadd.f32 %v2739_v39, %v2642_v5  ;;  %v2741_v18 = vpop.f32.mrb[77].mxu0  ;;  %v3003_v39 = vld [vmem:[%s9235_s11 + $0x160] sm:$0xff] }
 0x557   :  { %v8181_v37 = vadd.f32 %v2741_v18, %v2646_v17  ;;  %2754 = vmax.xlane.f32.xlu1 %v2753_v42  ;;  %v5190_v42 = vcombine.low %v2991_v30, %v2995_v19  ;;  %v5199_v18 = vcombine.high %v2999_v21, %v3003_v39  ;;  %v2984_v30 = vld [vmem:[%s9235_s11 + $0xc8] sm:$0xff] }
 0x558   :  { %v2988_v19 = vld [vmem:[%s9235_s11 + $0xe8] sm:$0xff] }
 0x559   :  { %v2745_v7 = vpop.f32.mrb[78].mxu0  ;;  %v2756_v9 = vmax.f32 %v8179_v1, %v8181_v37 }
 0x55a   :  { %v8185_v22 = vadd.f32 %v2745_v7, %v2642_v5  ;;  %v2747_v24 = vpop.f32.mrb[79].mxu0  ;;  %v2983_v5 = vld [vmem:[%s9235_s11 + $0xc0] sm:$0xff] }
 0x55b   :  { %v8187_v26 = vadd.f32 %v2747_v24, %v2646_v17  ;;  %2757 = vmax.xlane.f32.xlu0 %v2756_v9  ;;  %v5174_v17 = vcombine.low %v2975_v28, %v2979_v60  ;;  %v5183_v6 = vcombine.high %v2983_v5, %v2987_v20  ;;  %v5182_v13 = vcombine.low %v2983_v5, %v2987_v20  ;;  %v3007_v7 = vld [vmem:[%s9235_s11 + $0x180] sm:$0xff]  ;;  %v2972_v28 = vld [vmem:[%s9235_s11 + $0x68] sm:$0xff] }
 0x55c   :  { %v3011_v9 = vld [vmem:[%s9235_s11 + $0x1a0] sm:$0xff]  ;;  %v5198_v24 = vcombine.low %v2999_v21, %v3003_v39  ;;  %v2996_v21 = vld [vmem:[%s9235_s11 + $0x128] sm:$0xff] }
 0x55d   :  { %v2759_v29 = vmax.f32 %v8185_v22, %v8187_v26  ;;  %3732 = vmatpush1.bf16.msra.mxu1 %v5174_v17  ;;  %v5206_v46 = vcombine.low %v3007_v7, %v3011_v9 }
 0x55e   :  { %3733 = vmatprep.subr.bf16.mxu1 %v5183_v6 }
 0x55f   :  { %2760 = vmax.xlane.f32.xlu1 %v2759_v29  ;;  %v5207_v29 = vcombine.high %v3007_v7, %v3011_v9  ;;  %v3000_v9 = vld [vmem:[%s9235_s11 + $0x148] sm:$0xff] }
 0x561   :  { %3734 = vmatpush1.bf16.msra.mxu1 %v5182_v13 }
 0x562   :  { %3735 = vmatprep.subr.bf16.mxu1 %v5191_v36  ;;  %v2992_v36 = vld [vmem:[%s9235_s11 + $0x108] sm:$0xff] }
 0x563   :  { %v5193_v7 = vcombine.high %v2992_v36, %v2996_v21 }
 0x565   :  { %3736 = vmatpush1.bf16.msra.mxu1 %v5190_v42  ;;  %v5184_v42 = vcombine.low %v2984_v30, %v2988_v19 }
 0x566   :  { %3737 = vmatprep.subr.bf16.mxu1 %v5199_v18 }
 0x569   :  { %3738 = vmatpush1.bf16.msra.mxu1 %v5198_v24  ;;  %v3004_v24 = vld [vmem:[%s9235_s11 + $0x168] sm:$0xff] }
 0x56a   :  { %3739 = vmatprep.subr.bf16.mxu1 %v5207_v29  ;;  %v5192_v29 = vcombine.low %v2992_v36, %v2996_v21  ;;  %v5201_v12 = vcombine.high %v3000_v9, %v3004_v24  ;;  %v3067_v36 = vld [vmem:[%s9235_s11 + $0x360] sm:$0xff]  ;;  %v3064_v21 = vld [vmem:[%s9235_s11 + $0x348] sm:$0xff] }
 0x56d   :  { %3740 = vmatpush1.bf16.msra.mxu1 %v5206_v46  ;;  %v3012_v46 = vld [vmem:[%s9235_s11 + $0x1a8] sm:$0xff] }
 0x56e   :  { %3741 = vmatprep.subr.bf16.mxu1 %v5215_v31  ;;  %v5200_v31 = vcombine.low %v3000_v9, %v3004_v24  ;;  %v5209_v48 = vcombine.high %v3008_v35, %v3012_v46 }
 0x571   :  { %3742 = vmatpush1.bf16.msra.mxu1 %v5214_v41  ;;  %v3020_v41 = vld [vmem:[%s9235_s11 + $0x1e8] sm:$0xff] }
 0x572   :  { %3743 = vmatprep.subr.bf16.mxu1 %v5223_v51  ;;  %v5208_v51 = vcombine.low %v3008_v35, %v3012_v46  ;;  %v5217_v53 = vcombine.high %v3016_v38, %v3020_v41  ;;  %v3075_v35 = vld [vmem:[%s9235_s11 + $0x3a0] sm:$0xff]  ;;  %v3072_v46 = vld [vmem:[%s9235_s11 + $0x388] sm:$0xff] }
 0x575   :  { %3744 = vmatpush1.bf16.msra.mxu1 %v5222_v0  ;;  %v3028_v0 = vld [vmem:[%s9235_s11 + $0x228] sm:$0xff] }
 0x576   :  { %3745 = vmatprep.subr.bf16.mxu1 %v5231_v58  ;;  %v5216_v58 = vcombine.low %v3016_v38, %v3020_v41  ;;  %v5225_v11 = vcombine.high %v3024_v43, %v3028_v0 }
 0x579   :  { %3746 = vmatpush1.bf16.msra.mxu1 %v5230_v8  ;;  %v3036_v8 = vld [vmem:[%s9235_s11 + $0x268] sm:$0xff] }
 0x57a   :  { %3747 = vmatprep.subr.bf16.mxu1 %v5239_v47  ;;  %v5224_v47 = vcombine.low %v3024_v43, %v3028_v0  ;;  %v3083_v43 = vld [vmem:[%s9235_s11 + $0x3e0] sm:$0xff]  ;;  %v3080_v0 = vld [vmem:[%s9235_s11 + $0x3c8] sm:$0xff] }
 0x57d   :  { %3748 = vmatpush1.bf16.msra.mxu1 %v5238_v23  ;;  %v5233_v23 = vcombine.high %v3032_v44, %v3036_v8 }
 0x5e0   :  { %v2752_v56 = vpop.xlane.xlu0 %2751 }
 0x5e1   :  { %v2762_v25 = vsub.f32 %v8166_v32, %v2752_v56  ;;  %v2763_v61 = vsub.f32 %v8168_v33, %v2752_v56  ;;  %v3040_v56 = vld [vmem:[%s9235_s11 + $0x288] sm:$0xff] }
 0x5e3   :  { %v2770_v27 = vmul.f32 1.442695, %v2762_v25  ;;  %v2772_v10 = vmul.f32 1.442695, %v2763_v61  ;;  %v3044_v25 = vld [vmem:[%s9235_s11 + $0x2a8] sm:$0xff]  ;;  %v5232_v61 = vcombine.low %v3032_v44, %v3036_v8 }
 0x5e4   :  { %v2755_v63 = vpop.xlane.xlu1 %2754 }
 0x5e5   :  { %6308 = vpow2.f32 %v2770_v27  ;;  %v2764_v59 = vsub.f32 %v8173_v40, %v2755_v63  ;;  %v2765_v50 = vsub.f32 %v8175_v49, %v2755_v63  ;;  %v2968_v49 = vld [vmem:[%s9235_s11 + $0x48] sm:$0xff]  ;;  %v5241_v27 = vcombine.high %v3040_v56, %v3044_v25  ;;  %v5153_v63 = vld [vmem:[#allocation12] ss:$0 sm:$0xff] }
 0x5e6   :  { %6310 = vpow2.f32 %v2772_v10  ;;  %v5169_v15 = vcombine.high %v2968_v49, %v2972_v28  ;;  %v5168_v20 = vcombine.low %v2968_v49, %v2972_v28  ;;  %v5240_v10 = vcombine.low %v3040_v56, %v3044_v25  ;;  %v3052_v49 = vld [vmem:[%s9235_s11 + $0x2e8] sm:$0xff]  ;;  %v2965_v56 = vld [vmem:[%s9235_s11 + $0x30] sm:$0xff]  ;;  %v2962_v25 = vld [vmem:[%s9235_s11 + $0x18] sm:$0xff] }
 0x5e7   :  { %v2774_v45 = vmul.f32 1.442695, %v2764_v59  ;;  %v2776_v34 = vmul.f32 1.442695, %v2765_v50 }
 0x5e8   :  { %v2758_v52 = vpop.xlane.xlu0 %2757 }
 0x5e9   :  { %6312 = vpow2.f32 %v2774_v45  ;;  %v2766_v55 = vsub.f32 %v8179_v1, %v2758_v52  ;;  %v2767_v62 = vsub.f32 %v8181_v37, %v2758_v52 }
 0x5ea   :  { %6314 = vpow2.f32 %v2776_v34 }
 0x5eb   :  { %v2778_v32 = vmul.f32 1.442695, %v2766_v55  ;;  %v2780_v33 = vmul.f32 1.442695, %v2767_v62 }
 0x5ec   :  { %v2761_v14 = vpop.xlane.xlu1 %2760 }
 0x5ed   :  { %6316 = vpow2.f32 %v2778_v32  ;;  %v2768_v4 = vsub.f32 %v8185_v22, %v2761_v14  ;;  %v2769_v40 = vsub.f32 %v8187_v26, %v2761_v14  ;;  %v2976_v22 = vld [vmem:[%s9235_s11 + $0x88] sm:$0xff]  ;;  %v3051_v14 = vld [vmem:[%s9235_s11 + $0x2e0] sm:$0xff] }
 0x5ee   :  { %6318 = vpow2.f32 %v2780_v33  ;;  %v2980_v26 = vld [vmem:[%s9235_s11 + $0xa8] sm:$0xff]  ;;  %v3047_v33 = vld [vmem:[%s9235_s11 + $0x2c0] sm:$0xff] }
 0x5ef   :  { %v8333_v1 = vpop.eup %6308  ;;  %v2782_v37 = vmul.f32 1.442695, %v2768_v4  ;;  %v2784_v60 = vmul.f32 1.442695, %v2769_v40  ;;  %v5177_v6 = vcombine.high %v2976_v22, %v2980_v26  ;;  %v5176_v3 = vcombine.low %v2976_v22, %v2980_v26  ;;  %v3048_v4 = vld [vmem:[%s9235_s11 + $0x2c8] sm:$0xff]  ;;  %v3059_v22 = vld [vmem:[%s9235_s11 + $0x320] sm:$0xff] }
 0x5f0   :  { %v8335_v2 = vpop.eup %6310  ;;  %v5247_v40 = vcombine.high %v3047_v33, %v3051_v14  ;;  %v5246_v28 = vcombine.low %v3047_v33, %v3051_v14  ;;  %v3056_v26 = vld [vmem:[%s9235_s11 + $0x308] sm:$0xff] }
 0x5f1   :  { %6320 = vpow2.f32 %v2782_v37  ;;  %2914 = vmatprep.mubr.f32.mxu0 %v8335_v2  ;;  %v5248_v37 = vcombine.low %v3048_v4, %v3052_v49 }
 0x5f2   :  { %6322 = vpow2.f32 %v2784_v60  ;;  %2915 = vmatmul.mubr.f32.vlgmr.msra.gmra.mrb[80].mxu0 %v8333_v1  ;;  %v5249_v60 = vcombine.high %v3048_v4, %v3052_v49  ;;  %3749 = vmatprep.subr.bf16.mxu1 %v5247_v40 }
 0x5f3   :  { %v8345_v5 = vpop.eup %6312  ;;  %3781 = vmatpush1.bf16.msra.mxu0 %v5160_v57  ;;  %v5185_v57 = vcombine.high %v2984_v30, %v2988_v19  ;;  %3750 = vmatpush1.bf16.msra.mxu1 %v5246_v28 }
 0x5f4   :  { %v8350_v17 = vpop.eup %6314  ;;  %3782 = vmatprep.subr.bf16.mxu0 %v5169_v15  ;;  %v3055_v15 = vld [vmem:[%s9235_s11 + $0x300] sm:$0xff] }
 0x5f5   :  { %2920 = vmatprep.mubr.f32.mxu0 %v8350_v17  ;;  %v5254_v30 = vcombine.low %v3055_v15, %v3059_v22 }
 0x5f6   :  { %2921 = vmatmul.mubr.f32.gmra.mrb[82].mxu0 %v8345_v5 }
 0x5f7   :  { %v8360_v13 = vpop.eup %6316  ;;  %3783 = vmatpush1.bf16.msra.mxu0 %v5168_v20  ;;  %v5255_v20 = vcombine.high %v3055_v15, %v3059_v22 }
 0x5f8   :  { %v8362_v54 = vpop.eup %6318  ;;  %3784 = vmatprep.subr.bf16.mxu0 %v5177_v6  ;;  %v3060_v6 = vld [vmem:[%s9235_s11 + $0x328] sm:$0xff] }
 0x5f9   :  { %2926 = vmatprep.mubr.f32.mxu0 %v8362_v54  ;;  %v5256_v19 = vcombine.low %v3056_v26, %v3060_v6  ;;  %3751 = vmatprep.subr.bf16.mxu1 %v5255_v20  ;;  %v2970_v20 = vld [vmem:[%s9235_s11 + $0x58] sm:$0xff] }
 0x5fa   :  { %2927 = vmatmul.mubr.f32.gmra.mrb[84].mxu0 %v8360_v13  ;;  %3752 = vmatpush1.bf16.msra.mxu1 %v5254_v30 }
 0x5fb   :  { %v8372_v39 = vpop.eup %6320  ;;  %3785 = vmatpush1.bf16.msra.mxu0 %v5176_v3  ;;  %v5257_v3 = vcombine.high %v3056_v26, %v3060_v6  ;;  %v2973_v26 = vld [vmem:[%s9235_s11 + $0x70] sm:$0xff] }
 0x5fc   :  { %v8374_v18 = vpop.eup %6322  ;;  %3786 = vmatprep.subr.bf16.mxu0 %v5185_v57  ;;  %v3063_v57 = vld [vmem:[%s9235_s11 + $0x340] sm:$0xff] }
 0x5fd   :  { %2932 = vmatprep.mubr.f32.mxu0 %v8374_v18  ;;  %v5262_v9 = vcombine.low %v3063_v57, %v3067_v36 }
 0x5fe   :  { %2933 = vmatmul.mubr.f32.gmra.mrb[86].mxu0 %v8372_v39 }
 0x5ff   :  { %3787 = vmatpush1.bf16.msra.mxu0 %v5184_v42  ;;  %v5263_v42 = vcombine.high %v3063_v57, %v3067_v36  ;;  %v2978_v57 = vld [vmem:[%s9235_s11 + $0x98] sm:$0xff] }
 0x600   :  { %3788 = vmatprep.subr.bf16.mxu0 %v5193_v7  ;;  %v3068_v7 = vld [vmem:[%s9235_s11 + $0x368] sm:$0xff]  ;;  %v2982_v36 = vld [vmem:[%s9235_s11 + $0xb8] sm:$0xff] }
 0x601   :  { %v5264_v24 = vcombine.low %v3064_v21, %v3068_v7  ;;  %3753 = vmatprep.subr.bf16.mxu1 %v5263_v42 }
 0x602   :  { %3754 = vmatpush1.bf16.msra.mxu1 %v5262_v9 }
 0x603   :  { %3789 = vmatpush1.bf16.msra.mxu0 %v5192_v29  ;;  %v5265_v29 = vcombine.high %v3064_v21, %v3068_v7 }
 0x604   :  { %3790 = vmatprep.subr.bf16.mxu0 %v5201_v12  ;;  %v3071_v12 = vld [vmem:[%s9235_s11 + $0x380] sm:$0xff] }
 0x605   :  { %v5270_v38 = vcombine.low %v3071_v12, %v3075_v35 }
 0x607   :  { %3791 = vmatpush1.bf16.msra.mxu0 %v5200_v31  ;;  %v5271_v31 = vcombine.high %v3071_v12, %v3075_v35  ;;  %v5181_v12 = vcombine.high %v2978_v57, %v2982_v36 }
 0x608   :  { %3792 = vmatprep.subr.bf16.mxu0 %v5209_v48  ;;  %v3076_v48 = vld [vmem:[%s9235_s11 + $0x3a8] sm:$0xff] }
 0x609   :  { %v5272_v41 = vcombine.low %v3072_v46, %v3076_v48  ;;  %3755 = vmatprep.subr.bf16.mxu1 %v5271_v31 }
 0x60a   :  { %3756 = vmatpush1.bf16.msra.mxu1 %v5270_v38  ;;  %v2985_v38 = vld [vmem:[%s9235_s11 + $0xd0] sm:$0xff] }
 0x60b   :  { %3793 = vmatpush1.bf16.msra.mxu0 %v5208_v51  ;;  %v5273_v51 = vcombine.high %v3072_v46, %v3076_v48 }
 0x60c   :  { %3794 = vmatprep.subr.bf16.mxu0 %v5217_v53  ;;  %v3079_v53 = vld [vmem:[%s9235_s11 + $0x3c0] sm:$0xff] }
 0x60d   :  { %v5278_v44 = vcombine.low %v3079_v53, %v3083_v43 }
 0x60f   :  { %3795 = vmatpush1.bf16.msra.mxu0 %v5216_v58  ;;  %v5279_v58 = vcombine.high %v3079_v53, %v3083_v43  ;;  %v5180_v53 = vcombine.low %v2978_v57, %v2982_v36  ;;  %v2993_v43 = vld [vmem:[%s9235_s11 + $0x110] sm:$0xff] }
 0x610   :  { %3796 = vmatprep.subr.bf16.mxu0 %v5225_v11  ;;  %v3084_v11 = vld [vmem:[%s9235_s11 + $0x3e8] sm:$0xff]  ;;  %v3033_v36 = vld [vmem:[%s9235_s11 + $0x250] sm:$0xff] }
 0x611   :  { %v5280_v8 = vcombine.low %v3080_v0, %v3084_v11  ;;  %3757 = vmatprep.subr.bf16.mxu1 %v5279_v58 }
 0x612   :  { %3758 = vmatpush1.bf16.msra.mxu1 %v5278_v44  ;;  %v2994_v44 = vld [vmem:[%s9235_s11 + $0x118] sm:$0xff] }
 0x613   :  { %3797 = vmatpush1.bf16.msra.mxu0 %v5224_v47  ;;  %v5281_v47 = vcombine.high %v3080_v0, %v3084_v11  ;;  %v2997_v11 = vld [vmem:[%s9235_s11 + $0x130] sm:$0xff] }
 0x614   :  { %3798 = vmatprep.subr.bf16.mxu0 %v5233_v23  ;;  %v2961_v23 = vld [vmem:[%s9235_s11 + $0x10] sm:$0xff] }
 0x617   :  { %3799 = vmatpush1.bf16.msra.mxu0 %v5232_v61  ;;  %v5163_v61 = vcombine.high %v2961_v23, %v2965_v56 }
 0x618   :  { %3800 = vmatprep.subr.bf16.mxu0 %v5241_v27  ;;  %v2966_v27 = vld [vmem:[%s9235_s11 + $0x38] sm:$0xff] }
 0x619   :  { %3833 = vmatprep.subr.bf16.mxu1 %v5163_v61  ;;  %v3001_v61 = vld [vmem:[%s9235_s11 + $0x150] sm:$0xff] }
 0x61a   :  { %v5758_v59 = vpop.f32.mrb[40].mxu1 }
 0x61b   :  { %v2614_v50 = vadd.f32 %v5758_v59, %v5153_v63  ;;  %v2587_v45 = vpop.f32.mrb[41].mxu1  ;;  %3801 = vmatpush1.bf16.msra.mxu0 %v5240_v10  ;;  %v5162_v10 = vcombine.low %v2961_v23, %v2965_v56  ;;  %v5165_v59 = vcombine.high %v2962_v25, %v2966_v27  ;;  %v5195_v56 = vcombine.high %v2993_v43, %v2997_v11 }
 0x61c   :  { %v2613_v34 = vadd.f32 %v5153_v63, %v2587_v45  ;;  %3802 = vmatprep.subr.bf16.mxu0 %v5249_v60  ;;  %v2969_v60 = vld [vmem:[%s9235_s11 + $0x50] sm:$0xff] }
 0x61d   :  { %2618 = vst.msk [vmem:[%s9242_s18 + $0x8] sm:$0xff] %vm205_vm0, %v2614_v50  ;;  %v5171_v30 = vcombine.high %v2969_v60, %v2973_v26  ;;  %v5170_v7 = vcombine.low %v2969_v60, %v2973_v26  ;;  %v3022_v60 = vld [vmem:[%s9235_s11 + $0x1f8] sm:$0xff] }
 0x61e   :  { %2617 = vst.msk [vmem:[%s9242_s18] sm:$0xff] %vm205_vm0, %v2613_v34 }
 0x61f   :  { %3803 = vmatpush1.bf16.msra.mxu0 %v5248_v37 }
 0x620   :  { %3804 = vmatprep.subr.bf16.mxu0 %v5257_v3 }
 0x622   :  { %v5761_v52 = vpop.f32.mrb[42].mxu1 }
 0x623   :  { %v2616_v55 = vadd.f32 %v5761_v52, %v5153_v63  ;;  %v2597_v62 = vpop.f32.mrb[43].mxu1  ;;  %3805 = vmatpush1.bf16.msra.mxu0 %v5256_v19 }
 0x624   :  { %v2615_v32 = vadd.f32 %v5153_v63, %v2597_v62  ;;  %3806 = vmatprep.subr.bf16.mxu0 %v5265_v29  ;;  %v5164_v63 = vcombine.low %v2962_v25, %v2966_v27  ;;  %v3005_v27 = vld [vmem:[%s9235_s11 + $0x170] sm:$0xff] }
 0x625   :  { %2620 = vst.msk [vmem:[%s9242_s18 + $0x18] sm:$0xff] %vm205_vm0, %v2616_v55 }
 0x626   :  { %2619 = vst.msk [vmem:[%s9242_s18 + $0x10] sm:$0xff] %vm205_vm0, %v2615_v32 }
 0x627   :  { %3807 = vmatpush1.bf16.msra.mxu0 %v5264_v24 }
 0x628   :  { %3808 = vmatprep.subr.bf16.mxu0 %v5273_v51  ;;  %v2989_v51 = vld [vmem:[%s9235_s11 + $0xf0] sm:$0xff] }
 0x629   :  { %v5187_v0 = vcombine.high %v2985_v38, %v2989_v51 }
 0x62b   :  { %3809 = vmatpush1.bf16.msra.mxu0 %v5272_v41 }
 0x62c   :  { %3810 = vmatprep.subr.bf16.mxu0 %v5281_v47  ;;  %v5186_v47 = vcombine.low %v2985_v38, %v2989_v51 }
 0x62f   :  { %3811 = vmatpush1.bf16.msra.mxu0 %v5280_v8  ;;  %v2998_v8 = vld [vmem:[%s9235_s11 + $0x138] sm:$0xff] }
 0x630   :  { %3886 = vmatprep.subr.bf16.mxu0 %v5165_v59  ;;  %v5197_v25 = vcombine.high %v2994_v44, %v2998_v8  ;;  %v5194_v59 = vcombine.low %v2993_v43, %v2997_v11  ;;  %v3050_v43 = vld [vmem:[%s9235_s11 + $0x2d8] sm:$0xff] }
 0x6c5   :  { %v2916_v50 = vpop.f32.mrb[80].mxu0 }
 0x6c6   :  { %v2918_v45 = vpop.f32.mrb[81].mxu0  ;;  %6324 = vrcp.f32 %v2916_v50  ;;  %v5196_v50 = vcombine.low %v2994_v44, %v2998_v8 }
 0x6c7   :  { %6326 = vrcp.f32 %v2918_v45  ;;  %v5203_v45 = vcombine.high %v3001_v61, %v3005_v27 }
 0x6c9   :  { %v2922_v34 = vpop.f32.mrb[82].mxu0 }
 0x6ca   :  { %6328 = vrcp.f32 %v2922_v34  ;;  %v2924_v52 = vpop.f32.mrb[83].mxu0 }
 0x6cb   :  { %6330 = vrcp.f32 %v2924_v52  ;;  %v3009_v52 = vld [vmem:[%s9235_s11 + $0x190] sm:$0xff] }
 0x6cd   :  { %v2928_v55 = vpop.f32.mrb[84].mxu0 }
 0x6ce   :  { %v2930_v62 = vpop.f32.mrb[85].mxu0  ;;  %6332 = vrcp.f32 %v2928_v55  ;;  %v3013_v55 = vld [vmem:[%s9235_s11 + $0x1b0] sm:$0xff] }
 0x6cf   :  { %6334 = vrcp.f32 %v2930_v62  ;;  %v3010_v62 = vld [vmem:[%s9235_s11 + $0x198] sm:$0xff] }
 0x6d0   :  { %v6325_v33 = vpop.eup %6324 }
 0x6d1   :  { %v2934_v32 = vpop.f32.mrb[86].mxu0  ;;  %v6327_v4 = vpop.eup %6326  ;;  %v2947_v28 = vmul.f32 %v6325_v33, %v8333_v1  ;;  %v2974_v1 = vld [vmem:[%s9235_s11 + $0x78] sm:$0xff]  ;;  %v5202_v33 = vcombine.low %v3001_v61, %v3005_v27 }
 0x6d2   :  { %6336 = vrcp.f32 %v2934_v32  ;;  %v2936_v14 = vpop.f32.mrb[87].mxu0  ;;  %v2948_v15 = vmul.f32 %v6327_v4, %v8335_v2  ;;  %v5173_v19 = vcombine.high %v2970_v20, %v2974_v1  ;;  %v2977_v2 = vld [vmem:[%s9235_s11 + $0x90] sm:$0xff]  ;;  %v5172_v9 = vcombine.low %v2970_v20, %v2974_v1  ;;  %v3014_v32 = vld [vmem:[%s9235_s11 + $0x1b8] sm:$0xff] }
 0x6d3   :  { %6338 = vrcp.f32 %v2936_v14  ;;  %v5211_v4 = vcombine.high %v3009_v52, %v3013_v55  ;;  %v3025_v1 = vld [vmem:[%s9235_s11 + $0x210] sm:$0xff] }
 0x6d4   :  { %v6329_v40 = vpop.eup %6328 }
 0x6d5   :  { %v6331_v49 = vpop.eup %6330  ;;  %v2949_v37 = vmul.f32 %v6329_v40, %v8345_v5  ;;  %v5213_v40 = vcombine.high %v3010_v62, %v3014_v32 }
 0x6d6   :  { %v2950_v22 = vmul.f32 %v6331_v49, %v8350_v17  ;;  %v2981_v17 = vld [vmem:[%s9235_s11 + $0xb0] sm:$0xff] }
 0x6d7   :  { %v8518_v5 = vpack.c.bf16 %v2949_v37, %v2947_v28  ;;  %v5179_v24 = vcombine.high %v2977_v2, %v2981_v17  ;;  %v3017_v49 = vld [vmem:[%s9235_s11 + $0x1d0] sm:$0xff]  ;;  %v3018_v37 = vld [vmem:[%s9235_s11 + $0x1d8] sm:$0xff] }
 0x6d8   :  { %v2956_v6 = vpack.c.bf16 %v2950_v22, %v2948_v15  ;;  %v6333_v3 = vpop.eup %6332  ;;  %v3021_v28 = vld [vmem:[%s9235_s11 + $0x1f0] sm:$0xff]  ;;  %v5210_v15 = vcombine.low %v3009_v52, %v3013_v55  ;;  %v5212_v22 = vcombine.low %v3010_v62, %v3014_v32  ;;  %v5221_v20 = vcombine.high %v3018_v37, %v3022_v60 }
 0x6d9   :  { %v6335_v21 = vpop.eup %6334  ;;  %v2951_v35 = vmul.f32 %v6333_v3, %v8360_v13  ;;  %v2986_v13 = vld [vmem:[%s9235_s11 + $0xd8] sm:$0xff]  ;;  %v5219_v26 = vcombine.high %v3017_v49, %v3021_v28 }
 0x6da   :  { %3759 = vmatprep.mubr.bf16.mxu1 %v2956_v6  ;;  %3812 = vmatprep.mubr.bf16.mxu0 %v2956_v6  ;;  %v2952_v31 = vmul.f32 %v6335_v21, %v8362_v54  ;;  %v2990_v54 = vld [vmem:[%s9235_s11 + $0xf8] sm:$0xff]  ;;  %v3037_v21 = vld [vmem:[%s9235_s11 + $0x270] sm:$0xff] }
 0x6db   :  { %3760 = vmatmul.mubr.bf16.vlgmr.msra.gmra.mrb[44].mxu1 %v8518_v5  ;;  %3813 = vmatmul.mubr.bf16.vlgmr.msra.gmra.mrb[88].mxu0 %v8518_v5  ;;  %v5189_v58 = vcombine.high %v2986_v13, %v2990_v54  ;;  %v5188_v23 = vcombine.low %v2986_v13, %v2990_v54  ;;  %v5234_v38 = vcombine.low %v3033_v36, %v3037_v21 }
 0x6dc   :  { %v6337_v42 = vpop.eup %6336  ;;  %3834 = vmatpush1.bf16.msra.mxu1 %v5162_v10  ;;  %3887 = vmatpush1.bf16.msra.mxu0 %v5164_v63  ;;  %v3002_v10 = vld [vmem:[%s9235_s11 + $0x158] sm:$0xff] }
 0x6dd   :  { %v6339_v29 = vpop.eup %6338  ;;  %3835 = vmatprep.subr.bf16.mxu1 %v5171_v30  ;;  %3888 = vmatprep.subr.bf16.mxu0 %v5173_v19  ;;  %v2953_v46 = vmul.f32 %v6337_v42, %v8372_v39  ;;  %v3006_v63 = vld [vmem:[%s9235_s11 + $0x178] sm:$0xff] }
 0x6de   :  { %v2954_v48 = vmul.f32 %v6339_v29, %v8374_v18  ;;  %v5178_v18 = vcombine.low %v2977_v2, %v2981_v17  ;;  %v5205_v34 = vcombine.high %v3002_v10, %v3006_v63  ;;  %v5204_v14 = vcombine.low %v3002_v10, %v3006_v63  ;;  %v3026_v30 = vld [vmem:[%s9235_s11 + $0x218] sm:$0xff] }
 0x6df   :  { %v8541_v41 = vpack.c.bf16 %v2953_v46, %v2951_v35  ;;  %v3030_v19 = vld [vmem:[%s9235_s11 + $0x238] sm:$0xff]  ;;  %v5218_v2 = vcombine.low %v3017_v49, %v3021_v28  ;;  %v5220_v17 = vcombine.low %v3018_v37, %v3022_v60  ;;  %v5235_v29 = vcombine.high %v3033_v36, %v3037_v21  ;;  %v3041_v35 = vld [vmem:[%s9235_s11 + $0x290] sm:$0xff]  ;;  %v3949_v21 = vld [vmem:[#allocation7 + $0x40] sm:$0xff] }
 0x6e0   :  { %3836 = vmatpush1.bf16.msra.mxu1 %v5170_v7  ;;  %3889 = vmatpush1.bf16.msra.mxu0 %v5172_v9  ;;  %v8552_v39 = vpack.c.bf16 %v2954_v48, %v2952_v31  ;;  %v5229_v57 = vcombine.high %v3026_v30, %v3030_v19  ;;  %v3034_v42 = vld [vmem:[%s9235_s11 + $0x258] sm:$0xff]  ;;  %v3045_v46 = vld [vmem:[%s9235_s11 + $0x2b0] sm:$0xff] }
 0x6e1   :  { %3837 = vmatprep.subr.bf16.mxu1 %v5179_v24  ;;  %3890 = vmatprep.subr.bf16.mxu0 %v5181_v12  ;;  %v3038_v7 = vld [vmem:[%s9235_s11 + $0x278] sm:$0xff]  ;;  %v5228_v24 = vcombine.low %v3026_v30, %v3030_v19  ;;  %v5243_v13 = vcombine.high %v3041_v35, %v3045_v46 }
 0x6e2   :  { %3769 = vmatprep.mubr.bf16.mxu1 %v8552_v39  ;;  %3822 = vmatprep.mubr.bf16.mxu0 %v8552_v39  ;;  %v5237_v12 = vcombine.high %v3034_v42, %v3038_v7  ;;  %v3042_v31 = vld [vmem:[%s9235_s11 + $0x298] sm:$0xff]  ;;  %v5236_v51 = vcombine.low %v3034_v42, %v3038_v7  ;;  %v3953_v42 = vld [vmem:[#allocation7 + $0x60] sm:$0xff] }
 0x6e3   :  { %3770 = vmatmul.mubr.bf16.gmra.mrb[48].mxu1 %v8541_v41  ;;  %3823 = vmatmul.mubr.bf16.gmra.mrb[92].mxu0 %v8541_v41  ;;  %v3046_v48 = vld [vmem:[%s9235_s11 + $0x2b8] sm:$0xff] }
 0x6e4   :  { %3838 = vmatpush1.bf16.msra.mxu1 %v5178_v18  ;;  %3891 = vmatpush1.bf16.msra.mxu0 %v5180_v53  ;;  %v5245_v54 = vcombine.high %v3042_v31, %v3046_v48  ;;  %v3049_v18 = vld [vmem:[%s9235_s11 + $0x2d0] sm:$0xff]  ;;  %v5244_v11 = vcombine.low %v3042_v31, %v3046_v48  ;;  %v3969_v31 = vld [vmem:[#allocation7 + $0xe0] sm:$0xff] }
 0x6e5   :  { %3865 = vmatprep.mubr.bf16.mxu1 %v2956_v6  ;;  %3918 = vmatprep.mubr.bf16.mxu0 %v2956_v6  ;;  %v3029_v6 = vld [vmem:[%s9235_s11 + $0x230] sm:$0xff] }
 0x6e6   :  { %3839 = vmatprep.subr.bf16.mxu1 %v5187_v0  ;;  %3892 = vmatprep.subr.bf16.mxu0 %v5189_v58  ;;  %v5227_v3 = vcombine.high %v3025_v1, %v3029_v6  ;;  %v5226_v9 = vcombine.low %v3025_v1, %v3029_v6  ;;  %v3053_v53 = vld [vmem:[%s9235_s11 + $0x2f0] sm:$0xff]  ;;  %v3054_v0 = vld [vmem:[%s9235_s11 + $0x2f8] sm:$0xff]  ;;  %v5242_v58 = vcombine.low %v3041_v35, %v3045_v46  ;;  %v3965_v46 = vld [vmem:[#allocation7 + $0xc0] sm:$0xff] }
 0x6e7   :  { %v5251_v44 = vcombine.high %v3049_v18, %v3053_v53  ;;  %v5253_v8 = vcombine.high %v3050_v43, %v3054_v0  ;;  %v5250_v61 = vcombine.low %v3049_v18, %v3053_v53  ;;  %v5252_v27 = vcombine.low %v3050_v43, %v3054_v0  ;;  %v3954_v18 = vld [vmem:[#allocation7 + $0x68] sm:$0xff]  ;;  %v6347_v53 = vld [vmem:[%s9257_s29] sm:$0xff] }
 0x6e8   :  { %3840 = vmatpush1.bf16.msra.mxu1 %v5186_v47  ;;  %3893 = vmatpush1.bf16.msra.mxu0 %v5188_v23  ;;  %v3057_v47 = vld [vmem:[%s9235_s11 + $0x310] sm:$0xff]  ;;  %v6348_v43 = vld [vmem:[%s9257_s29 + $0x8] sm:$0xff] }
 0x6e9   :  { %3841 = vmatprep.subr.bf16.mxu1 %v5195_v56  ;;  %3894 = vmatprep.subr.bf16.mxu0 %v5197_v25  ;;  %v3061_v23 = vld [vmem:[%s9235_s11 + $0x330] sm:$0xff]  ;;  %v3058_v56 = vld [vmem:[%s9235_s11 + $0x318] sm:$0xff]  ;;  %v8715_v0 = vpack.c.bf16 %v6348_v43, %v6347_v53 }
 0x6ea   :  { %v3062_v25 = vld [vmem:[%s9235_s11 + $0x338] sm:$0xff]  ;;  %v5259_v10 = vcombine.high %v3057_v47, %v3061_v23  ;;  %v5258_v52 = vcombine.low %v3057_v47, %v3061_v23  ;;  %v3966_v23 = vld [vmem:[#allocation7 + $0xc8] sm:$0xff] }
 0x6eb   :  { %v5261_v63 = vcombine.high %v3058_v56, %v3062_v25  ;;  %v5260_v55 = vcombine.low %v3058_v56, %v3062_v25  ;;  %v3970_v56 = vld [vmem:[#allocation7 + $0xe8] sm:$0xff]  ;;  %v6349_v25 = vld [vmem:[%s9257_s29 + $0x10] sm:$0xff]  ;;  %v3972_v53 = vld [vmem:[#allocation7 + $0xf8] sm:$0xff] }
 0x6ec   :  { %3842 = vmatpush1.bf16.msra.mxu1 %v5194_v59  ;;  %3895 = vmatpush1.bf16.msra.mxu0 %v5196_v50  ;;  %v3065_v59 = vld [vmem:[%s9235_s11 + $0x350] sm:$0xff] }
 0x6ed   :  { %3843 = vmatprep.subr.bf16.mxu1 %v5203_v45  ;;  %3896 = vmatprep.subr.bf16.mxu0 %v5205_v34  ;;  %v3069_v50 = vld [vmem:[%s9235_s11 + $0x370] sm:$0xff]  ;;  %v3066_v45 = vld [vmem:[%s9235_s11 + $0x358] sm:$0xff] }
 0x6ee   :  { %v3070_v34 = vld [vmem:[%s9235_s11 + $0x378] sm:$0xff]  ;;  %v5267_v62 = vcombine.high %v3065_v59, %v3069_v50  ;;  %v5266_v49 = vcombine.low %v3065_v59, %v3069_v50  ;;  %v3943_v59 = vld [vmem:[#allocation7 + $0x10] sm:$0xff] }
 0x6ef   :  { %v5269_v32 = vcombine.high %v3066_v45, %v3070_v34  ;;  %v5268_v28 = vcombine.low %v3066_v45, %v3070_v34  ;;  %v3947_v50 = vld [vmem:[#allocation7 + $0x30] sm:$0xff]  ;;  %v5312_v45 = vcombine.low %v3966_v23, %v3970_v56 }
 0x6f0   :  { %3844 = vmatpush1.bf16.msra.mxu1 %v5202_v33  ;;  %3897 = vmatpush1.bf16.msra.mxu0 %v5204_v14  ;;  %v3073_v33 = vld [vmem:[%s9235_s11 + $0x390] sm:$0xff]  ;;  %v5291_v34 = vcombine.high %v3943_v59, %v3947_v50 }
 0x6f1   :  { %3845 = vmatprep.subr.bf16.mxu1 %v5211_v4  ;;  %3898 = vmatprep.subr.bf16.mxu0 %v5213_v40  ;;  %v3077_v14 = vld [vmem:[%s9235_s11 + $0x3b0] sm:$0xff]  ;;  %v3074_v4 = vld [vmem:[%s9235_s11 + $0x398] sm:$0xff] }
 0x6f2   :  { %v3078_v40 = vld [vmem:[%s9235_s11 + $0x3b8] sm:$0xff]  ;;  %v5275_v37 = vcombine.high %v3073_v33, %v3077_v14  ;;  %v5274_v1 = vcombine.low %v3073_v33, %v3077_v14  ;;  %v4399_v33 = vld [vmem:[%s9237_s13 + $0x80] sm:$0xff]  ;;  %v4400_v14 = vld [vmem:[%s9237_s13 + $0x88] sm:$0xff] }
 0x6f3   :  { %v5277_v60 = vcombine.high %v3074_v4, %v3078_v40  ;;  %v5276_v6 = vcombine.low %v3074_v4, %v3078_v40  ;;  %v4383_v4 = vld [vmem:[%s9237_s13] sm:$0xff] }
 0x6f4   :  { %3846 = vmatpush1.bf16.msra.mxu1 %v5210_v15  ;;  %3899 = vmatpush1.bf16.msra.mxu0 %v5212_v22  ;;  %v3081_v15 = vld [vmem:[%s9235_s11 + $0x3d0] sm:$0xff] }
 0x6f5   :  { %3847 = vmatprep.subr.bf16.mxu1 %v5219_v26  ;;  %3900 = vmatprep.subr.bf16.mxu0 %v5221_v20  ;;  %v3085_v22 = vld [vmem:[%s9235_s11 + $0x3f0] sm:$0xff]  ;;  %v3082_v26 = vld [vmem:[%s9235_s11 + $0x3d8] sm:$0xff] }
 0x6f6   :  { %v3086_v20 = vld [vmem:[%s9235_s11 + $0x3f8] sm:$0xff]  ;;  %v5283_v30 = vcombine.high %v3081_v15, %v3085_v22 }
 0x6f7   :  { %v5285_v19 = vcombine.high %v3082_v26, %v3086_v20 }
 0x6f8   :  { %3848 = vmatpush1.bf16.msra.mxu1 %v5218_v2  ;;  %3901 = vmatpush1.bf16.msra.mxu0 %v5220_v17  ;;  %v3941_v2 = vld [vmem:[#allocation7] sm:$0xff] }
 0x6f9   :  { %3849 = vmatprep.subr.bf16.mxu1 %v5227_v3  ;;  %3902 = vmatprep.subr.bf16.mxu0 %v5229_v57  ;;  %v3945_v17 = vld [vmem:[#allocation7 + $0x20] sm:$0xff]  ;;  %v5282_v3 = vcombine.low %v3081_v15, %v3085_v22  ;;  %v5284_v57 = vcombine.low %v3082_v26, %v3086_v20  ;;  %v3963_v15 = vld [vmem:[#allocation7 + $0xb0] sm:$0xff] }
 0x6fa   :  { %v5287_v36 = vcombine.high %v3941_v2, %v3945_v17  ;;  %v5286_v7 = vcombine.low %v3941_v2, %v3945_v17  ;;  %v4385_v20 = vld [vmem:[%s9237_s13 + $0x10] sm:$0xff] }
 0x6fb   :  { %v3967_v17 = vld [vmem:[#allocation7 + $0xd0] sm:$0xff] }
 0x6fc   :  { %3850 = vmatpush1.bf16.msra.mxu1 %v5226_v9  ;;  %3903 = vmatpush1.bf16.msra.mxu0 %v5228_v24  ;;  %v5295_v9 = vcombine.high %v3949_v21, %v3953_v42  ;;  %v3957_v24 = vld [vmem:[#allocation7 + $0x80] sm:$0xff] }
 0x6fd   :  { %3851 = vmatprep.subr.bf16.mxu1 %v5235_v29  ;;  %3904 = vmatprep.subr.bf16.mxu0 %v5237_v12  ;;  %v3961_v29 = vld [vmem:[#allocation7 + $0xa0] sm:$0xff]  ;;  %v5294_v12 = vcombine.low %v3949_v21, %v3953_v42  ;;  %v4388_v42 = vld [vmem:[%s9237_s13 + $0x28] sm:$0xff] }
 0x6fe   :  { %v5303_v35 = vcombine.high %v3957_v24, %v3961_v29  ;;  %v5302_v48 = vcombine.low %v3957_v24, %v3961_v29  ;;  %v4387_v21 = vld [vmem:[%s9237_s13 + $0x20] sm:$0xff]  ;;  %v3944_v29 = vld [vmem:[#allocation7 + $0x18] sm:$0xff] }
 0x6ff   :  { %v6114_v24 = vpack.c.bf16 %v4388_v42, %v4387_v21  ;;  %v4413_v21 = vld [vmem:[%s9237_s13 + $0xf0] sm:$0xff]  ;;  %v4414_v42 = vld [vmem:[%s9237_s13 + $0xf8] sm:$0xff] }
 0x700   :  { %3852 = vmatpush1.bf16.msra.mxu1 %v5234_v38  ;;  %3905 = vmatpush1.bf16.msra.mxu0 %v5236_v51  ;;  %v5311_v38 = vcombine.high %v3965_v46, %v3969_v31  ;;  %v3946_v51 = vld [vmem:[#allocation7 + $0x28] sm:$0xff] }
 0x701   :  { %3853 = vmatprep.subr.bf16.mxu1 %v5243_v13  ;;  %3906 = vmatprep.subr.bf16.mxu0 %v5245_v54  ;;  %v3950_v54 = vld [vmem:[#allocation7 + $0x48] sm:$0xff] }
 0x704   :  { %3854 = vmatpush1.bf16.msra.mxu1 %v5242_v58  ;;  %3907 = vmatpush1.bf16.msra.mxu0 %v5244_v11  ;;  %v5297_v58 = vcombine.high %v3950_v54, %v3954_v18  ;;  %v3958_v11 = vld [vmem:[#allocation7 + $0x88] sm:$0xff] }
 0x705   :  { %3855 = vmatprep.subr.bf16.mxu1 %v5251_v44  ;;  %3908 = vmatprep.subr.bf16.mxu0 %v5253_v8  ;;  %v3962_v44 = vld [vmem:[#allocation7 + $0xa8] sm:$0xff]  ;;  %v5296_v8 = vcombine.low %v3950_v54, %v3954_v18  ;;  %v3968_v18 = vld [vmem:[#allocation7 + $0xd8] sm:$0xff] }
 0x706   :  { %v5305_v47 = vcombine.high %v3958_v11, %v3962_v44 }
 0x708   :  { %3856 = vmatpush1.bf16.msra.mxu1 %v5250_v61  ;;  %3909 = vmatpush1.bf16.msra.mxu0 %v5252_v27  ;;  %v6350_v61 = vld [vmem:[%s9257_s29 + $0x18] sm:$0xff] }
 0x709   :  { %3857 = vmatprep.subr.bf16.mxu1 %v5259_v10  ;;  %3910 = vmatprep.subr.bf16.mxu0 %v5261_v63  ;;  %v8726_v27 = vpack.c.bf16 %v6350_v61, %v6349_v25  ;;  %v5304_v10 = vcombine.low %v3958_v11, %v3962_v44  ;;  %v5313_v63 = vcombine.high %v3966_v23, %v3970_v56  ;;  %v4405_v11 = vld [vmem:[%s9237_s13 + $0xb0] sm:$0xff]  ;;  %v4406_v44 = vld [vmem:[%s9237_s13 + $0xb8] sm:$0xff]  ;;  %v4407_v23 = vld [vmem:[%s9237_s13 + $0xc0] sm:$0xff] }
 0x70a   :  { %v4408_v56 = vld [vmem:[%s9237_s13 + $0xc8] sm:$0xff]  ;;  %v4431_v25 = vld [vmem:[%s9237_s13 + $0x180] sm:$0xff] }
 0x70b   :  { %v6120_v61 = vpack.c.bf16 %v4408_v56, %v4407_v23  ;;  %v4444_v23 = vld [vmem:[%s9237_s13 + $0x1e8] sm:$0xff] }
 0x70c   :  { %3858 = vmatpush1.bf16.msra.mxu1 %v5258_v52  ;;  %3911 = vmatpush1.bf16.msra.mxu0 %v5260_v55  ;;  %v3951_v52 = vld [vmem:[#allocation7 + $0x50] sm:$0xff] }
 0x70d   :  { %3859 = vmatprep.subr.bf16.mxu1 %v5267_v62  ;;  %3912 = vmatprep.subr.bf16.mxu0 %v5269_v32  ;;  %v3955_v55 = vld [vmem:[#allocation7 + $0x70] sm:$0xff]  ;;  %v5290_v62 = vcombine.low %v3943_v59, %v3947_v50 }
 0x70e   :  { %v3959_v32 = vld [vmem:[#allocation7 + $0x90] sm:$0xff]  ;;  %v5299_v40 = vcombine.high %v3951_v52, %v3955_v55 }
 0x70f   :  { %v5307_v2 = vcombine.high %v3959_v32, %v3963_v15 }
 0x710   :  { %3860 = vmatpush1.bf16.msra.mxu1 %v5266_v49  ;;  %3913 = vmatpush1.bf16.msra.mxu0 %v5268_v28  ;;  %v6104_v49 = vpack.c.bf16 %v4400_v14, %v4399_v33  ;;  %v4384_v28 = vld [vmem:[%s9237_s13 + $0x8] sm:$0xff]  ;;  %v4434_v14 = vld [vmem:[%s9237_s13 + $0x198] sm:$0xff] }
 0x711   :  { %3861 = vmatprep.subr.bf16.mxu1 %v5275_v37  ;;  %3914 = vmatprep.subr.bf16.mxu0 %v5277_v60  ;;  %v4401_v37 = vld [vmem:[%s9237_s13 + $0x90] sm:$0xff]  ;;  %v4402_v60 = vld [vmem:[%s9237_s13 + $0x98] sm:$0xff]  ;;  %v6106_v22 = vpack.c.bf16 %v4384_v28, %v4383_v4 }
 0x712   :  { %v6108_v26 = vpack.c.bf16 %v4402_v60, %v4401_v37  ;;  %v4393_v4 = vld [vmem:[%s9237_s13 + $0x50] sm:$0xff]  ;;  %v4418_v60 = vld [vmem:[%s9237_s13 + $0x118] sm:$0xff] }
 0x713   :  { %v4417_v37 = vld [vmem:[%s9237_s13 + $0x110] sm:$0xff] }
 0x714   :  { %3862 = vmatpush1.bf16.msra.mxu1 %v5274_v1  ;;  %3915 = vmatpush1.bf16.msra.mxu0 %v5276_v6  ;;  %v4386_v1 = vld [vmem:[%s9237_s13 + $0x18] sm:$0xff]  ;;  %v4403_v6 = vld [vmem:[%s9237_s13 + $0xa0] sm:$0xff] }
 0x715   :  { %3863 = vmatprep.subr.bf16.mxu1 %v5283_v30  ;;  %3916 = vmatprep.subr.bf16.mxu0 %v5285_v19  ;;  %v4404_v30 = vld [vmem:[%s9237_s13 + $0xa8] sm:$0xff]  ;;  %v5298_v19 = vcombine.low %v3951_v52, %v3955_v55  ;;  %v4409_v55 = vld [vmem:[%s9237_s13 + $0xd0] sm:$0xff] }
 0x718   :  { %3864 = vmatpush1.bf16.msra.mxu1 %v5282_v3  ;;  %3917 = vmatpush1.bf16.msra.mxu0 %v5284_v57  ;;  %v6110_v3 = vpack.c.bf16 %v4386_v1, %v4385_v20  ;;  %v3971_v57 = vld [vmem:[#allocation7 + $0xf0] sm:$0xff]  ;;  %v4435_v20 = vld [vmem:[%s9237_s13 + $0x1a0] sm:$0xff] }
 0x719   :  { %4139 = vmatprep.subr.bf16.mxu1 %v5287_v36  ;;  %6105 = vmatprep.subr.bf16.mxu0 %v6104_v49  ;;  %v6112_v36 = vpack.c.bf16 %v4404_v30, %v4403_v6  ;;  %v4436_v6 = vld [vmem:[%s9237_s13 + $0x1a8] sm:$0xff]  ;;  %v4395_v30 = vld [vmem:[%s9237_s13 + $0x60] sm:$0xff] }
 0x71b   :  { %3866 = vmatmul.mubr.bf16.vlgmr.msra.gmra.mrb[52].mxu1 %v8518_v5  ;;  %3919 = vmatmul.mubr.bf16.vlgmr.msra.gmra.mrb[96].mxu0 %v8518_v5  ;;  %v3942_v5 = vld [vmem:[#allocation7 + $0x8] sm:$0xff] }
 0x71c   :  { %3875 = vmatprep.mubr.bf16.mxu1 %v8552_v39  ;;  %3928 = vmatprep.mubr.bf16.mxu0 %v8552_v39  ;;  %v5310_v39 = vcombine.low %v3965_v46, %v3969_v31  ;;  %v5289_v13 = vcombine.high %v3942_v5, %v3946_v51  ;;  %v3952_v31 = vld [vmem:[#allocation7 + $0x58] sm:$0xff] }
 0x71d   :  { %4140 = vmatpush1.bf16.msra.mxu1 %v5286_v7  ;;  %6107 = vmatpush3.bf16.msra.mxu0 %v6106_v22  ;;  %v5306_v7 = vcombine.low %v3959_v32, %v3963_v15  ;;  %v4433_v32 = vld [vmem:[%s9237_s13 + $0x190] sm:$0xff]  ;;  %v6142_v15 = vpack.c.bf16 %v4418_v60, %v4417_v37  ;;  %v4411_v22 = vld [vmem:[%s9237_s13 + $0xe0] sm:$0xff] }
 0x71e   :  { %4141 = vmatprep.subr.bf16.mxu1 %v5295_v9  ;;  %6109 = vmatprep.subr.bf16.mxu0 %v6108_v26  ;;  %v5315_v9 = vcombine.high %v3967_v17, %v3971_v57  ;;  %v6140_v49 = vpack.c.bf16 %v4434_v14, %v4433_v32  ;;  %v4412_v26 = vld [vmem:[%s9237_s13 + $0xe8] sm:$0xff] }
 0x71f   :  { %v6128_v1 = vpack.c.bf16 %v4412_v26, %v4411_v22 }
 0x721   :  { %4142 = vmatpush1.bf16.msra.mxu1 %v5294_v12  ;;  %6111 = vmatpush3.bf16.msra.mxu0 %v6110_v3  ;;  %v3948_v12 = vld [vmem:[#allocation7 + $0x38] sm:$0xff]  ;;  %v4419_v3 = vld [vmem:[%s9237_s13 + $0x120] sm:$0xff] }
 0x722   :  { %4143 = vmatprep.subr.bf16.mxu1 %v5303_v35  ;;  %6113 = vmatprep.subr.bf16.mxu0 %v6112_v36  ;;  %v5314_v35 = vcombine.low %v3967_v17, %v3971_v57  ;;  %v5293_v46 = vcombine.high %v3944_v29, %v3948_v12  ;;  %v4420_v57 = vld [vmem:[%s9237_s13 + $0x128] sm:$0xff] }
 0x723   :  { %3876 = vmatmul.mubr.bf16.gmra.mrb[56].mxu1 %v8541_v41  ;;  %3929 = vmatmul.mubr.bf16.gmra.mrb[100].mxu0 %v8541_v41  ;;  %v5288_v41 = vcombine.low %v3942_v5, %v3946_v51  ;;  %v3960_v51 = vld [vmem:[#allocation7 + $0x98] sm:$0xff]  ;;  %v6146_v36 = vpack.c.bf16 %v4420_v57, %v4419_v3 }
 0x724   :  { %4171 = vmatprep.mubr.bf16.mxu1 %v6552_v16 }
 0x725   :  { %4144 = vmatpush1.bf16.msra.mxu1 %v5302_v48  ;;  %6115 = vmatpush3.bf16.msra.mxu0 %v6114_v24  ;;  %v3956_v48 = vld [vmem:[#allocation7 + $0x78] sm:$0xff] }
 0x726   :  { %4145 = vmatprep.subr.bf16.mxu1 %v5311_v38  ;;  %v5292_v38 = vcombine.low %v3944_v29, %v3948_v12  ;;  %v5301_v5 = vcombine.high %v3952_v31, %v3956_v48  ;;  %v4438_v24 = vld [vmem:[%s9237_s13 + $0x1b8] sm:$0xff]  ;;  %v4397_v29 = vld [vmem:[%s9237_s13 + $0x70] sm:$0xff] }
 0x727   :  { %v4398_v12 = vld [vmem:[%s9237_s13 + $0x78] sm:$0xff] }
 0x729   :  { %4146 = vmatpush1.bf16.msra.mxu1 %v5310_v39  ;;  %v3964_v39 = vld [vmem:[#allocation7 + $0xb8] sm:$0xff] }
 0x72a   :  { %4192 = vmatprep.subr.bf16.mxu1 %v5289_v13  ;;  %v5300_v13 = vcombine.low %v3952_v31, %v3956_v48  ;;  %v5309_v54 = vcombine.high %v3960_v51, %v3964_v39  ;;  %v5308_v43 = vcombine.low %v3960_v51, %v3964_v39  ;;  %v4421_v31 = vld [vmem:[%s9237_s13 + $0x130] sm:$0xff]  ;;  %v4422_v48 = vld [vmem:[%s9237_s13 + $0x138] sm:$0xff]  ;;  %v4440_v51 = vld [vmem:[%s9237_s13 + $0x1c8] sm:$0xff] }
 0x72b   :  { %v4463_v39 = vld [vmem:[%s9237_s13 + $0x280] sm:$0xff] }
 0x72c   :  { %5318 = vmatmul.mubr.msk.bf16.vlgmr.msra.gmra.mrb[60].mxu1 %vm205_vm0, %v8715_v0 }
 0x72d   :  { %4193 = vmatpush1.bf16.msra.mxu1 %v5288_v41  ;;  %4181 = vmatprep.mubr.bf16.mxu1 %v6552_v16  ;;  %v5317_v41 = vcombine.high %v3968_v18, %v3972_v53 }
 0x72e   :  { %4194 = vmatprep.subr.bf16.mxu1 %v5297_v58  ;;  %v5316_v58 = vcombine.low %v3968_v18, %v3972_v53  ;;  %v4423_v18 = vld [vmem:[%s9237_s13 + $0x140] sm:$0xff]  ;;  %v4424_v53 = vld [vmem:[%s9237_s13 + $0x148] sm:$0xff] }
 0x731   :  { %4195 = vmatpush1.bf16.msra.mxu1 %v5296_v8  ;;  %v6116_v8 = vpack.c.bf16 %v4406_v44, %v4405_v11  ;;  %v4442_v11 = vld [vmem:[%s9237_s13 + $0x1d8] sm:$0xff] }
 0x732   :  { %4196 = vmatprep.subr.bf16.mxu1 %v5305_v47  ;;  %v4389_v47 = vld [vmem:[%s9237_s13 + $0x30] sm:$0xff] }
 0x733   :  { %6117 = vmatprep.subr.bf16.mxu0 %v6116_v8  ;;  %v4425_v8 = vld [vmem:[%s9237_s13 + $0x150] sm:$0xff] }
 0x734   :  { %5319 = vmatmul.mubr.msk.bf16.gmra.mrb[64].mxu1 %vm205_vm0, %v8726_v27 }
 0x735   :  { %4197 = vmatpush1.bf16.msra.mxu1 %v5304_v10  ;;  %4224 = vmatprep.mubr.bf16.mxu1 %v6552_v16  ;;  %v4391_v10 = vld [vmem:[%s9237_s13 + $0x40] sm:$0xff] }
 0x736   :  { %4198 = vmatprep.subr.bf16.mxu1 %v5313_v63  ;;  %v4392_v63 = vld [vmem:[%s9237_s13 + $0x48] sm:$0xff] }
 0x737   :  { %v6122_v50 = vpack.c.bf16 %v4392_v63, %v4391_v10  ;;  %v4445_v10 = vld [vmem:[%s9237_s13 + $0x1f0] sm:$0xff]  ;;  %v4446_v63 = vld [vmem:[%s9237_s13 + $0x1f8] sm:$0xff] }
 0x739   :  { %4199 = vmatpush1.bf16.msra.mxu1 %v5312_v45  ;;  %v4415_v45 = vld [vmem:[%s9237_s13 + $0x100] sm:$0xff] }
 0x73a   :  { %4245 = vmatprep.subr.bf16.mxu1 %v5291_v34  ;;  %v4416_v34 = vld [vmem:[%s9237_s13 + $0x108] sm:$0xff] }
 0x73b   :  { %v6138_v52 = vpack.c.bf16 %v4416_v34, %v4415_v45  ;;  %v4430_v45 = vld [vmem:[%s9237_s13 + $0x178] sm:$0xff] }
 0x73c   :  { %5320 = vmatmul.mubr.msk.bf16.vlgmr.msra.gmra.mrb[68].mxu1 %vm205_vm0, %v8715_v0 }
 0x73d   :  { %4246 = vmatpush1.bf16.msra.mxu1 %v5290_v62  ;;  %4234 = vmatprep.mubr.bf16.mxu1 %v6552_v16  ;;  %v4410_v62 = vld [vmem:[%s9237_s13 + $0xd8] sm:$0xff] }
 0x73e   :  { %4247 = vmatprep.subr.bf16.mxu1 %v5299_v40  ;;  %v6124_v33 = vpack.c.bf16 %v4410_v62, %v4409_v55  ;;  %v4394_v40 = vld [vmem:[%s9237_s13 + $0x58] sm:$0xff]  ;;  %v4496_v55 = vld [vmem:[%s9237_s13 + $0x388] sm:$0xff] }
 0x73f   :  { %v6126_v28 = vpack.c.bf16 %v4394_v40, %v4393_v4 }
 0x741   :  { %4248 = vmatpush1.bf16.msra.mxu1 %v5298_v19  ;;  %v4396_v19 = vld [vmem:[%s9237_s13 + $0x68] sm:$0xff] }
 0x742   :  { %4249 = vmatprep.subr.bf16.mxu1 %v5307_v2  ;;  %v6144_v2 = vpack.c.bf16 %v4436_v6, %v4435_v20  ;;  %v6130_v17 = vpack.c.bf16 %v4396_v19, %v4395_v30 }
 0x744   :  { %5321 = vmatmul.mubr.msk.bf16.gmra.mrb[72].mxu1 %vm205_vm0, %v8726_v27 }
 0x745   :  { %4250 = vmatpush1.bf16.msra.mxu1 %v5306_v7  ;;  %4277 = vmatprep.mubr.bf16.mxu1 %v6552_v16  ;;  %v4437_v7 = vld [vmem:[%s9237_s13 + $0x1b0] sm:$0xff] }
 0x746   :  { %4251 = vmatprep.subr.bf16.mxu1 %v5315_v9  ;;  %v6132_v9 = vpack.c.bf16 %v4414_v42, %v4413_v21 }
 0x749   :  { %4252 = vmatpush1.bf16.msra.mxu1 %v5314_v35  ;;  %v6148_v35 = vpack.c.bf16 %v4438_v24, %v4437_v7 }
 0x74a   :  { %4298 = vmatprep.subr.bf16.mxu1 %v5293_v46  ;;  %v6134_v46 = vpack.c.bf16 %v4398_v12, %v4397_v29 }
 0x74c   :  { %5322 = vmatmul.mubr.msk.bf16.vlgmr.msra.gmra.mrb[76].mxu1 %vm205_vm0, %v8715_v0 }
 0x74d   :  { %4299 = vmatpush1.bf16.msra.mxu1 %v5292_v38  ;;  %4287 = vmatprep.mubr.bf16.mxu1 %v6552_v16  ;;  %v6150_v38 = vpack.c.bf16 %v4422_v48, %v4421_v31  ;;  %v4447_v48 = vld [vmem:[%s9237_s13 + $0x200] sm:$0xff] }
 0x74e   :  { %4300 = vmatprep.subr.bf16.mxu1 %v5301_v5  ;;  %v4439_v5 = vld [vmem:[%s9237_s13 + $0x1c0] sm:$0xff] }
 0x751   :  { %4301 = vmatpush1.bf16.msra.mxu1 %v5300_v13  ;;  %v6152_v13 = vpack.c.bf16 %v4440_v51, %v4439_v5  ;;  %v4465_v51 = vld [vmem:[%s9237_s13 + $0x290] sm:$0xff] }
 0x752   :  { %4302 = vmatprep.subr.bf16.mxu1 %v5309_v54  ;;  %v4464_v54 = vld [vmem:[%s9237_s13 + $0x288] sm:$0xff] }
 0x754   :  { %5323 = vmatmul.mubr.msk.bf16.gmra.mrb[80].mxu1 %vm205_vm0, %v8726_v27 }
 0x755   :  { %4303 = vmatpush1.bf16.msra.mxu1 %v5308_v43  ;;  %4330 = vmatprep.mubr.bf16.mxu1 %v6552_v16  ;;  %v6168_v43 = vpack.c.bf16 %v4464_v54, %v4463_v39  ;;  %v4466_v39 = vld [vmem:[%s9237_s13 + $0x298] sm:$0xff] }
 0x756   :  { %4304 = vmatprep.subr.bf16.mxu1 %v5317_v41  ;;  %v6154_v41 = vpack.c.bf16 %v4424_v53, %v4423_v18 }
 0x759   :  { %4305 = vmatpush1.bf16.msra.mxu1 %v5316_v58  ;;  %v4441_v58 = vld [vmem:[%s9237_s13 + $0x1d0] sm:$0xff] }
 0x75a   :  { %v6156_v44 = vpack.c.bf16 %v4442_v11, %v4441_v58  ;;  %v6172_v11 = vpack.c.bf16 %v4466_v39, %v4465_v51  ;;  %v4480_v39 = vld [vmem:[%s9237_s13 + $0x308] sm:$0xff] }
 0x75c   :  { %5324 = vmatmul.mubr.msk.bf16.vlgmr.msra.gmra.mrb[84].mxu1 %vm205_vm0, %v8715_v0 }
 0x75d   :  { %4340 = vmatprep.mubr.bf16.mxu1 %v6552_v16  ;;  %v4390_v16 = vld [vmem:[%s9237_s13 + $0x38] sm:$0xff] }
 0x75e   :  { %v6118_v0 = vpack.c.bf16 %v4390_v16, %v4389_v47  ;;  %v4426_v47 = vld [vmem:[%s9237_s13 + $0x158] sm:$0xff] }
 0x75f   :  { %v6158_v16 = vpack.c.bf16 %v4426_v47, %v4425_v8  ;;  %v4450_v8 = vld [vmem:[%s9237_s13 + $0x218] sm:$0xff] }
 0x760   :  { %6119 = vmatpush3.bf16.msra.mxu0 %v6118_v0  ;;  %v4443_v0 = vld [vmem:[%s9237_s13 + $0x1e0] sm:$0xff] }
 0x761   :  { %6121 = vmatprep.subr.bf16.mxu0 %v6120_v61  ;;  %v6160_v56 = vpack.c.bf16 %v4444_v23, %v4443_v0  ;;  %v4428_v61 = vld [vmem:[%s9237_s13 + $0x168] sm:$0xff] }
 0x762   :  { %v4468_v0 = vld [vmem:[%s9237_s13 + $0x2a8] sm:$0xff] }
 0x764   :  { %5325 = vmatmul.mubr.msk.bf16.gmra.mrb[88].mxu1 %vm205_vm0, %v8726_v27  ;;  %v4432_v27 = vld [vmem:[%s9237_s13 + $0x188] sm:$0xff]  ;;  %6123 = vmatpush3.bf16.msra.mxu0 %v6122_v50  ;;  %v4429_v50 = vld [vmem:[%s9237_s13 + $0x170] sm:$0xff] }
 0x765   :  { %v6136_v59 = vpack.c.bf16 %v4432_v27, %v4431_v25  ;;  %6125 = vmatprep.subr.bf16.mxu0 %v6124_v33  ;;  %v4427_v25 = vld [vmem:[%s9237_s13 + $0x160] sm:$0xff]  ;;  %v6166_v34 = vpack.c.bf16 %v4430_v45, %v4429_v50 }
 0x766   :  { %v6162_v27 = vpack.c.bf16 %v4428_v61, %v4427_v25  ;;  %v4451_v25 = vld [vmem:[%s9237_s13 + $0x220] sm:$0xff]  ;;  %v4452_v61 = vld [vmem:[%s9237_s13 + $0x228] sm:$0xff] }
 0x767   :  { %6137 = vmatprep.subr.bf16.mxu1 %v6136_v59  ;;  %v6164_v59 = vpack.c.bf16 %v4446_v63, %v4445_v10  ;;  %v4469_v10 = vld [vmem:[%s9237_s13 + $0x2b0] sm:$0xff]  ;;  %v4470_v63 = vld [vmem:[%s9237_s13 + $0x2b8] sm:$0xff] }
 0x768   :  { %6139 = vmatpush3.bf16.msra.mxu1 %v6138_v52  ;;  %6127 = vmatpush3.bf16.msra.mxu0 %v6126_v28  ;;  %v4495_v52 = vld [vmem:[%s9237_s13 + $0x380] sm:$0xff] }
 0x769   :  { %6141 = vmatprep.subr.bf16.mxu1 %v6140_v49  ;;  %6129 = vmatprep.subr.bf16.mxu0 %v6128_v1  ;;  %v6200_v62 = vpack.c.bf16 %v4496_v55, %v4495_v52  ;;  %v6178_v52 = vpack.c.bf16 %v4452_v61, %v4451_v25  ;;  %v4482_v25 = vld [vmem:[%s9237_s13 + $0x318] sm:$0xff]  ;;  %v4475_v61 = vld [vmem:[%s9237_s13 + $0x2e0] sm:$0xff] }
 0x76c   :  { %6143 = vmatpush3.bf16.msra.mxu1 %v6142_v15  ;;  %6131 = vmatpush3.bf16.msra.mxu0 %v6130_v17 }
 0x76d   :  { %6145 = vmatprep.subr.bf16.mxu1 %v6144_v2  ;;  %6133 = vmatprep.subr.bf16.mxu0 %v6132_v9 }
 0x770   :  { %6147 = vmatpush3.bf16.msra.mxu1 %v6146_v36  ;;  %6135 = vmatpush3.bf16.msra.mxu0 %v6134_v46 }
 0x771   :  { %6149 = vmatprep.subr.bf16.mxu1 %v6148_v35  ;;  %6169 = vmatprep.subr.bf16.mxu0 %v6168_v43 }
 0x774   :  { %6151 = vmatpush3.bf16.msra.mxu1 %v6150_v38  ;;  %v4448_v38 = vld [vmem:[%s9237_s13 + $0x208] sm:$0xff] }
 0x775   :  { %6153 = vmatprep.subr.bf16.mxu1 %v6152_v13  ;;  %v6170_v43 = vpack.c.bf16 %v4448_v38, %v4447_v48  ;;  %v4455_v38 = vld [vmem:[%s9237_s13 + $0x240] sm:$0xff] }
 0x778   :  { %6155 = vmatpush3.bf16.msra.mxu1 %v6154_v41 }
 0x779   :  { %6157 = vmatprep.subr.bf16.mxu1 %v6156_v44  ;;  %v4449_v44 = vld [vmem:[%s9237_s13 + $0x210] sm:$0xff] }
 0x77a   :  { %v6174_v23 = vpack.c.bf16 %v4450_v8, %v4449_v44 }
 0x77c   :  { %6159 = vmatpush3.bf16.msra.mxu1 %v6158_v16  ;;  %v4467_v16 = vld [vmem:[%s9237_s13 + $0x2a0] sm:$0xff] }
 0x77d   :  { %6161 = vmatprep.subr.bf16.mxu1 %v6160_v56  ;;  %v6176_v56 = vpack.c.bf16 %v4468_v0, %v4467_v16  ;;  %v4457_v0 = vld [vmem:[%s9237_s13 + $0x250] sm:$0xff] }
 0x780   :  { %6163 = vmatpush3.bf16.msra.mxu1 %v6162_v27 }
 0x781   :  { %6165 = vmatprep.subr.bf16.mxu1 %v6164_v59 }
 0x784   :  { %6167 = vmatpush3.bf16.msra.mxu1 %v6166_v34 }
 0x785   :  { %6201 = vmatprep.subr.bf16.mxu1 %v6200_v62 }
 0x7ae   :  { %v3761_v32 = vpop.f32.mrb[44].mxu1  ;;  %v8952_v33 = vpop.f32.mrb[88].mxu0 }
 0x7af   :  { %v3763_v14 = vpop.f32.mrb[45].mxu1  ;;  %v8954_v4 = vpop.f32.mrb[89].mxu0 }
 0x7b0   :  { %v3765_v40 = vpop.f32.mrb[46].mxu1  ;;  %v8956_v49 = vpop.f32.mrb[90].mxu0 }
 0x7b1   :  { %v3767_v28 = vpop.f32.mrb[47].mxu1  ;;  %v8958_v37 = vpop.f32.mrb[91].mxu0 }
 0x7b6   :  { %v3771_v60 = vpop.f32.mrb[48].mxu1  ;;  %v8960_v15 = vpop.f32.mrb[92].mxu0 }
 0x7b7   :  { %v3773_v22 = vpop.f32.mrb[49].mxu1  ;;  %v8962_v26 = vpop.f32.mrb[93].mxu0 }
 0x7b8   :  { %v3775_v20 = vpop.f32.mrb[50].mxu1  ;;  %v8964_v1 = vpop.f32.mrb[94].mxu0 }
 0x7b9   :  { %v3777_v6 = vpop.f32.mrb[51].mxu1  ;;  %v8966_v30 = vpop.f32.mrb[95].mxu0 }
 0x7ee   :  { %v8968_v19 = vpop.f32.mrb[52].mxu1  ;;  %v8970_v2 = vpop.f32.mrb[96].mxu0 }
 0x7ef   :  { %v8972_v17 = vpop.f32.mrb[53].mxu1  ;;  %v8974_v3 = vpop.f32.mrb[97].mxu0 }
 0x7f0   :  { %v8976_v57 = vpop.f32.mrb[54].mxu1  ;;  %v8978_v36 = vpop.f32.mrb[98].mxu0 }
 0x7f1   :  { %v8980_v21 = vpop.f32.mrb[55].mxu1  ;;  %v8982_v42 = vpop.f32.mrb[99].mxu0 }
 0x7f6   :  { %v8984_v7 = vpop.f32.mrb[56].mxu1  ;;  %v8986_v9 = vpop.f32.mrb[100].mxu0 }
 0x7f7   :  { %v8988_v24 = vpop.f32.mrb[57].mxu1  ;;  %v8990_v29 = vpop.f32.mrb[101].mxu0 }
 0x7f8   :  { %v8992_v12 = vpop.f32.mrb[58].mxu1  ;;  %v8994_v35 = vpop.f32.mrb[102].mxu0 }
 0x7f9   :  { %v8996_v46 = vpop.f32.mrb[59].mxu1  ;;  %v8998_v31 = vpop.f32.mrb[103].mxu0 }
 0x7ff   :  { %v4173_v5 = vpop.f32.mrb[60].mxu1 }
 0x800   :  { %v4351_v13 = vmul.f32 %v4173_v5, %v3761_v32  ;;  %v4175_v54 = vpop.f32.mrb[61].mxu1  ;;  %v6180_v32 = vpack.c.bf16 %v4470_v63, %v4469_v10  ;;  %v4479_v5 = vld [vmem:[%s9237_s13 + $0x300] sm:$0xff] }
 0x801   :  { %v4352_v18 = vmul.f32 %v4175_v54, %v3763_v14  ;;  %v4177_v53 = vpop.f32.mrb[62].mxu1  ;;  %v4453_v14 = vld [vmem:[%s9237_s13 + $0x230] sm:$0xff]  ;;  %v4474_v54 = vld [vmem:[%s9237_s13 + $0x2d8] sm:$0xff]  ;;  %v4499_v10 = vld [vmem:[%s9237_s13 + $0x3a0] sm:$0xff] }
 0x802   :  { %v4359_v41 = vmul.f32 %v4177_v53, %v3765_v40  ;;  %v4179_v58 = vpop.f32.mrb[63].mxu1  ;;  %v4454_v40 = vld [vmem:[%s9237_s13 + $0x238] sm:$0xff] }
 0x803   :  { %v4360_v47 = vmul.f32 %v4179_v58, %v3767_v28  ;;  %4575 = vmatprep.mubr.f32.mxu0 %v4352_v18 }
 0x804   :  { %4576 = vmatmul.mubr.f32.vlgmr.msra.gmra.mrb[104].mxu0 %v4351_v13  ;;  %v4473_v13 = vld [vmem:[%s9237_s13 + $0x2d0] sm:$0xff] }
 0x805   :  { %4580 = vmatprep.mubr.f32.mxu0 %v4360_v47  ;;  %6171 = vmatpush3.bf16.msra.mxu0 %v6170_v43  ;;  %v4497_v43 = vld [vmem:[%s9237_s13 + $0x390] sm:$0xff]  ;;  %v6188_v16 = vpack.c.bf16 %v4474_v54, %v4473_v13  ;;  %v4462_v54 = vld [vmem:[%s9237_s13 + $0x278] sm:$0xff] }
 0x806   :  { %6173 = vmatprep.subr.bf16.mxu0 %v6172_v11  ;;  %v4461_v13 = vld [vmem:[%s9237_s13 + $0x270] sm:$0xff] }
 0x807   :  { %v4183_v27 = vpop.f32.mrb[64].mxu1 }
 0x808   :  { %v4367_v59 = vmul.f32 %v4183_v27, %v3771_v60  ;;  %v4185_v50 = vpop.f32.mrb[65].mxu1  ;;  %4581 = vmatmul.mubr.f32.gmra.mrb[106].mxu0 %v4359_v41  ;;  %v4471_v60 = vld [vmem:[%s9237_s13 + $0x2c0] sm:$0xff]  ;;  %v4498_v41 = vld [vmem:[%s9237_s13 + $0x398] sm:$0xff]  ;;  %v4476_v27 = vld [vmem:[%s9237_s13 + $0x2e8] sm:$0xff] }
 0x809   :  { %v4368_v45 = vmul.f32 %v4185_v50, %v3773_v22  ;;  %v4187_v34 = vpop.f32.mrb[66].mxu1  ;;  %6175 = vmatpush3.bf16.msra.mxu0 %v6174_v23  ;;  %v4472_v22 = vld [vmem:[%s9237_s13 + $0x2c8] sm:$0xff]  ;;  %v4458_v23 = vld [vmem:[%s9237_s13 + $0x258] sm:$0xff]  ;;  %v6192_v50 = vpack.c.bf16 %v4476_v27, %v4475_v61 }
 0x80a   :  { %v4375_v55 = vmul.f32 %v4187_v34, %v3775_v20  ;;  %v4189_v62 = vpop.f32.mrb[67].mxu1  ;;  %6177 = vmatprep.subr.bf16.mxu0 %v6176_v56  ;;  %v6182_v20 = vpack.c.bf16 %v4454_v40, %v4453_v14  ;;  %v6184_v48 = vpack.c.bf16 %v4472_v22, %v4471_v60  ;;  %v6190_v63 = vpack.c.bf16 %v4458_v23, %v4457_v0  ;;  %v4460_v34 = vld [vmem:[%s9237_s13 + $0x268] sm:$0xff]  ;;  %v4477_v14 = vld [vmem:[%s9237_s13 + $0x2f0] sm:$0xff]  ;;  %v4478_v40 = vld [vmem:[%s9237_s13 + $0x2f8] sm:$0xff] }
 0x80b   :  { %v4376_v28 = vmul.f32 %v4189_v62, %v3777_v6  ;;  %4585 = vmatprep.mubr.f32.mxu0 %v4368_v45  ;;  %v4456_v6 = vld [vmem:[%s9237_s13 + $0x248] sm:$0xff]  ;;  %v4459_v45 = vld [vmem:[%s9237_s13 + $0x260] sm:$0xff]  ;;  %v4501_v22 = vld [vmem:[%s9237_s13 + $0x3b0] sm:$0xff] }
 0x80c   :  { %4586 = vmatmul.mubr.f32.gmra.mrb[108].mxu0 %v4367_v59  ;;  %v6186_v44 = vpack.c.bf16 %v4456_v6, %v4455_v38  ;;  %v6194_v6 = vpack.c.bf16 %v4460_v34, %v4459_v45  ;;  %v4505_v0 = vld [vmem:[%s9237_s13 + $0x3d0] sm:$0xff]  ;;  %v4506_v23 = vld [vmem:[%s9237_s13 + $0x3d8] sm:$0xff]  ;;  %v4492_v45 = vld [vmem:[%s9237_s13 + $0x368] sm:$0xff] }
 0x80d   :  { %4590 = vmatprep.mubr.f32.mxu0 %v4376_v28  ;;  %6179 = vmatpush3.bf16.msra.mxu0 %v6178_v52  ;;  %v4483_v52 = vld [vmem:[%s9237_s13 + $0x320] sm:$0xff]  ;;  %v6220_v27 = vpack.c.bf16 %v4506_v23, %v4505_v0 }
 0x80e   :  { %6181 = vmatprep.subr.bf16.mxu0 %v6180_v32  ;;  %v4484_v32 = vld [vmem:[%s9237_s13 + $0x328] sm:$0xff] }
 0x80f   :  { %v4226_v51 = vpop.f32.mrb[68].mxu1 }
 0x810   :  { %v4353_v18 = vmul.f32 %v4226_v51, %v8952_v33  ;;  %v4228_v53 = vpop.f32.mrb[69].mxu1  ;;  %4591 = vmatmul.mubr.f32.gmra.mrb[110].mxu0 %v4375_v55  ;;  %v6202_v33 = vpack.c.bf16 %v4480_v39, %v4479_v5  ;;  %v6196_v39 = vpack.c.bf16 %v4478_v40, %v4477_v14 }
 0x811   :  { %v4354_v58 = vmul.f32 %v4228_v53, %v8954_v4  ;;  %v4230_v11 = vpop.f32.mrb[70].mxu1  ;;  %6183 = vmatpush3.bf16.msra.mxu0 %v6182_v20  ;;  %v4481_v4 = vld [vmem:[%s9237_s13 + $0x310] sm:$0xff]  ;;  %v4502_v20 = vld [vmem:[%s9237_s13 + $0x3b8] sm:$0xff] }
 0x812   :  { %v4361_v8 = vmul.f32 %v4230_v11, %v8956_v49  ;;  %v4232_v47 = vpop.f32.mrb[71].mxu1  ;;  %6185 = vmatprep.subr.bf16.mxu0 %v6184_v48  ;;  %v6204_v49 = vpack.c.bf16 %v4498_v41, %v4497_v43  ;;  %v6206_v59 = vpack.c.bf16 %v4482_v25, %v4481_v4  ;;  %v4486_v53 = vld [vmem:[%s9237_s13 + $0x338] sm:$0xff]  ;;  %v4503_v43 = vld [vmem:[%s9237_s13 + $0x3c0] sm:$0xff]  ;;  %v6198_v41 = vpack.c.bf16 %v4462_v54, %v4461_v13 }
 0x813   :  { %v4362_v56 = vmul.f32 %v4232_v47, %v8958_v37  ;;  %4660 = vmatprep.mubr.f32.mxu1 %v4354_v58  ;;  %v4500_v37 = vld [vmem:[%s9237_s13 + $0x3a8] sm:$0xff] }
 0x814   :  { %4661 = vmatmul.mubr.f32.vlgmr.msra.gmra.mrb[92].mxu1 %v4353_v18  ;;  %v6208_v62 = vpack.c.bf16 %v4500_v37, %v4499_v10  ;;  %v6212_v18 = vpack.c.bf16 %v4502_v20, %v4501_v22  ;;  %v4488_v47 = vld [vmem:[%s9237_s13 + $0x348] sm:$0xff]  ;;  %v4489_v10 = vld [vmem:[%s9237_s13 + $0x350] sm:$0xff] }
 0x815   :  { %4665 = vmatprep.mubr.f32.mxu1 %v4362_v56  ;;  %6187 = vmatpush3.bf16.msra.mxu0 %v6186_v44  ;;  %v4493_v20 = vld [vmem:[%s9237_s13 + $0x370] sm:$0xff] }
 0x816   :  { %6203 = vmatpush3.bf16.msra.mxu1 %v6202_v33  ;;  %6189 = vmatprep.subr.bf16.mxu0 %v6188_v16 }
 0x817   :  { %v4236_v55 = vpop.f32.mrb[72].mxu1  ;;  %6205 = vmatprep.subr.bf16.mxu1 %v6204_v49 }
 0x818   :  { %v4369_v28 = vmul.f32 %v4236_v55, %v8960_v15  ;;  %v4238_v60 = vpop.f32.mrb[73].mxu1  ;;  %4666 = vmatmul.mubr.f32.gmra.mrb[94].mxu1 %v4361_v8  ;;  %v6210_v15 = vpack.c.bf16 %v4484_v32, %v4483_v52  ;;  %v4487_v8 = vld [vmem:[%s9237_s13 + $0x340] sm:$0xff]  ;;  %v4509_v55 = vld [vmem:[%s9237_s13 + $0x3f0] sm:$0xff] }
 0x819   :  { %v4370_v48 = vmul.f32 %v4238_v60, %v8962_v26  ;;  %v4240_v38 = vpop.f32.mrb[74].mxu1  ;;  %6191 = vmatpush3.bf16.msra.mxu0 %v6190_v63  ;;  %v6218_v61 = vpack.c.bf16 %v4488_v47, %v4487_v8 }
 0x81a   :  { %v4377_v5 = vmul.f32 %v4240_v38, %v8964_v1  ;;  %6207 = vmatpush3.bf16.msra.mxu1 %v6206_v59  ;;  %v4242_v51 = vpop.f32.mrb[75].mxu1  ;;  %6193 = vmatprep.subr.bf16.mxu0 %v6192_v50  ;;  %v4485_v1 = vld [vmem:[%s9237_s13 + $0x330] sm:$0xff]  ;;  %v4491_v50 = vld [vmem:[%s9237_s13 + $0x360] sm:$0xff] }
 0x81b   :  { %v4378_v26 = vmul.f32 %v4242_v51, %v8966_v30  ;;  %4670 = vmatprep.mubr.f32.mxu1 %v4370_v48  ;;  %6209 = vmatprep.subr.bf16.mxu1 %v6208_v62  ;;  %v4504_v30 = vld [vmem:[%s9237_s13 + $0x3c8] sm:$0xff]  ;;  %v6214_v58 = vpack.c.bf16 %v4486_v53, %v4485_v1  ;;  %v4510_v62 = vld [vmem:[%s9237_s13 + $0x3f8] sm:$0xff]  ;;  %v6226_v60 = vpack.c.bf16 %v4492_v45, %v4491_v50 }
 0x81c   :  { %4671 = vmatmul.mubr.f32.gmra.mrb[96].mxu1 %v4369_v28  ;;  %v6216_v44 = vpack.c.bf16 %v4504_v30, %v4503_v43  ;;  %v6228_v22 = vpack.c.bf16 %v4510_v62, %v4509_v55  ;;  %v4494_v48 = vld [vmem:[%s9237_s13 + $0x378] sm:$0xff]  ;;  %v4852_v53 = vld [vmem:[#allocation13 + $0x8] sm:$0xff] }
 0x81d   :  { %4675 = vmatprep.mubr.f32.mxu1 %v4378_v26  ;;  %6195 = vmatpush3.bf16.msra.mxu0 %v6194_v6  ;;  %v4854_v30 = vld [vmem:[#allocation13 + $0x18] sm:$0xff] }
 0x81e   :  { %6211 = vmatpush3.bf16.msra.mxu1 %v6210_v15  ;;  %6197 = vmatprep.subr.bf16.mxu0 %v6196_v39 }
 0x81f   :  { %v4279_v11 = vpop.f32.mrb[76].mxu1  ;;  %6213 = vmatprep.subr.bf16.mxu1 %v6212_v18 }
 0x820   :  { %v4355_v33 = vmul.f32 %v4279_v11, %v8968_v19  ;;  %v4281_v16 = vpop.f32.mrb[77].mxu1  ;;  %4676 = vmatmul.mubr.f32.gmra.mrb[98].mxu1 %v4377_v5  ;;  %v4858_v11 = vld [vmem:[#allocation13 + $0x38] sm:$0xff] }
 0x821   :  { %v4356_v4 = vmul.f32 %v4281_v16, %v8972_v17  ;;  %v4283_v56 = vpop.f32.mrb[78].mxu1  ;;  %6199 = vmatpush3.bf16.msra.mxu0 %v6198_v41  ;;  %v4490_v17 = vld [vmem:[%s9237_s13 + $0x358] sm:$0xff]  ;;  %v4856_v41 = vld [vmem:[#allocation13 + $0x28] sm:$0xff] }
 0x822   :  { %v4363_v49 = vmul.f32 %v4283_v56, %v8976_v57  ;;  %6215 = vmatpush3.bf16.msra.mxu1 %v6214_v58  ;;  %v4285_v25 = vpop.f32.mrb[79].mxu1  ;;  %v4507_v57 = vld [vmem:[%s9237_s13 + $0x3e0] sm:$0xff]  ;;  %v6222_v37 = vpack.c.bf16 %v4490_v17, %v4489_v10  ;;  %v4857_v58 = vld [vmem:[#allocation13 + $0x30] sm:$0xff] }
 0x823   :  { %v4364_v19 = vmul.f32 %v4285_v25, %v8980_v21  ;;  %4745 = vmatprep.mubr.f32.mxu0 %v4356_v4  ;;  %6217 = vmatprep.subr.bf16.mxu1 %v6216_v44  ;;  %v4508_v21 = vld [vmem:[%s9237_s13 + $0x3e8] sm:$0xff]  ;;  %v6244_v44 = vpack.c.bf16 %v4858_v11, %v4857_v58 }
 0x824   :  { %4746 = vmatmul.mubr.f32.vlgmr.msra.gmra.mrb[112].mxu0 %v4355_v33  ;;  %v6224_v59 = vpack.c.bf16 %v4508_v21, %v4507_v57 }
 0x825   :  { %4750 = vmatprep.mubr.f32.mxu0 %v4364_v19 }
 0x826   :  { %6219 = vmatpush3.bf16.msra.mxu1 %v6218_v61 }
 0x827   :  { %v4289_v63 = vpop.f32.mrb[80].mxu1  ;;  %6221 = vmatprep.subr.bf16.mxu1 %v6220_v27 }
 0x828   :  { %v4371_v34 = vmul.f32 %v4289_v63, %v8984_v7  ;;  %v4291_v52 = vpop.f32.mrb[81].mxu1  ;;  %4751 = vmatmul.mubr.f32.gmra.mrb[114].mxu0 %v4363_v49 }
 0x829   :  { %v4372_v32 = vmul.f32 %v4291_v52, %v8988_v24  ;;  %v4293_v14 = vpop.f32.mrb[82].mxu1  ;;  %v6230_v24 = vpack.c.bf16 %v4494_v48, %v4493_v20 }
 0x82a   :  { %v4379_v40 = vmul.f32 %v4293_v14, %v8992_v12  ;;  %6223 = vmatpush3.bf16.msra.mxu1 %v6222_v37  ;;  %v4295_v28 = vpop.f32.mrb[83].mxu1 }
 0x82b   :  { %v4380_v7 = vmul.f32 %v4295_v28, %v8996_v46  ;;  %4755 = vmatprep.mubr.f32.mxu0 %v4372_v32  ;;  %6225 = vmatprep.subr.bf16.mxu1 %v6224_v59 }
 0x82c   :  { %4756 = vmatmul.mubr.f32.gmra.mrb[116].mxu0 %v4371_v34 }
 0x82d   :  { %4760 = vmatprep.mubr.f32.mxu0 %v4380_v7 }
 0x82e   :  { %6227 = vmatpush3.bf16.msra.mxu1 %v6226_v60 }
 0x82f   :  { %v4332_v12 = vpop.f32.mrb[84].mxu1  ;;  %6229 = vmatprep.subr.bf16.mxu1 %v6228_v22 }
 0x830   :  { %v4357_v38 = vmul.f32 %v4332_v12, %v8970_v2  ;;  %v4334_v46 = vpop.f32.mrb[85].mxu1  ;;  %4761 = vmatmul.mubr.f32.gmra.mrb[118].mxu0 %v4379_v40 }
 0x831   :  { %v4358_v6 = vmul.f32 %v4334_v46, %v8974_v3  ;;  %v4336_v5 = vpop.f32.mrb[86].mxu1 }
 0x832   :  { %v4365_v51 = vmul.f32 %v4336_v5, %v8978_v36  ;;  %6231 = vmatpush3.bf16.msra.mxu1 %v6230_v24  ;;  %v4338_v15 = vpop.f32.mrb[87].mxu1 }
 0x833   :  { %v4366_v39 = vmul.f32 %v4338_v15, %v8982_v42  ;;  %4830 = vmatprep.mubr.f32.mxu1 %v4358_v6  ;;  %v4851_v42 = vld [vmem:[#allocation13] sm:$0xff] }
 0x834   :  { %v6232_v43 = vpack.c.bf16 %v4852_v53, %v4851_v42 }
 0x835   :  { %4831 = vmatmul.mubr.f32.vlgmr.msra.gmra.mrb[100].mxu1 %v4357_v38 }
 0x836   :  { %4835 = vmatprep.mubr.f32.mxu1 %v4366_v39  ;;  %6233 = vmatprep.subr.bf16.mxu0 %v6232_v43 }
 0x837   :  { %v4342_v13 = vpop.f32.mrb[88].mxu1  ;;  %6248 = vmatprep.subr.bf16.mxu1 %v6232_v43  ;;  %6235 = vmatpush3.bf16.msra.mxu0 %v6232_v43 }
 0x838   :  { %v4373_v54 = vmul.f32 %v4342_v13, %v8986_v9  ;;  %v4344_v26 = vpop.f32.mrb[89].mxu1  ;;  %v4853_v9 = vld [vmem:[#allocation13 + $0x10] sm:$0xff]  ;;  %6252 = vmatpush3.bf16.msra.mxu1 %v6232_v43 }
 0x839   :  { %v4374_v2 = vmul.f32 %v4344_v26, %v8990_v29  ;;  %4836 = vmatmul.mubr.f32.gmra.mrb[102].mxu1 %v4365_v51  ;;  %v4346_v18 = vpop.f32.mrb[90].mxu1  ;;  %v6236_v29 = vpack.c.bf16 %v4854_v30, %v4853_v9 }
 0x83a   :  { %v4381_v3 = vmul.f32 %v4346_v18, %v8994_v35  ;;  %v4348_v1 = vpop.f32.mrb[91].mxu1  ;;  %v4855_v35 = vld [vmem:[#allocation13 + $0x20] sm:$0xff] }
 0x83b   :  { %v4382_v36 = vmul.f32 %v4348_v1, %v8998_v31  ;;  %4840 = vmatprep.mubr.f32.mxu1 %v4374_v2  ;;  %6237 = vmatprep.subr.bf16.mxu0 %v6236_v29  ;;  %v6240_v31 = vpack.c.bf16 %v4856_v41, %v4855_v35 }
 0x83c   :  { %6249 = vmatprep.subr.bf16.mxu1 %v6236_v29  ;;  %6239 = vmatpush3.bf16.msra.mxu0 %v6236_v29 }
 0x83d   :  { %4841 = vmatmul.mubr.f32.gmra.mrb[104].mxu1 %v4373_v54  ;;  %6241 = vmatprep.subr.bf16.mxu0 %v6240_v31 }
 0x83e   :  { %4845 = vmatprep.mubr.f32.mxu1 %v4382_v36  ;;  %6253 = vmatpush3.bf16.msra.mxu1 %v6236_v29 }
 0x83f   :  { %6250 = vmatprep.subr.bf16.mxu1 %v6240_v31 }
 0x840   :  { %6243 = vmatpush3.bf16.msra.mxu0 %v6240_v31 }
 0x841   :  { %4846 = vmatmul.mubr.f32.gmra.mrb[106].mxu1 %v4381_v3  ;;  %6245 = vmatprep.subr.bf16.mxu0 %v6244_v44 }
 0x842   :  { %6254 = vmatpush3.bf16.msra.mxu1 %v6240_v31 }
 0x843   :  { %6251 = vmatprep.subr.bf16.mxu1 %v6244_v44 }
 0x844   :  { %6247 = vmatpush3.bf16.msra.mxu0 %v6244_v44 }
 0x846   :  { %6255 = vmatpush3.bf16.msra.mxu1 %v6244_v44 }
 0x8d7   :  { %v5562_v8 = vpop.f32.mrb[104].mxu0 }
 0x8d8   :  { %v5563_v47 = vpop.f32.mrb[105].mxu0 }
 0x8d9   :  { %v5564_v33 = vadd.f32 %v5563_v47, %v5562_v8 }
 0x8db   :  { %v5565_v16 = vpop.f32.mrb[106].mxu0 }
 0x8dc   :  { %v5566_v0 = vpop.f32.mrb[107].mxu0 }
 0x8dd   :  { %v5567_v23 = vadd.f32 %v5566_v0, %v5565_v16 }
 0x8df   :  { %v5568_v4 = vpop.f32.mrb[108].mxu0 }
 0x8e0   :  { %v5569_v56 = vpop.f32.mrb[109].mxu0 }
 0x8e1   :  { %v5570_v49 = vadd.f32 %v5569_v56, %v5568_v4 }
 0x8e3   :  { %v5571_v25 = vpop.f32.mrb[110].mxu0 }
 0x8e4   :  { %v5572_v61 = vpop.f32.mrb[111].mxu0 }
 0x8e5   :  { %v5573_v19 = vadd.f32 %v5572_v61, %v5571_v25 }
 0x8e7   :  { %v5606_v27 = vpop.f32.mrb[92].mxu1 }
 0x8e8   :  { %v5607_v10 = vpop.f32.mrb[93].mxu1 }
 0x8e9   :  { %v5608_v17 = vadd.f32 %v5607_v10, %v5606_v27 }
 0x8eb   :  { %v4663_v57 = vadd.f32 %v5608_v17, %v5564_v33  ;;  %v5609_v21 = vpop.f32.mrb[94].mxu1 }
 0x8ec   :  { %v5610_v37 = vpop.f32.mrb[95].mxu1 }
 0x8ed   :  { %v5611_v63 = vadd.f32 %v5610_v37, %v5609_v21 }
 0x8ef   :  { %v4668_v59 = vadd.f32 %v5611_v63, %v5567_v23  ;;  %v5612_v50 = vpop.f32.mrb[96].mxu1 }
 0x8f0   :  { %v5613_v45 = vpop.f32.mrb[97].mxu1 }
 0x8f1   :  { %v5614_v34 = vadd.f32 %v5613_v45, %v5612_v50 }
 0x8f3   :  { %v4673_v52 = vadd.f32 %v5614_v34, %v5570_v49  ;;  %v5615_v55 = vpop.f32.mrb[98].mxu1 }
 0x8f4   :  { %v5616_v62 = vpop.f32.mrb[99].mxu1 }
 0x8f5   :  { %v5617_v32 = vadd.f32 %v5616_v62, %v5615_v55 }
 0x8f7   :  { %v4678_v14 = vadd.f32 %v5617_v32, %v5573_v19  ;;  %v5650_v40 = vpop.f32.mrb[112].mxu0 }
 0x8f8   :  { %v5651_v28 = vpop.f32.mrb[113].mxu0 }
 0x8f9   :  { %v5652_v60 = vadd.f32 %v5651_v28, %v5650_v40 }
 0x8fb   :  { %v4748_v7 = vadd.f32 %v5652_v60, %v4663_v57  ;;  %v5653_v22 = vpop.f32.mrb[114].mxu0 }
 0x8fc   :  { %v5654_v20 = vpop.f32.mrb[115].mxu0 }
 0x8fd   :  { %v5655_v48 = vadd.f32 %v5654_v20, %v5653_v22 }
 0x8ff   :  { %v4753_v24 = vadd.f32 %v5655_v48, %v4668_v59  ;;  %v5656_v12 = vpop.f32.mrb[116].mxu0 }
 0x900   :  { %v5657_v38 = vpop.f32.mrb[117].mxu0 }
 0x901   :  { %v5658_v46 = vadd.f32 %v5657_v38, %v5656_v12 }
 0x903   :  { %v4758_v6 = vadd.f32 %v5658_v46, %v4673_v52  ;;  %v5659_v5 = vpop.f32.mrb[118].mxu0 }
 0x904   :  { %v5660_v51 = vpop.f32.mrb[119].mxu0 }
 0x905   :  { %v5661_v15 = vadd.f32 %v5660_v51, %v5659_v5 }
 0x907   :  { %v4763_v39 = vadd.f32 %v5661_v15, %v4678_v14 }
 0x908   :  { %v5694_v13 = vpop.f32.mrb[100].mxu1 }
 0x909   :  { %v5695_v54 = vpop.f32.mrb[101].mxu1 }
 0x90a   :  { %v5696_v26 = vadd.f32 %v5695_v54, %v5694_v13 }
 0x90c   :  { %v4833_v2 = vadd.f32 %v5696_v26, %v4748_v7  ;;  %v5697_v18 = vpop.f32.mrb[102].mxu1 }
 0x90d   :  { %v5698_v3 = vpop.f32.mrb[103].mxu1 }
 0x90e   :  { %v5699_v1 = vadd.f32 %v5698_v3, %v5697_v18  ;;  %5778 = vmatprep.mubr.msk.f32.mxu0 %vm205_vm0, %v4833_v2 }
 0x910   :  { %v4838_v36 = vadd.f32 %v5699_v1, %v4753_v24  ;;  %v5700_v42 = vpop.f32.mrb[104].mxu1 }
 0x911   :  { %v5701_v53 = vpop.f32.mrb[105].mxu1 }
 0x912   :  { %v5702_v43 = vadd.f32 %v5701_v53, %v5700_v42  ;;  %5779 = vmatmul.mubr.msk.f32.vlgmr.msra.gmra.mrb[120].mxu0 %vm205_vm0, %v4838_v36 }
 0x914   :  { %v4843_v9 = vadd.f32 %v5702_v43, %v4758_v6  ;;  %v5703_v30 = vpop.f32.mrb[106].mxu1 }
 0x915   :  { %v5704_v29 = vpop.f32.mrb[107].mxu1 }
 0x916   :  { %v5705_v35 = vadd.f32 %v5704_v29, %v5703_v30  ;;  %5781 = vmatprep.mubr.msk.f32.mxu1 %vm205_vm0, %v4843_v9 }
 0x918   :  { %v4848_v41 = vadd.f32 %v5705_v35, %v4763_v39 }
 0x91a   :  { %5782 = vmatmul.mubr.msk.f32.vlgmr.msra.gmra.mrb[108].mxu1 %vm205_vm0, %v4848_v41 }
 0x9e5   :  { %v5780_v31 = vpop.f32.mrb[120].mxu0 }
 0x9e6   :  { %4957 = vst.msk [vmem:[%s9243_s19 + $0x8] sm:$0xff] %vm205_vm0, %v5780_v31  ;;  %v4937_v58 = vpop.f32.mrb[121].mxu0 }
 0x9e7   :  { %4956 = vst.msk [vmem:[%s9243_s19] sm:$0xff] %vm205_vm0, %v4937_v58 }
 0x9ed   :  { %v5783_v11 = vpop.f32.mrb[108].mxu1 }
 0x9ee   :  { %4959 = vst.msk [vmem:[%s9243_s19 + $0x18] sm:$0xff] %vm205_vm0, %v5783_v11  ;;  %v4947_v44 = vpop.f32.mrb[109].mxu1 }
 0x9ef   :  { %4958 = vst.msk [vmem:[%s9243_s19 + $0x10] sm:$0xff] %vm205_vm0, %v4947_v44 }
 0x9f0   :  { %4968 = vsyncpa [#allocation3], 1 }
 0x9f1   :  { %4969 = vsyncpa [#allocation5], 1 }
 0x9f2   :  { %4970 = vsyncpa [#allocation8], 1 }
 0x9f3   :  { %4971 = vsyncpa [#allocation11], 1 }
 0x9f4   :  { %4972 = vsyncpa [#allocation14], 1 }

</bundles_post_ra>
